<compile_context>
chip_gen: v6e
topology: v6e:2x2x1
jax: 0.10.0
libtpu: 0.0.40
codegen_flags: <defaults>
</compile_context>

<pallas_src>
import functools

import jax
import jax.numpy as jnp
from jax import lax
from jax.experimental import pallas as pl
from jax.experimental.pallas import tpu as pltpu

_LANE = 128


def _round_up(x, m):
    return ((x + m - 1) // m) * m


def _largest_divisor(n, cap, multiple_of=1):
    """Largest d <= cap with n % d == 0 and d % multiple_of == 0; falls back to n
    (a full-extent block is always legal)."""
    cap = max(1, min(cap, n))
    for d in range(cap, 0, -1):
        if n % d == 0 and d % multiple_of == 0:
            return d
    return n


def _vmem_limit(*block_bytes):
    """Right-sized VMEM budget: 2x (double buffering) every block + slack."""
    total = int(sum(block_bytes))
    return int(min(56 * 2**20, max(28 * 2**20, 2 * total + 12 * 2**20)))


def _apply_activation(x, activation):
    if activation == "relu":
        return jnp.maximum(x, 0.0)
    if activation == "elu":
        # exp only sees non-positive values -> no overflow in the dead branch.
        return jnp.where(x > 0, x, jnp.exp(jnp.minimum(x, 0.0)) - 1.0)
    if activation is None:
        return x
    raise ValueError("The activation function is not valid.")


# ----------------------------------------------------------------------------
# Pallas kernels
# ----------------------------------------------------------------------------
def _matmul_bias_act_kernel(a_ref, w_ref, b_ref, o_ref, *, activation):
    acc = jnp.dot(a_ref[...], w_ref[...], preferred_element_type=jnp.float32)
    o_ref[...] = _apply_activation(acc + b_ref[...], activation).astype(o_ref.dtype)


def _conv_s2d_kernel(x_ref, w_ref, b_ref, o_ref, *, keff, ho, wo, wo_pad, activation):
    """Fused im2col + matmul for a stride-1 conv on a space-to-depth input view.

    x_ref: (NB, H2, W2p, C4)   w_ref: (keff*keff, C4, Cout)   b_ref: (1, Cout)
    o_ref: (NB, ho, wo, Cout)
    """
    nb = x_ref.shape[0]
    c4 = x_ref.shape[-1]
    cout = w_ref.shape[-1]
    rows = nb * ho * wo_pad                       # wo_pad multiple of 8 -> trivial reshapes
    acc = jnp.zeros((rows, cout), jnp.float32)
    for idx in range(keff * keff):
        ka, kb = idx // keff, idx % keff
        patch = x_ref[:, ka:ka + ho, kb:kb + wo_pad, :]      # (NB, ho, wo_pad, C4)
        patch2d = patch.reshape(rows, c4)                    # layout-trivial
        acc = acc + jnp.dot(patch2d, w_ref[idx],
                            preferred_element_type=jnp.float32)
    acc = _apply_activation(acc + b_ref[...], activation)
    acc = acc.reshape(nb, ho, wo_pad, cout)[:, :, :wo, :]    # drop junk columns
    o_ref[...] = acc.astype(o_ref.dtype)


def _two_matmul_kernel(a_ref, w1_ref, b1_ref, w2_ref, b2_ref, o_ref, *, activation):
    # conv3 (flatten matmul) fused with the final Linear layer.
    h = jnp.dot(a_ref[...], w1_ref[...], preferred_element_type=jnp.float32)
    h = _apply_activation(h + b1_ref[...], activation)
    o = jnp.dot(h.astype(w2_ref.dtype), w2_ref[...],
                preferred_element_type=jnp.float32)
    o_ref[...] = (o + b2_ref[...]).astype(o_ref.dtype)


# ----------------------------------------------------------------------------
# Pallas wrappers
# ----------------------------------------------------------------------------
def _pallas_matmul_bias_act(a, w, bias, *, activation, out_dtype, tm):
    """a: (M, K), w: (K, N), bias: (1, N) f32; M % tm == 0."""
    m, k = a.shape
    n = w.shape[1]
    assert m % tm == 0
    isz = jnp.dtype(a.dtype).itemsize
    osz = jnp.dtype(out_dtype).itemsize
    limit = _vmem_limit(tm * k * isz, k * n * isz, n * 4, tm * n * osz)
    kernel = functools.partial(_matmul_bias_act_kernel, activation=activation)
    return pl.pallas_call(
        kernel,
        out_shape=jax.ShapeDtypeStruct((m, n), out_dtype),
        grid=(m // tm,),
        in_specs=[
            pl.BlockSpec((tm, k), lambda i: (i, 0)),
            pl.BlockSpec((k, n), lambda i: (0, 0)),      # resident across M tiles
            pl.BlockSpec((1, n), lambda i: (0, 0)),
        ],
        out_specs=pl.BlockSpec((tm, n), lambda i: (i, 0)),
        compiler_params=pltpu.CompilerParams(
            dimension_semantics=("parallel",),
            vmem_limit_bytes=limit,
        ),
    )(a, w, bias)


def _pallas_conv_s2d(xs2d, w_eff, bias, *, keff, ho, wo, wo_pad, nb,
                     activation, out_dtype):
    """Fused conv on a space-to-depth view.  xs2d: (N, H2, W2p, C4)."""
    n, h2, w2p, c4 = xs2d.shape
    cout = w_eff.shape[-1]
    assert n % nb == 0
    isz = jnp.dtype(xs2d.dtype).itemsize
    wsz = jnp.dtype(w_eff.dtype).itemsize
    osz = jnp.dtype(out_dtype).itemsize
    limit = _vmem_limit(nb * h2 * w2p * c4 * isz,
                        keff * keff * c4 * cout * wsz,
                        cout * 4,
                        nb * ho * wo * cout * osz,
                        nb * ho * wo_pad * cout * 4)          # f32 accumulator
    kernel = functools.partial(_conv_s2d_kernel, keff=keff, ho=ho, wo=wo,
                               wo_pad=wo_pad, activation=activation)
    return pl.pallas_call(
        kernel,
        out_shape=jax.ShapeDtypeStruct((n, ho, wo, cout), out_dtype),
        grid=(n // nb,),
        in_specs=[
            pl.BlockSpec((nb, h2, w2p, c4), lambda i: (i, 0, 0, 0)),
            pl.BlockSpec((keff * keff, c4, cout), lambda i: (0, 0, 0)),
            pl.BlockSpec((1, cout), lambda i: (0, 0)),
        ],
        out_specs=pl.BlockSpec((nb, ho, wo, cout), lambda i: (i, 0, 0, 0)),
        compiler_params=pltpu.CompilerParams(
            dimension_semantics=("parallel",),
            vmem_limit_bytes=limit,
        ),
    )(xs2d, w_eff, bias)


def _pallas_matmul_act_matmul(a, w1, b1, w2, b2, *, activation, out_dtype, tm):
    """Fused (act(a @ w1 + b1)) @ w2 + b2."""
    m, k = a.shape
    n1 = w1.shape[1]
    n2 = w2.shape[1]
    assert m % tm == 0
    isz = jnp.dtype(a.dtype).itemsize
    wsz = jnp.dtype(w1.dtype).itemsize
    limit = _vmem_limit(tm * k * isz, k * n1 * wsz, n1 * 4,
                        n1 * n2 * wsz, n2 * 4, tm * n2 * 4, tm * n1 * 4)
    kernel = functools.partial(_two_matmul_kernel, activation=activation)
    return pl.pallas_call(
        kernel,
        out_shape=jax.ShapeDtypeStruct((m, n2), out_dtype),
        grid=(m // tm,),
        in_specs=[
            pl.BlockSpec((tm, k), lambda i: (i, 0)),
            pl.BlockSpec((k, n1), lambda i: (0, 0)),
            pl.BlockSpec((1, n1), lambda i: (0, 0)),
            pl.BlockSpec((n1, n2), lambda i: (0, 0)),
            pl.BlockSpec((1, n2), lambda i: (0, 0)),
        ],
        out_specs=pl.BlockSpec((tm, n2), lambda i: (i, 0)),
        compiler_params=pltpu.CompilerParams(
            dimension_semantics=("parallel",),
            vmem_limit_bytes=limit,
        ),
    )(a, w1, b1, w2, b2)


# ----------------------------------------------------------------------------
# Glue: layout / weight prep (pure XLA reshapes; no per-layer channel padding)
# ----------------------------------------------------------------------------
def _conv1_im2col(x_nhw, kh, kw, stride, compute_dtype):
    """x_nhw: (N, Hp, Wp) single-channel, already spatially padded.
    Returns (N*Ho*Wo, KH*KW) with (ki, kj) column ordering (Cin == 1)."""
    n, hp, wp = x_nhw.shape
    ho = (hp - kh) // stride + 1
    wo = (wp - kw) // stride + 1
    cols = []
    for ki in range(kh):
        for kj in range(kw):
            cols.append(x_nhw[:, ki:ki + stride * ho:stride,
                              kj:kj + stride * wo:stride])
    col = jnp.stack(cols, axis=-1)                    # (N, Ho, Wo, KH*KW)
    return col.reshape(n * ho * wo, kh * kw).astype(compute_dtype), ho, wo


def _conv1_weight(w, b, compute_dtype):
    """w: (Cout, 1, 8, 8) torch layout -> (64, Cout), bias -> (1, Cout) f32."""
    cout = w.shape[0]
    w2d = jnp.transpose(w, (2, 3, 1, 0)).reshape(-1, cout).astype(compute_dtype)
    return w2d, b.reshape(1, cout).astype(jnp.float32)


def _space_to_depth2(x):
    """(N, H, W, C) with even H, W -> (N, H//2, W//2, 4C); channel order (p, q, c)."""
    n, h, w, c = x.shape
    x = x.reshape(n, h // 2, 2, w // 2, 2, c)
    x = jnp.transpose(x, (0, 1, 3, 2, 4, 5))
    return x.reshape(n, h // 2, w // 2, 4 * c)


def _conv2_eff_weight(w, b, compute_dtype):
    """Stride-2 conv weight (Cout, Cin, KH, KW), KH/KW even, rewritten as the
    equivalent stride-1 conv over the space-to-depth view:
      returns (keff*keff, 4*Cin, Cout) with row order (p, q, ci) matching s2d."""
    cout, cin, kh, kw = w.shape
    assert kh == kw and kh % 2 == 0
    keff = kh // 2
    wt = jnp.transpose(w, (2, 3, 1, 0))                   # (KH, KW, Cin, Cout)
    wt = wt.reshape(keff, 2, keff, 2, cin, cout)          # (a, p, b, q, ci, co)
    wt = jnp.transpose(wt, (0, 2, 1, 3, 4, 5))            # (a, b, p, q, ci, co)
    wt = wt.reshape(keff * keff, 4 * cin, cout).astype(compute_dtype)
    return wt, b.reshape(1, cout).astype(jnp.float32), keff


def _conv3_fc_weights(w3, b3, w_fc, b_fc, compute_dtype):
    """conv3 (5x5 over a 5x5 map) as a flatten-matmul + fc1 (lane-padded to 128)."""
    cout3, cin3, kh, kw = w3.shape
    w3m = jnp.transpose(w3, (2, 3, 1, 0)).reshape(kh * kw * cin3, cout3)
    w3m = w3m.astype(compute_dtype)
    b3m = b3.reshape(1, cout3).astype(jnp.float32)
    nout = w_fc.shape[0]
    nout_pad = _round_up(nout, _LANE)
    wfc = jnp.pad(w_fc.T, ((0, 0), (0, nout_pad - nout))).astype(compute_dtype)
    bfc = jnp.pad(b_fc, (0, nout_pad - nout)).reshape(1, nout_pad)
    return w3m, b3m, wfc, bfc.astype(jnp.float32), nout, (kh, kw)


# ----------------------------------------------------------------------------
# Parameter init (Glorot/Xavier uniform weights, PyTorch-default bias)
# ----------------------------------------------------------------------------
def _xavier_uniform(key, shape, fan_in, fan_out):
    bound = (6.0 / (fan_in + fan_out)) ** 0.5
    return jax.random.uniform(key, shape, jnp.float32, -bound, bound)


def _bias_uniform(key, shape, fan_in):
    bound = 1.0 / (fan_in ** 0.5)
    return jax.random.uniform(key, shape, jnp.float32, -bound, bound)


def init_params(key, nb_filters=64):
    k = jax.random.split(key, 8)
    nf, nf2 = nb_filters, nb_filters * 2
    p = {}
    p["w1"] = _xavier_uniform(k[0], (nf, 1, 8, 8), 1 * 8 * 8, nf * 8 * 8)
    p["b1"] = _bias_uniform(k[1], (nf,), 1 * 8 * 8)
    p["w2"] = _xavier_uniform(k[2], (nf2, nf, 6, 6), nf * 6 * 6, nf2 * 6 * 6)
    p["b2"] = _bias_uniform(k[3], (nf2,), nf * 6 * 6)
    p["w3"] = _xavier_uniform(k[4], (nf2, nf2, 5, 5), nf2 * 5 * 5, nf2 * 5 * 5)
    p["b3"] = _bias_uniform(k[5], (nf2,), nf2 * 5 * 5)
    p["w_fc"] = _xavier_uniform(k[6], (10, nf2), nf2, 10)   # PyTorch Linear: (out, in)
    p["b_fc"] = _bias_uniform(k[7], (10,), nf2)
    return p


# ----------------------------------------------------------------------------
# Forward pass (matches MNISTClassifier.forward)
# ----------------------------------------------------------------------------
def mnist_classifier_forward(params, x, activation="relu",
                             compute_dtype=jnp.bfloat16):
    """x: (N, 1, 28, 28) NCHW float32 -> logits (N, 10) float32."""
    assert x.ndim == 4 and x.shape[1] == 1 and x.shape[2] == 28 and x.shape[3] == 28
    n = x.shape[0]

    # Pad the (tiny, raw) input batch once so every layer's image-tile count
    # divides it; the padded images are sliced off the logits at the end.
    n_pad = n if n <= 1 else _round_up(n, 2)
    # conv1 tile must give TM1 = nb1*196 divisible by 8 -> nb1 even (or full batch).
    nb1 = _largest_divisor(n_pad, max(1, min(128, n_pad // 2)), multiple_of=2)
    nb2 = _largest_divisor(n_pad, max(1, min(64, n_pad // 2)))
    tm3 = _largest_divisor(n_pad, max(1, min(512, n_pad // 2)), multiple_of=8)
    if n_pad != n:
        x = jnp.pad(x, ((0, n_pad - n), (0, 0), (0, 0), (0, 0)))

    # ---- conv1: XLA im2col (Cin=1 -> K=64, not padded) + fused matmul kernel ----
    x_img = jnp.pad(x[:, 0, :, :], ((0, 0), (3, 3), (3, 3)))          # (Np, 34, 34)
    col1, ho1, wo1 = _conv1_im2col(x_img, 8, 8, 2, compute_dtype)      # (Np*196, 64)
    w1, b1 = _conv1_weight(params["w1"], params["b1"], compute_dtype)
    tm1 = nb1 * ho1 * wo1
    h1 = _pallas_matmul_bias_act(col1, w1, b1, activation=activation,
                                 out_dtype=compute_dtype, tm=tm1)      # (Np*196, nf)
    nf = h1.shape[-1]
    h1 = h1.reshape(n_pad, ho1, wo1, nf)                               # (Np, 14, 14, nf)

    # ---- conv2: fused in-kernel im2col on a space-to-depth view ----
    assert ho1 % 2 == 0 and wo1 % 2 == 0
    w2, b2, keff = _conv2_eff_weight(params["w2"], params["b2"], compute_dtype)
    xs2d = _space_to_depth2(h1)                                        # (Np, 7, 7, 4nf)
    ho2 = xs2d.shape[1] - keff + 1                                     # 5
    wo2 = xs2d.shape[2] - keff + 1                                     # 5
    wo2_pad = _round_up(wo2, 8)                                        # 8
    w2p = (keff - 1) + wo2_pad                                         # 10
    xs2d = jnp.pad(xs2d, ((0, 0), (0, 0), (0, w2p - xs2d.shape[2]), (0, 0)))
    h2 = _pallas_conv_s2d(xs2d, w2, b2, keff=keff, ho=ho2, wo=wo2,
                          wo_pad=wo2_pad, nb=nb2, activation=activation,
                          out_dtype=compute_dtype)                     # (Np, 5, 5, 2nf)

    # ---- conv3 (5x5 over a 5x5 map == NHWC flatten + matmul) fused with fc1 ----
    w3m, b3m, wfc, bfc, nout, (kh3, kw3) = _conv3_fc_weights(
        params["w3"], params["b3"], params["w_fc"], params["b_fc"], compute_dtype)
    assert kh3 == ho2 and kw3 == wo2          # conv3 output is exactly 1x1
    a3 = h2.reshape(n_pad, -1)                                         # (Np, 25*2nf)
    logits = _pallas_matmul_act_matmul(a3, w3m, b3m, wfc, bfc,
                                       activation=activation,
                                       out_dtype=jnp.float32, tm=tm3)
    return logits[:n, :nout]


# ----------------------------------------------------------------------------
# Pure-JAX reference for correctness checks
# ----------------------------------------------------------------------------
def _ref_forward(params, x, activation="relu"):
    act = jax.nn.relu if activation == "relu" else jax.nn.elu

    def conv(h, w, b, stride, pad):
        y = lax.conv_general_dilated(
            h, w, window_strides=(stride, stride),
            padding=((pad, pad), (pad, pad)),
            dimension_numbers=("NCHW", "OIHW", "NCHW"))
        return act(y + b[None, :, None, None])

    h = conv(x, params["w1"], params["b1"], 2, 3)
    h = conv(h, params["w2"], params["b2"], 2, 0)
    h = conv(h, params["w3"], params["b3"], 1, 0)
    flat = h.reshape(h.shape[0], -1)
    return flat @ params["w_fc"].T + params["b_fc"]


if __name__ == "__main__":
    key = jax.random.PRNGKey(0)
    k_param, k_param32, k_x = jax.random.split(key, 3)

    batch = 2
    # 28x28 input is required for the conv stack to reduce to a 1x1 spatial output.
    x = jax.random.normal(k_x, (batch, 1, 28, 28), jnp.float32)
    params = init_params(k_param, nb_filters=64)          # module default

    fwd_bf16 = jax.jit(functools.partial(mnist_classifier_forward,
                                         activation="relu",
                                         compute_dtype=jnp.bfloat16))
    fwd_f32 = jax.jit(functools.partial(mnist_classifier_forward,
                                        activation="relu",
                                        compute_dtype=jnp.float32))
    fwd_f32_elu = jax.jit(functools.partial(mnist_classifier_forward,
                                            activation="elu",
                                            compute_dtype=jnp.float32))

    # Fast path: bf16 operands on the MXU (f32 accumulation).
    logits = jax.block_until_ready(fwd_bf16(params, x))
    assert logits.shape == (batch, 10), logits.shape

    # Tight semantic check: f32 compute path vs pure-JAX reference (relu + elu).
    ref = jax.block_until_ready(_ref_forward(params, x, "relu"))
    out_f32 = jax.block_until_ready(fwd_f32(params, x))
    assert jnp.allclose(out_f32, ref, atol=2e-4, rtol=2e-4), "f32 mismatch vs reference"

    ref_elu = jax.block_until_ready(_ref_forward(params, x, "elu"))
    out_elu = jax.block_until_ready(fwd_f32_elu(params, x))
    assert jnp.allclose(out_elu, ref_elu, atol=2e-4, rtol=2e-4), "elu mismatch vs reference"

    # bf16 fast path: per-logit tolerance (tighter than the previous rel-L2 gate).
    max_err = float(jnp.max(jnp.abs(logits - ref)))
    scale = float(jnp.maximum(jnp.max(jnp.abs(ref)), 1.0))
    assert max_err <= 0.05 * scale + 0.05, f"bf16 per-logit error too large: {max_err}"

    # Exercise the non-128-aligned channel path (2*nb_filters = 64) and the
    # batch-padding / multi-tile path (batch 5 -> padded 6).
    params32 = init_params(k_param32, nb_filters=32)
    out32 = jax.block_until_ready(fwd_f32(params32, x))
    ref32 = jax.block_until_ready(_ref_forward(params32, x, "relu"))
    assert jnp.allclose(out32, ref32, atol=2e-4, rtol=2e-4), "nb_filters=32 mismatch"

    x5 = jax.random.normal(jax.random.PRNGKey(1), (5, 1, 28, 28), jnp.float32)
    out5 = jax.block_until_ready(fwd_f32(params, x5))
    ref5 = jax.block_until_ready(_ref_forward(params, x5, "relu"))
    assert out5.shape == (5, 10)
    assert jnp.allclose(out5, ref5, atol=2e-4, rtol=2e-4), "odd-batch mismatch"

    print("KERNEL_OK")
</pallas_src>

<mosaic_0001>
module attributes {stable_mosaic.version = 11 : i64} {
  func.func @_matmul_bias_act_kernel(%arg0: i32, %arg1: memref<392x64xbf16, #tpu.memory_space<vmem>>, %arg2: memref<64x64xbf16, #tpu.memory_space<vmem>>, %arg3: memref<1x64xf32, #tpu.memory_space<vmem>>, %arg4: memref<392x64xbf16, #tpu.memory_space<vmem>>) attributes {dimension_semantics = [#tpu.dimension_semantics<parallel>], iteration_bounds = array<i64: 1>, scalar_prefetch = 0 : i64, scratch_operands = 0 : i64, tpu.core_type = #tpu.core_type<tc>, window_params = [{transform_indices = @transform_0, window_bounds = array<i64: 392, 64>}, {pipeline_mode = #tpu.pipeline_mode<synchronous>, transform_indices = @transform_1, window_bounds = array<i64: 64, 64>}, {pipeline_mode = #tpu.pipeline_mode<synchronous>, transform_indices = @transform_2, window_bounds = array<i64: 1, 64>}, {transform_indices = @transform_3, window_bounds = array<i64: 392, 64>}]} {
    %c0 = arith.constant 0 : index
    %c0_0 = arith.constant 0 : index
    %0 = vector.load %arg1[%c0, %c0_0] : memref<392x64xbf16, #tpu.memory_space<vmem>>, vector<392x64xbf16>
    %c0_1 = arith.constant 0 : index
    %c0_2 = arith.constant 0 : index
    %1 = vector.load %arg2[%c0_1, %c0_2] : memref<64x64xbf16, #tpu.memory_space<vmem>>, vector<64x64xbf16>
    %cst = arith.constant dense<0.000000e+00> : vector<392x64xf32>
    %2 = tpu.matmul %0, %1, %cst {dimension_numbers = #tpu.dot_dimension_numbers<[1], [0], [0], [1], [0, 0, 1, 1], [], []>} : vector<392x64xbf16>, vector<64x64xbf16>, vector<392x64xf32> -> vector<392x64xf32>
    %c0_3 = arith.constant 0 : index
    %c0_4 = arith.constant 0 : index
    %3 = vector.load %arg3[%c0_3, %c0_4] : memref<1x64xf32, #tpu.memory_space<vmem>>, vector<1x64xf32>
    %4 = vector.broadcast %3 : vector<1x64xf32> to vector<392x64xf32>
    %5 = arith.addf %2, %4 : vector<392x64xf32>
    %cst_5 = arith.constant 0.000000e+00 : f32
    %6 = vector.broadcast %cst_5 : f32 to vector<392x64xf32>
    %7 = arith.maximumf %5, %6 : vector<392x64xf32>
    %8 = arith.truncf %7 : vector<392x64xf32> to vector<392x64xbf16>
    %c0_6 = arith.constant 0 : index
    %c0_7 = arith.constant 0 : index
    %9 = vector.load %arg4[%c0_6, %c0_7] : memref<392x64xbf16, #tpu.memory_space<vmem>>, vector<392x64xbf16>
    tpu.vector_store %arg4[%c0_6, %c0_7], %8 {strides = array<i32>} : memref<392x64xbf16, #tpu.memory_space<vmem>>, vector<392x64xbf16>,
    return
  }
  func.func @transform_0(%arg0: i32) -> (i32, i32) {
    %c0_i32 = arith.constant 0 : i32
    %c0_i32_0 = arith.constant 0 : i32
    return %arg0, %c0_i32 : i32, i32
  }
  func.func @transform_1(%arg0: i32) -> (i32, i32) {
    %c0_i32 = arith.constant 0 : i32
    %c0_i32_0 = arith.constant 0 : i32
    %c0_i32_1 = arith.constant 0 : i32
    return %c0_i32, %c0_i32_0 : i32, i32
  }
  func.func @transform_2(%arg0: i32) -> (i32, i32) {
    %c0_i32 = arith.constant 0 : i32
    %c0_i32_0 = arith.constant 0 : i32
    %c0_i32_1 = arith.constant 0 : i32
    return %c0_i32, %c0_i32_0 : i32, i32
  }
  func.func @transform_3(%arg0: i32) -> (i32, i32) {
    %c0_i32 = arith.constant 0 : i32
    %c0_i32_0 = arith.constant 0 : i32
    return %arg0, %c0_i32 : i32, i32
  }
}

module attributes {stable_mosaic.version = 11 : i64} {
  func.func @_conv_s2d_kernel(%arg0: i32, %arg1: memref<1x7x10x256xbf16, #tpu.memory_space<vmem>>, %arg2: memref<9x256x128xbf16, #tpu.memory_space<vmem>>, %arg3: memref<1x128xf32, #tpu.memory_space<vmem>>, %arg4: memref<1x5x5x128xbf16, #tpu.memory_space<vmem>>) attributes {dimension_semantics = [#tpu.dimension_semantics<parallel>], iteration_bounds = array<i64: 2>, scalar_prefetch = 0 : i64, scratch_operands = 0 : i64, tpu.core_type = #tpu.core_type<tc>, window_params = [{transform_indices = @transform_0, window_bounds = array<i64: 1, 7, 10, 256>}, {pipeline_mode = #tpu.pipeline_mode<synchronous>, transform_indices = @transform_1, window_bounds = array<i64: 9, 256, 128>}, {pipeline_mode = #tpu.pipeline_mode<synchronous>, transform_indices = @transform_2, window_bounds = array<i64: 1, 128>}, {transform_indices = @transform_3, window_bounds = array<i64: 1, 5, 5, 128>}]} {
    %cst = arith.constant 0.000000e+00 : f32
    %0 = vector.broadcast %cst : f32 to vector<40x128xf32>
    %c0 = arith.constant 0 : index
    %c0_0 = arith.constant 0 : index
    %c0_1 = arith.constant 0 : index
    %c0_2 = arith.constant 0 : index
    %1 = vector.load %arg1[%c0, %c0_0, %c0_1, %c0_2] : memref<1x7x10x256xbf16, #tpu.memory_space<vmem>>, vector<1x5x8x256xbf16>
    %2 = vector.shape_cast %1 : vector<1x5x8x256xbf16> to vector<40x256xbf16>
    %c0_3 = arith.constant 0 : index
    %c0_4 = arith.constant 0 : index
    %c0_5 = arith.constant 0 : index
    %3 = vector.load %arg2[%c0_3, %c0_4, %c0_5] : memref<9x256x128xbf16, #tpu.memory_space<vmem>>, vector<1x256x128xbf16>
    %4 = vector.shape_cast %3 : vector<1x256x128xbf16> to vector<256x128xbf16>
    %cst_6 = arith.constant dense<0.000000e+00> : vector<40x128xf32>
    %5 = tpu.matmul %2, %4, %cst_6 {dimension_numbers = #tpu.dot_dimension_numbers<[1], [0], [0], [1], [0, 0, 1, 1], [], []>} : vector<40x256xbf16>, vector<256x128xbf16>, vector<40x128xf32> -> vector<40x128xf32>
    %6 = arith.addf %0, %5 : vector<40x128xf32>
    %c0_7 = arith.constant 0 : index
    %c0_8 = arith.constant 0 : index
    %c1 = arith.constant 1 : index
    %c0_9 = arith.constant 0 : index
    %7 = vector.load %arg1[%c0_7, %c0_8, %c1, %c0_9] : memref<1x7x10x256xbf16, #tpu.memory_space<vmem>>, vector<1x5x8x256xbf16>
    %8 = vector.shape_cast %7 : vector<1x5x8x256xbf16> to vector<40x256xbf16>
    %c1_10 = arith.constant 1 : index
    %c0_11 = arith.constant 0 : index
    %c0_12 = arith.constant 0 : index
    %9 = vector.load %arg2[%c1_10, %c0_11, %c0_12] : memref<9x256x128xbf16, #tpu.memory_space<vmem>>, vector<1x256x128xbf16>
    %10 = vector.shape_cast %9 : vector<1x256x128xbf16> to vector<256x128xbf16>
    %cst_13 = arith.constant dense<0.000000e+00> : vector<40x128xf32>
    %11 = tpu.matmul %8, %10, %cst_13 {dimension_numbers = #tpu.dot_dimension_numbers<[1], [0], [0], [1], [0, 0, 1, 1], [], []>} : vector<40x256xbf16>, vector<256x128xbf16>, vector<40x128xf32> -> vector<40x128xf32>
    %12 = arith.addf %6, %11 : vector<40x128xf32>
    %c0_14 = arith.constant 0 : index
    %c0_15 = arith.constant 0 : index
    %c2 = arith.constant 2 : index
    %c0_16 = arith.constant 0 : index
    %13 = vector.load %arg1[%c0_14, %c0_15, %c2, %c0_16] : memref<1x7x10x256xbf16, #tpu.memory_space<vmem>>, vector<1x5x8x256xbf16>
    %14 = vector.shape_cast %13 : vector<1x5x8x256xbf16> to vector<40x256xbf16>
    %c2_17 = arith.constant 2 : index
    %c0_18 = arith.constant 0 : index
    %c0_19 = arith.constant 0 : index
    %15 = vector.load %arg2[%c2_17, %c0_18, %c0_19] : memref<9x256x128xbf16, #tpu.memory_space<vmem>>, vector<1x256x128xbf16>
    %16 = vector.shape_cast %15 : vector<1x256x128xbf16> to vector<256x128xbf16>
    %cst_20 = arith.constant dense<0.000000e+00> : vector<40x128xf32>
    %17 = tpu.matmul %14, %16, %cst_20 {dimension_numbers = #tpu.dot_dimension_numbers<[1], [0], [0], [1], [0, 0, 1, 1], [], []>} : vector<40x256xbf16>, vector<256x128xbf16>, vector<40x128xf32> -> vector<40x128xf32>
    %18 = arith.addf %12, %17 : vector<40x128xf32>
    %c0_21 = arith.constant 0 : index
    %c1_22 = arith.constant 1 : index
    %c0_23 = arith.constant 0 : index
    %c0_24 = arith.constant 0 : index
    %19 = vector.load %arg1[%c0_21, %c1_22, %c0_23, %c0_24] : memref<1x7x10x256xbf16, #tpu.memory_space<vmem>>, vector<1x5x8x256xbf16>
    %20 = vector.shape_cast %19 : vector<1x5x8x256xbf16> to vector<40x256xbf16>
    %c3 = arith.constant 3 : index
    %c0_25 = arith.constant 0 : index
    %c0_26 = arith.constant 0 : index
    %21 = vector.load %arg2[%c3, %c0_25, %c0_26] : memref<9x256x128xbf16, #tpu.memory_space<vmem>>, vector<1x256x128xbf16>
    %22 = vector.shape_cast %21 : vector<1x256x128xbf16> to vector<256x128xbf16>
    %cst_27 = arith.constant dense<0.000000e+00> : vector<40x128xf32>
    %23 = tpu.matmul %20, %22, %cst_27 {dimension_numbers = #tpu.dot_dimension_numbers<[1], [0], [0], [1], [0, 0, 1, 1], [], []>} : vector<40x256xbf16>, vector<256x128xbf16>, vector<40x128xf32> -> vector<40x128xf32>
    %24 = arith.addf %18, %23 : vector<40x128xf32>
    %c0_28 = arith.constant 0 : index
    %c1_29 = arith.constant 1 : index
    %c1_30 = arith.constant 1 : index
    %c0_31 = arith.constant 0 : index
    %25 = vector.load %arg1[%c0_28, %c1_29, %c1_30, %c0_31] : memref<1x7x10x256xbf16, #tpu.memory_space<vmem>>, vector<1x5x8x256xbf16>
    %26 = vector.shape_cast %25 : vector<1x5x8x256xbf16> to vector<40x256xbf16>
    %c4 = arith.constant 4 : index
    %c0_32 = arith.constant 0 : index
    %c0_33 = arith.constant 0 : index
    %27 = vector.load %arg2[%c4, %c0_32, %c0_33] : memref<9x256x128xbf16, #tpu.memory_space<vmem>>, vector<1x256x128xbf16>
    %28 = vector.shape_cast %27 : vector<1x256x128xbf16> to vector<256x128xbf16>
    %cst_34 = arith.constant dense<0.000000e+00> : vector<40x128xf32>
    %29 = tpu.matmul %26, %28, %cst_34 {dimension_numbers = #tpu.dot_dimension_numbers<[1], [0], [0], [1], [0, 0, 1, 1], [], []>} : vector<40x256xbf16>, vector<256x128xbf16>, vector<40x128xf32> -> vector<40x128xf32>
    %30 = arith.addf %24, %29 : vector<40x128xf32>
    %c0_35 = arith.constant 0 : index
    %c1_36 = arith.constant 1 : index
    %c2_37 = arith.constant 2 : index
    %c0_38 = arith.constant 0 : index
    %31 = vector.load %arg1[%c0_35, %c1_36, %c2_37, %c0_38] : memref<1x7x10x256xbf16, #tpu.memory_space<vmem>>, vector<1x5x8x256xbf16>
    %32 = vector.shape_cast %31 : vector<1x5x8x256xbf16> to vector<40x256xbf16>
    %c5 = arith.constant 5 : index
    %c0_39 = arith.constant 0 : index
    %c0_40 = arith.constant 0 : index
    %33 = vector.load %arg2[%c5, %c0_39, %c0_40] : memref<9x256x128xbf16, #tpu.memory_space<vmem>>, vector<1x256x128xbf16>
    %34 = vector.shape_cast %33 : vector<1x256x128xbf16> to vector<256x128xbf16>
    %cst_41 = arith.constant dense<0.000000e+00> : vector<40x128xf32>
    %35 = tpu.matmul %32, %34, %cst_41 {dimension_numbers = #tpu.dot_dimension_numbers<[1], [0], [0], [1], [0, 0, 1, 1], [], []>} : vector<40x256xbf16>, vector<256x128xbf16>, vector<40x128xf32> -> vector<40x128xf32>
    %36 = arith.addf %30, %35 : vector<40x128xf32>
    %c0_42 = arith.constant 0 : index
    %c2_43 = arith.constant 2 : index
    %c0_44 = arith.constant 0 : index
    %c0_45 = arith.constant 0 : index
    %37 = vector.load %arg1[%c0_42, %c2_43, %c0_44, %c0_45] : memref<1x7x10x256xbf16, #tpu.memory_space<vmem>>, vector<1x5x8x256xbf16>
    %38 = vector.shape_cast %37 : vector<1x5x8x256xbf16> to vector<40x256xbf16>
    %c6 = arith.constant 6 : index
    %c0_46 = arith.constant 0 : index
    %c0_47 = arith.constant 0 : index
    %39 = vector.load %arg2[%c6, %c0_46, %c0_47] : memref<9x256x128xbf16, #tpu.memory_space<vmem>>, vector<1x256x128xbf16>
    %40 = vector.shape_cast %39 : vector<1x256x128xbf16> to vector<256x128xbf16>
    %cst_48 = arith.constant dense<0.000000e+00> : vector<40x128xf32>
    %41 = tpu.matmul %38, %40, %cst_48 {dimension_numbers = #tpu.dot_dimension_numbers<[1], [0], [0], [1], [0, 0, 1, 1], [], []>} : vector<40x256xbf16>, vector<256x128xbf16>, vector<40x128xf32> -> vector<40x128xf32>
    %42 = arith.addf %36, %41 : vector<40x128xf32>
    %c0_49 = arith.constant 0 : index
    %c2_50 = arith.constant 2 : index
    %c1_51 = arith.constant 1 : index
    %c0_52 = arith.constant 0 : index
    %43 = vector.load %arg1[%c0_49, %c2_50, %c1_51, %c0_52] : memref<1x7x10x256xbf16, #tpu.memory_space<vmem>>, vector<1x5x8x256xbf16>
    %44 = vector.shape_cast %43 : vector<1x5x8x256xbf16> to vector<40x256xbf16>
    %c7 = arith.constant 7 : index
    %c0_53 = arith.constant 0 : index
    %c0_54 = arith.constant 0 : index
    %45 = vector.load %arg2[%c7, %c0_53, %c0_54] : memref<9x256x128xbf16, #tpu.memory_space<vmem>>, vector<1x256x128xbf16>
    %46 = vector.shape_cast %45 : vector<1x256x128xbf16> to vector<256x128xbf16>
    %cst_55 = arith.constant dense<0.000000e+00> : vector<40x128xf32>
    %47 = tpu.matmul %44, %46, %cst_55 {dimension_numbers = #tpu.dot_dimension_numbers<[1], [0], [0], [1], [0, 0, 1, 1], [], []>} : vector<40x256xbf16>, vector<256x128xbf16>, vector<40x128xf32> -> vector<40x128xf32>
    %48 = arith.addf %42, %47 : vector<40x128xf32>
    %c0_56 = arith.constant 0 : index
    %c2_57 = arith.constant 2 : index
    %c2_58 = arith.constant 2 : index
    %c0_59 = arith.constant 0 : index
    %49 = vector.load %arg1[%c0_56, %c2_57, %c2_58, %c0_59] : memref<1x7x10x256xbf16, #tpu.memory_space<vmem>>, vector<1x5x8x256xbf16>
    %50 = vector.shape_cast %49 : vector<1x5x8x256xbf16> to vector<40x256xbf16>
    %c8 = arith.constant 8 : index
    %c0_60 = arith.constant 0 : index
    %c0_61 = arith.constant 0 : index
    %51 = vector.load %arg2[%c8, %c0_60, %c0_61] : memref<9x256x128xbf16, #tpu.memory_space<vmem>>, vector<1x256x128xbf16>
    %52 = vector.shape_cast %51 : vector<1x256x128xbf16> to vector<256x128xbf16>
    %cst_62 = arith.constant dense<0.000000e+00> : vector<40x128xf32>
    %53 = tpu.matmul %50, %52, %cst_62 {dimension_numbers = #tpu.dot_dimension_numbers<[1], [0], [0], [1], [0, 0, 1, 1], [], []>} : vector<40x256xbf16>, vector<256x128xbf16>, vector<40x128xf32> -> vector<40x128xf32>
    %54 = arith.addf %48, %53 : vector<40x128xf32>
    %c0_63 = arith.constant 0 : index
    %c0_64 = arith.constant 0 : index
    %55 = vector.load %arg3[%c0_63, %c0_64] : memref<1x128xf32, #tpu.memory_space<vmem>>, vector<1x128xf32>
    %56 = vector.broadcast %55 : vector<1x128xf32> to vector<40x128xf32>
    %57 = arith.addf %54, %56 : vector<40x128xf32>
    %cst_65 = arith.constant 0.000000e+00 : f32
    %58 = vector.broadcast %cst_65 : f32 to vector<40x128xf32>
    %59 = arith.maximumf %57, %58 : vector<40x128xf32>
    %60 = vector.shape_cast %59 : vector<40x128xf32> to vector<1x5x8x128xf32>
    %61 = vector.extract_strided_slice %60 {offsets = [0, 0, 0, 0], sizes = [1, 5, 5, 128], strides = [1, 1, 1, 1]} : vector<1x5x8x128xf32> to vector<1x5x5x128xf32>
    %62 = arith.truncf %61 : vector<1x5x5x128xf32> to vector<1x5x5x128xbf16>
    %c0_66 = arith.constant 0 : index
    %c0_67 = arith.constant 0 : index
    %c0_68 = arith.constant 0 : index
    %c0_69 = arith.constant 0 : index
    %63 = vector.load %arg4[%c0_66, %c0_67, %c0_68, %c0_69] : memref<1x5x5x128xbf16, #tpu.memory_space<vmem>>, vector<1x5x5x128xbf16>
    tpu.vector_store %arg4[%c0_66, %c0_67, %c0_68, %c0_69], %62 {strides = array<i32>} : memref<1x5x5x128xbf16, #tpu.memory_space<vmem>>, vector<1x5x5x128xbf16>,
    return
  }
  func.func @transform_0(%arg0: i32) -> (i32, i32, i32, i32) {
    %c0_i32 = arith.constant 0 : i32
    %c0_i32_0 = arith.constant 0 : i32
    %c0_i32_1 = arith.constant 0 : i32
    %c0_i32_2 = arith.constant 0 : i32
    return %arg0, %c0_i32, %c0_i32_0, %c0_i32_1 : i32, i32, i32, i32
  }
  func.func @transform_1(%arg0: i32) -> (i32, i32, i32) {
    %c0_i32 = arith.constant 0 : i32
    %c0_i32_0 = arith.constant 0 : i32
    %c0_i32_1 = arith.constant 0 : i32
    %c0_i32_2 = arith.constant 0 : i32
    return %c0_i32, %c0_i32_0, %c0_i32_1 : i32, i32, i32
  }
  func.func @transform_2(%arg0: i32) -> (i32, i32) {
    %c0_i32 = arith.constant 0 : i32
    %c0_i32_0 = arith.constant 0 : i32
    %c0_i32_1 = arith.constant 0 : i32
    return %c0_i32, %c0_i32_0 : i32, i32
  }
  func.func @transform_3(%arg0: i32) -> (i32, i32, i32, i32) {
    %c0_i32 = arith.constant 0 : i32
    %c0_i32_0 = arith.constant 0 : i32
    %c0_i32_1 = arith.constant 0 : i32
    %c0_i32_2 = arith.constant 0 : i32
    return %arg0, %c0_i32, %c0_i32_0, %c0_i32_1 : i32, i32, i32, i32
  }
}

module attributes {stable_mosaic.version = 11 : i64} {
  func.func @_two_matmul_kernel(%arg0: i32, %arg1: memref<2x3200xbf16, #tpu.memory_space<vmem>>, %arg2: memref<3200x128xbf16, #tpu.memory_space<vmem>>, %arg3: memref<1x128xf32, #tpu.memory_space<vmem>>, %arg4: memref<128x128xbf16, #tpu.memory_space<vmem>>, %arg5: memref<1x128xf32, #tpu.memory_space<vmem>>, %arg6: memref<2x128xf32, #tpu.memory_space<vmem>>) attributes {dimension_semantics = [#tpu.dimension_semantics<parallel>], iteration_bounds = array<i64: 1>, scalar_prefetch = 0 : i64, scratch_operands = 0 : i64, tpu.core_type = #tpu.core_type<tc>, window_params = [{transform_indices = @transform_0, window_bounds = array<i64: 2, 3200>}, {pipeline_mode = #tpu.pipeline_mode<synchronous>, transform_indices = @transform_1, window_bounds = array<i64: 3200, 128>}, {pipeline_mode = #tpu.pipeline_mode<synchronous>, transform_indices = @transform_2, window_bounds = array<i64: 1, 128>}, {pipeline_mode = #tpu.pipeline_mode<synchronous>, transform_indices = @transform_3, window_bounds = array<i64: 128, 128>}, {pipeline_mode = #tpu.pipeline_mode<synchronous>, transform_indices = @transform_4, window_bounds = array<i64: 1, 128>}, {transform_indices = @transform_5, window_bounds = array<i64: 2, 128>}]} {
    %c0 = arith.constant 0 : index
    %c0_0 = arith.constant 0 : index
    %0 = vector.load %arg1[%c0, %c0_0] : memref<2x3200xbf16, #tpu.memory_space<vmem>>, vector<2x3200xbf16>
    %c0_1 = arith.constant 0 : index
    %c0_2 = arith.constant 0 : index
    %1 = vector.load %arg2[%c0_1, %c0_2] : memref<3200x128xbf16, #tpu.memory_space<vmem>>, vector<3200x128xbf16>
    %cst = arith.constant dense<0.000000e+00> : vector<2x128xf32>
    %2 = tpu.matmul %0, %1, %cst {dimension_numbers = #tpu.dot_dimension_numbers<[1], [0], [0], [1], [0, 0, 1, 1], [], []>} : vector<2x3200xbf16>, vector<3200x128xbf16>, vector<2x128xf32> -> vector<2x128xf32>
    %c0_3 = arith.constant 0 : index
    %c0_4 = arith.constant 0 : index
    %3 = vector.load %arg3[%c0_3, %c0_4] : memref<1x128xf32, #tpu.memory_space<vmem>>, vector<1x128xf32>
    %4 = vector.broadcast %3 : vector<1x128xf32> to vector<2x128xf32>
    %5 = arith.addf %2, %4 : vector<2x128xf32>
    %cst_5 = arith.constant 0.000000e+00 : f32
    %6 = vector.broadcast %cst_5 : f32 to vector<2x128xf32>
    %7 = arith.maximumf %5, %6 : vector<2x128xf32>
    %8 = arith.truncf %7 : vector<2x128xf32> to vector<2x128xbf16>
    %c0_6 = arith.constant 0 : index
    %c0_7 = arith.constant 0 : index
    %9 = vector.load %arg4[%c0_6, %c0_7] : memref<128x128xbf16, #tpu.memory_space<vmem>>, vector<128x128xbf16>
    %cst_8 = arith.constant dense<0.000000e+00> : vector<2x128xf32>
    %10 = tpu.matmul %8, %9, %cst_8 {dimension_numbers = #tpu.dot_dimension_numbers<[1], [0], [0], [1], [0, 0, 1, 1], [], []>} : vector<2x128xbf16>, vector<128x128xbf16>, vector<2x128xf32> -> vector<2x128xf32>
    %c0_9 = arith.constant 0 : index
    %c0_10 = arith.constant 0 : index
    %11 = vector.load %arg5[%c0_9, %c0_10] : memref<1x128xf32, #tpu.memory_space<vmem>>, vector<1x128xf32>
    %12 = vector.broadcast %11 : vector<1x128xf32> to vector<2x128xf32>
    %13 = arith.addf %10, %12 : vector<2x128xf32>
    %c0_11 = arith.constant 0 : index
    %c0_12 = arith.constant 0 : index
    %14 = vector.load %arg6[%c0_11, %c0_12] : memref<2x128xf32, #tpu.memory_space<vmem>>, vector<2x128xf32>
    tpu.vector_store %arg6[%c0_11, %c0_12], %13 {strides = array<i32>} : memref<2x128xf32, #tpu.memory_space<vmem>>, vector<2x128xf32>,
    return
  }
  func.func @transform_0(%arg0: i32) -> (i32, i32) {
    %c0_i32 = arith.constant 0 : i32
    %c0_i32_0 = arith.constant 0 : i32
    return %arg0, %c0_i32 : i32, i32
  }
  func.func @transform_1(%arg0: i32) -> (i32, i32) {
    %c0_i32 = arith.constant 0 : i32
    %c0_i32_0 = arith.constant 0 : i32
    %c0_i32_1 = arith.constant 0 : i32
    return %c0_i32, %c0_i32_0 : i32, i32
  }
  func.func @transform_2(%arg0: i32) -> (i32, i32) {
    %c0_i32 = arith.constant 0 : i32
    %c0_i32_0 = arith.constant 0 : i32
    %c0_i32_1 = arith.constant 0 : i32
    return %c0_i32, %c0_i32_0 : i32, i32
  }
  func.func @transform_3(%arg0: i32) -> (i32, i32) {
    %c0_i32 = arith.constant 0 : i32
    %c0_i32_0 = arith.constant 0 : i32
    %c0_i32_1 = arith.constant 0 : i32
    return %c0_i32, %c0_i32_0 : i32, i32
  }
  func.func @transform_4(%arg0: i32) -> (i32, i32) {
    %c0_i32 = arith.constant 0 : i32
    %c0_i32_0 = arith.constant 0 : i32
    %c0_i32_1 = arith.constant 0 : i32
    return %c0_i32, %c0_i32_0 : i32, i32
  }
  func.func @transform_5(%arg0: i32) -> (i32, i32) {
    %c0_i32 = arith.constant 0 : i32
    %c0_i32_0 = arith.constant 0 : i32
    return %arg0, %c0_i32 : i32, i32
  }
}

</mosaic_0001>

<bundles_post_ra>
// kernel: mnist_classifier_forward.3
= control target key start
LH: loop header
LB: loop body
LE: loop exit
PB: predicated region body
PF: predicated region fallthrough
CT: control target
= control target key end

     0   :  { %v1163_v0 = vmov 0.0   ;;  %vm1164_vm0 = vmmov 0   ;;  %vm226_vm1 = vcmask 523264   ;;  %vm780_vm2 = vcmask 519168   ;;  %s1605_s1 = inlined_call_operand.vmem [shape: bf16[64,64], index: 1, kind: input, shape index: {}]   ;;  %s1606_s0 = inlined_call_operand.vmem [shape: bf16[392,64], index: 0, kind: input, shape index: {}]   ;;  %s1607_s2 = inlined_call_operand.vmem [shape: f32[1,64], index: 2, kind: input, shape index: {}]   ;;  %s1608_s3 = inlined_call_operand.vmem [shape: bf16[392,64], index: 3, kind: output, shape index: {}]  }
   0x1   :  { %1016 = vmatprep.subr.bf16.mxu0 %v1163_v0  ;;  %v1134_v1 = vld [vmem:[%s1605_s1 + $0x18] sm:$0xff]   ;;  %1124 = vmatprep.subr.bf16.mxu1 %v1163_v0  ;;  %v1135_v2 = vld [vmem:[%s1605_s1 + $0x10] sm:$0xff]   ;;  %v1136_v3 = vld [vmem:[%s1605_s1 + $0x8] sm:$0xff]  }
   0x2   :  { %1024 = vmatprep.mubr.msk.bf16.mxu0 %vm1164_vm0, %v1163_v0  ;;  %1076 = vmatprep.mubr.msk.bf16.mxu1 %vm1164_vm0, %v1163_v0  ;;  %v1137_v4 = vld [vmem:[%s1605_s1] sm:$0xff]   ;;  %v1139_v6 = vld [vmem:[%s1606_s0 + $0x68] sm:$0xff]   ;;  %v1141_v8 = vld [vmem:[%s1606_s0 + $0x70] sm:$0xff]  }
   0x3   :  { %1017 = vmatpush3.bf16.msra.mxu0 %v1134_v1  ;;  %1128 = vmatpush3.bf16.msra.mxu1 %v1134_v1  ;;  %v1138_v5 = vld [vmem:[%s1606_s0] sm:$0xff]   ;;  %v1140_v7 = vld [vmem:[%s1606_s0 + $0x8] sm:$0xff]   ;;  %v1142_v9 = vld [vmem:[%s1606_s0 + $0x10] sm:$0xff]  }
   0x4   :  { %1018 = vmatprep.subr.bf16.mxu0 %v1163_v0  ;;  %1125 = vmatprep.subr.bf16.mxu1 %v1163_v0  ;;  %v1143_v10 = vld [vmem:[%s1606_s0 + $0x78] sm:$0xff]   ;;  %v1145_v12 = vld [vmem:[%s1606_s0 + $0x80] sm:$0xff]   ;;  %v1147_v14 = vld [vmem:[%s1606_s0 + $0x88] sm:$0xff]  }
   0x5   :  { %v1144_v11 = vld [vmem:[%s1606_s0 + $0x18] sm:$0xff]   ;;  %v1146_v13 = vld [vmem:[%s1606_s0 + $0x20] sm:$0xff]   ;;  %v1148_v15 = vld [vmem:[%s1606_s0 + $0x28] sm:$0xff]  }
   0x6   :  { %v1149_v16 = vld [vmem:[%s1606_s0 + $0x90] sm:$0xff]   ;;  %v1151_v18 = vld [vmem:[%s1606_s0 + $0x98] sm:$0xff]   ;;  %v1153_v20 = vld [vmem:[%s1606_s0 + $0xa0] sm:$0xff]  }
   0x7   :  { %1019 = vmatpush3.bf16.msra.mxu0 %v1135_v2  ;;  %1129 = vmatpush3.bf16.msra.mxu1 %v1135_v2  ;;  %v1150_v17 = vld [vmem:[%s1606_s0 + $0x30] sm:$0xff]   ;;  %v1152_v19 = vld [vmem:[%s1606_s0 + $0x38] sm:$0xff]   ;;  %v1154_v21 = vld [vmem:[%s1606_s0 + $0x40] sm:$0xff]  }
   0x8   :  { %1020 = vmatprep.subr.bf16.mxu0 %v1163_v0  ;;  %1126 = vmatprep.subr.bf16.mxu1 %v1163_v0  ;;  %v1155_v22 = vld [vmem:[%s1606_s0 + $0xa8] sm:$0xff]   ;;  %v1157_v24 = vld [vmem:[%s1606_s0 + $0xb0] sm:$0xff]   ;;  %v1159_v26 = vld [vmem:[%s1606_s0 + $0xb8] sm:$0xff]  }
   0x9   :  { %v1156_v23 = vld [vmem:[%s1606_s0 + $0x48] sm:$0xff]   ;;  %v1158_v25 = vld [vmem:[%s1606_s0 + $0x50] sm:$0xff]   ;;  %v1160_v27 = vld [vmem:[%s1606_s0 + $0x58] sm:$0xff]  }
   0xa   :  { %v1161_v28 = vld [vmem:[%s1606_s0 + $0xc0] ss:$0 sps:$4 sm:$0xff]  }
   0xb   :  { %1021 = vmatpush3.bf16.msra.mxu0 %v1136_v3  ;;  %1130 = vmatpush3.bf16.msra.mxu1 %v1136_v3  ;;  %v1162_v29 = vld [vmem:[%s1606_s0 + $0x60] sm:$0xff]  }
   0xc   :  { %1022 = vmatprep.subr.bf16.mxu0 %v1163_v0  ;;  %1127 = vmatprep.subr.bf16.mxu1 %v1163_v0  ;;  %v1358_v30 = vld [vmem:[%s1607_s2] ss:$0 sm:$0xff] }
   0xf   :  { %1023 = vmatpush3.bf16.msra.mxu0 %v1137_v4  ;;  %1131 = vmatpush3.bf16.msra.mxu1 %v1137_v4 }
  0x12   :  { %1025 = vmatmul.mubr.msk.bf16.vlgmr.msra.gmra.mxu0 %vm226_vm1, %v1138_v5  ;;  %1077 = vmatmul.mubr.msk.bf16.vlgmr.msra.gmra.mxu1 %vm226_vm1, %v1139_v6 }
  0x13   :  { %1028 = vmatprep.mubr.msk.bf16.mxu0 %vm1164_vm0, %v1163_v0  ;;  %1080 = vmatprep.mubr.msk.bf16.mxu1 %vm1164_vm0, %v1163_v0 }
  0x1a   :  { %1029 = vmatmul.mubr.msk.bf16.gmra.mxu0 %vm226_vm1, %v1140_v7  ;;  %1081 = vmatmul.mubr.msk.bf16.gmra.mxu1 %vm226_vm1, %v1141_v8 }
  0x1b   :  { %1032 = vmatprep.mubr.msk.bf16.mxu0 %vm1164_vm0, %v1163_v0  ;;  %1084 = vmatprep.mubr.msk.bf16.mxu1 %vm1164_vm0, %v1163_v0 }
  0x22   :  { %1033 = vmatmul.mubr.msk.bf16.gmra.mxu0 %vm226_vm1, %v1142_v9  ;;  %1085 = vmatmul.mubr.msk.bf16.gmra.mxu1 %vm226_vm1, %v1143_v10 }
  0x23   :  { %1036 = vmatprep.mubr.msk.bf16.mxu0 %vm1164_vm0, %v1163_v0  ;;  %1088 = vmatprep.mubr.msk.bf16.mxu1 %vm1164_vm0, %v1163_v0 }
  0x2a   :  { %1037 = vmatmul.mubr.msk.bf16.gmra.mxu0 %vm226_vm1, %v1144_v11  ;;  %1089 = vmatmul.mubr.msk.bf16.gmra.mxu1 %vm226_vm1, %v1145_v12 }
  0x2b   :  { %1040 = vmatprep.mubr.msk.bf16.mxu0 %vm1164_vm0, %v1163_v0  ;;  %1092 = vmatprep.mubr.msk.bf16.mxu1 %vm1164_vm0, %v1163_v0 }
  0x32   :  { %1041 = vmatmul.mubr.msk.bf16.gmra.mxu0 %vm226_vm1, %v1146_v13  ;;  %1093 = vmatmul.mubr.msk.bf16.gmra.mxu1 %vm226_vm1, %v1147_v14 }
  0x33   :  { %1044 = vmatprep.mubr.msk.bf16.mxu0 %vm1164_vm0, %v1163_v0  ;;  %1096 = vmatprep.mubr.msk.bf16.mxu1 %vm1164_vm0, %v1163_v0 }
  0x3a   :  { %1045 = vmatmul.mubr.msk.bf16.gmra.mxu0 %vm226_vm1, %v1148_v15  ;;  %1097 = vmatmul.mubr.msk.bf16.gmra.mxu1 %vm226_vm1, %v1149_v16 }
  0x3b   :  { %1048 = vmatprep.mubr.msk.bf16.mxu0 %vm1164_vm0, %v1163_v0  ;;  %1100 = vmatprep.mubr.msk.bf16.mxu1 %vm1164_vm0, %v1163_v0 }
  0x42   :  { %1049 = vmatmul.mubr.msk.bf16.gmra.mxu0 %vm226_vm1, %v1150_v17  ;;  %1101 = vmatmul.mubr.msk.bf16.gmra.mxu1 %vm226_vm1, %v1151_v18 }
  0x43   :  { %1052 = vmatprep.mubr.msk.bf16.mxu0 %vm1164_vm0, %v1163_v0  ;;  %1104 = vmatprep.mubr.msk.bf16.mxu1 %vm1164_vm0, %v1163_v0 }
  0x4a   :  { %1053 = vmatmul.mubr.msk.bf16.gmra.mxu0 %vm226_vm1, %v1152_v19  ;;  %1105 = vmatmul.mubr.msk.bf16.gmra.mxu1 %vm226_vm1, %v1153_v20 }
  0x4b   :  { %1056 = vmatprep.mubr.msk.bf16.mxu0 %vm1164_vm0, %v1163_v0  ;;  %1108 = vmatprep.mubr.msk.bf16.mxu1 %vm1164_vm0, %v1163_v0 }
  0x52   :  { %1057 = vmatmul.mubr.msk.bf16.gmra.mxu0 %vm226_vm1, %v1154_v21  ;;  %1109 = vmatmul.mubr.msk.bf16.gmra.mxu1 %vm226_vm1, %v1155_v22 }
  0x53   :  { %1060 = vmatprep.mubr.msk.bf16.mxu0 %vm1164_vm0, %v1163_v0  ;;  %1112 = vmatprep.mubr.msk.bf16.mxu1 %vm1164_vm0, %v1163_v0 }
  0x5a   :  { %1061 = vmatmul.mubr.msk.bf16.gmra.mxu0 %vm226_vm1, %v1156_v23  ;;  %1113 = vmatmul.mubr.msk.bf16.gmra.mxu1 %vm226_vm1, %v1157_v24 }
  0x5b   :  { %1064 = vmatprep.mubr.msk.bf16.mxu0 %vm1164_vm0, %v1163_v0  ;;  %1116 = vmatprep.mubr.msk.bf16.mxu1 %vm1164_vm0, %v1163_v0 }
  0x62   :  { %1065 = vmatmul.mubr.msk.bf16.gmra.mxu0 %vm226_vm1, %v1158_v25  ;;  %1117 = vmatmul.mubr.msk.bf16.gmra.mxu1 %vm226_vm1, %v1159_v26 }
  0x63   :  { %1068 = vmatprep.mubr.msk.bf16.mxu0 %vm1164_vm0, %v1163_v0  ;;  %1120 = vmatprep.mubr.msk.bf16.mxu1 %vm1164_vm0, %v1163_v0 }
  0x6a   :  { %1069 = vmatmul.mubr.msk.bf16.gmra.mxu0 %vm226_vm1, %v1160_v27  ;;  %1121 = vmatmul.mubr.msk.bf16.gmra.mxu1 %vm226_vm1, %v1161_v28 }
  0x6b   :  { %1072 = vmatprep.mubr.msk.bf16.mxu0 %vm1164_vm0, %v1163_v0 }
  0x72   :  { %1073 = vmatmul.mubr.msk.bf16.gmra.mxu0 %vm226_vm1, %v1162_v29 }
  0xd2   :  { %v336_v31 = vpop.f32.mrf.mxu0  ;;  %v440_v32 = vpop.f32.mrf.mxu1 }
  0xd3   :  { %v337_v33 = vadd.f32 %v1358_v30, %v336_v31  ;;  %v441_v34 = vadd.f32 %v1358_v30, %v440_v32 }
  0xd4   :  { %v1026_v35 = vpop.f32.mrf.mxu0  ;;  %v1078_v36 = vpop.f32.mrf.mxu1 }
  0xd5   :  { %v534_v37 = vmax.f32 %v337_v33, 0.0  ;;  %v560_v38 = vmax.f32 %v441_v34, 0.0 }
  0xd6   :  { %v339_v39 = vpop.f32.mrf.mxu0  ;;  %v443_v40 = vpop.f32.mrf.mxu1 }
  0xd7   :  { %v938_v41 = vpack.c.bf16 %v534_v37, %v534_v37  ;;  %v340_v42 = vadd.f32 %v1358_v30, %v339_v39  ;;  %v964_v43 = vpack.c.bf16 %v560_v38, %v560_v38  ;;  %v444_v44 = vadd.f32 %v1358_v30, %v443_v40 }
  0xd8   :  { %v1027_v45 = vpop.f32.mrf.mxu0  ;;  %v1079_v46 = vpop.f32.mrf.mxu1 }
  0xd9   :  { %781 = vst.msk [vmem:[%s1608_s3] sm:$0xf] %vm780_vm2, %v938_v41  ;;  %v535_v47 = vmax.f32 %v340_v42, 0.0  ;;  %807 = vst.msk [vmem:[%s1608_s3 + $0x68] sm:$0xf] %vm780_vm2, %v964_v43  ;;  %v561_v48 = vmax.f32 %v444_v44, 0.0 }
  0xda   :  { %v344_v49 = vpop.f32.mrf.mxu0  ;;  %v448_v50 = vpop.f32.mrf.mxu1 }
  0xdb   :  { %v939_v51 = vpack.c.bf16 %v535_v47, %v535_v47  ;;  %v345_v52 = vadd.f32 %v1358_v30, %v344_v49  ;;  %v965_v53 = vpack.c.bf16 %v561_v48, %v561_v48  ;;  %v449_v54 = vadd.f32 %v1358_v30, %v448_v50 }
  0xdc   :  { %v1030_v55 = vpop.f32.mrf.mxu0  ;;  %v1082_v56 = vpop.f32.mrf.mxu1 }
  0xdd   :  { %782 = vst.msk [vmem:[%s1608_s3 + $0x4] sm:$0xf] %vm780_vm2, %v939_v51  ;;  %v536_v57 = vmax.f32 %v345_v52, 0.0  ;;  %808 = vst.msk [vmem:[%s1608_s3 + $0x6c] sm:$0xf] %vm780_vm2, %v965_v53  ;;  %v562_v58 = vmax.f32 %v449_v54, 0.0 }
  0xde   :  { %v347_v59 = vpop.f32.mrf.mxu0  ;;  %v451_v60 = vpop.f32.mrf.mxu1 }
  0xdf   :  { %v940_v61 = vpack.c.bf16 %v536_v57, %v536_v57  ;;  %v348_v62 = vadd.f32 %v1358_v30, %v347_v59  ;;  %v966_v63 = vpack.c.bf16 %v562_v58, %v562_v58  ;;  %v452_v0 = vadd.f32 %v1358_v30, %v451_v60 }
  0xe0   :  { %v1031_v1 = vpop.f32.mrf.mxu0  ;;  %v1083_v2 = vpop.f32.mrf.mxu1 }
  0xe1   :  { %783 = vst.msk [vmem:[%s1608_s3 + $0x8] sm:$0xf] %vm780_vm2, %v940_v61  ;;  %v537_v3 = vmax.f32 %v348_v62, 0.0  ;;  %809 = vst.msk [vmem:[%s1608_s3 + $0x70] sm:$0xf] %vm780_vm2, %v966_v63  ;;  %v563_v4 = vmax.f32 %v452_v0, 0.0 }
  0xe2   :  { %v352_v5 = vpop.f32.mrf.mxu0  ;;  %v456_v6 = vpop.f32.mrf.mxu1 }
  0xe3   :  { %v941_v7 = vpack.c.bf16 %v537_v3, %v537_v3  ;;  %v353_v8 = vadd.f32 %v1358_v30, %v352_v5  ;;  %v967_v9 = vpack.c.bf16 %v563_v4, %v563_v4  ;;  %v457_v10 = vadd.f32 %v1358_v30, %v456_v6 }
  0xe4   :  { %v1034_v11 = vpop.f32.mrf.mxu0  ;;  %v1086_v12 = vpop.f32.mrf.mxu1 }
  0xe5   :  { %784 = vst.msk [vmem:[%s1608_s3 + $0xc] sm:$0xf] %vm780_vm2, %v941_v7  ;;  %v538_v13 = vmax.f32 %v353_v8, 0.0  ;;  %810 = vst.msk [vmem:[%s1608_s3 + $0x74] sm:$0xf] %vm780_vm2, %v967_v9  ;;  %v564_v14 = vmax.f32 %v457_v10, 0.0 }
  0xe6   :  { %v355_v15 = vpop.f32.mrf.mxu0  ;;  %v459_v16 = vpop.f32.mrf.mxu1 }
  0xe7   :  { %v942_v17 = vpack.c.bf16 %v538_v13, %v538_v13  ;;  %v356_v18 = vadd.f32 %v1358_v30, %v355_v15  ;;  %v968_v19 = vpack.c.bf16 %v564_v14, %v564_v14  ;;  %v460_v20 = vadd.f32 %v1358_v30, %v459_v16 }
  0xe8   :  { %v1035_v21 = vpop.f32.mrf.mxu0  ;;  %v1087_v22 = vpop.f32.mrf.mxu1 }
  0xe9   :  { %785 = vst.msk [vmem:[%s1608_s3 + $0x10] sm:$0xf] %vm780_vm2, %v942_v17  ;;  %v539_v23 = vmax.f32 %v356_v18, 0.0  ;;  %811 = vst.msk [vmem:[%s1608_s3 + $0x78] sm:$0xf] %vm780_vm2, %v968_v19  ;;  %v565_v24 = vmax.f32 %v460_v20, 0.0 }
  0xea   :  { %v360_v25 = vpop.f32.mrf.mxu0  ;;  %v464_v26 = vpop.f32.mrf.mxu1 }
  0xeb   :  { %v943_v27 = vpack.c.bf16 %v539_v23, %v539_v23  ;;  %v361_v28 = vadd.f32 %v1358_v30, %v360_v25  ;;  %v969_v29 = vpack.c.bf16 %v565_v24, %v565_v24  ;;  %v465_v31 = vadd.f32 %v1358_v30, %v464_v26 }
  0xec   :  { %v1038_v32 = vpop.f32.mrf.mxu0  ;;  %v1090_v33 = vpop.f32.mrf.mxu1 }
  0xed   :  { %786 = vst.msk [vmem:[%s1608_s3 + $0x14] sm:$0xf] %vm780_vm2, %v943_v27  ;;  %v540_v34 = vmax.f32 %v361_v28, 0.0  ;;  %812 = vst.msk [vmem:[%s1608_s3 + $0x7c] sm:$0xf] %vm780_vm2, %v969_v29  ;;  %v566_v35 = vmax.f32 %v465_v31, 0.0 }
  0xee   :  { %v363_v36 = vpop.f32.mrf.mxu0  ;;  %v467_v37 = vpop.f32.mrf.mxu1 }
  0xef   :  { %v944_v38 = vpack.c.bf16 %v540_v34, %v540_v34  ;;  %v364_v39 = vadd.f32 %v1358_v30, %v363_v36  ;;  %v970_v40 = vpack.c.bf16 %v566_v35, %v566_v35  ;;  %v468_v41 = vadd.f32 %v1358_v30, %v467_v37 }
  0xf0   :  { %v1039_v42 = vpop.f32.mrf.mxu0  ;;  %v1091_v43 = vpop.f32.mrf.mxu1 }
  0xf1   :  { %787 = vst.msk [vmem:[%s1608_s3 + $0x18] sm:$0xf] %vm780_vm2, %v944_v38  ;;  %v541_v44 = vmax.f32 %v364_v39, 0.0  ;;  %813 = vst.msk [vmem:[%s1608_s3 + $0x80] sm:$0xf] %vm780_vm2, %v970_v40  ;;  %v567_v45 = vmax.f32 %v468_v41, 0.0 }
  0xf2   :  { %v368_v46 = vpop.f32.mrf.mxu0  ;;  %v472_v47 = vpop.f32.mrf.mxu1 }
  0xf3   :  { %v945_v48 = vpack.c.bf16 %v541_v44, %v541_v44  ;;  %v369_v49 = vadd.f32 %v1358_v30, %v368_v46  ;;  %v971_v50 = vpack.c.bf16 %v567_v45, %v567_v45  ;;  %v473_v51 = vadd.f32 %v1358_v30, %v472_v47 }
  0xf4   :  { %v1042_v52 = vpop.f32.mrf.mxu0  ;;  %v1094_v53 = vpop.f32.mrf.mxu1 }
  0xf5   :  { %788 = vst.msk [vmem:[%s1608_s3 + $0x1c] sm:$0xf] %vm780_vm2, %v945_v48  ;;  %v542_v54 = vmax.f32 %v369_v49, 0.0  ;;  %814 = vst.msk [vmem:[%s1608_s3 + $0x84] sm:$0xf] %vm780_vm2, %v971_v50  ;;  %v568_v55 = vmax.f32 %v473_v51, 0.0 }
  0xf6   :  { %v371_v56 = vpop.f32.mrf.mxu0  ;;  %v475_v57 = vpop.f32.mrf.mxu1 }
  0xf7   :  { %v946_v58 = vpack.c.bf16 %v542_v54, %v542_v54  ;;  %v372_v59 = vadd.f32 %v1358_v30, %v371_v56  ;;  %v972_v60 = vpack.c.bf16 %v568_v55, %v568_v55  ;;  %v476_v61 = vadd.f32 %v1358_v30, %v475_v57 }
  0xf8   :  { %v1043_v62 = vpop.f32.mrf.mxu0  ;;  %v1095_v63 = vpop.f32.mrf.mxu1 }
  0xf9   :  { %789 = vst.msk [vmem:[%s1608_s3 + $0x20] sm:$0xf] %vm780_vm2, %v946_v58  ;;  %v543_v0 = vmax.f32 %v372_v59, 0.0  ;;  %815 = vst.msk [vmem:[%s1608_s3 + $0x88] sm:$0xf] %vm780_vm2, %v972_v60  ;;  %v569_v1 = vmax.f32 %v476_v61, 0.0 }
  0xfa   :  { %v376_v2 = vpop.f32.mrf.mxu0  ;;  %v480_v3 = vpop.f32.mrf.mxu1 }
  0xfb   :  { %v947_v4 = vpack.c.bf16 %v543_v0, %v543_v0  ;;  %v377_v5 = vadd.f32 %v1358_v30, %v376_v2  ;;  %v973_v6 = vpack.c.bf16 %v569_v1, %v569_v1  ;;  %v481_v7 = vadd.f32 %v1358_v30, %v480_v3 }
  0xfc   :  { %v1046_v8 = vpop.f32.mrf.mxu0  ;;  %v1098_v9 = vpop.f32.mrf.mxu1 }
  0xfd   :  { %790 = vst.msk [vmem:[%s1608_s3 + $0x24] sm:$0xf] %vm780_vm2, %v947_v4  ;;  %v544_v10 = vmax.f32 %v377_v5, 0.0  ;;  %816 = vst.msk [vmem:[%s1608_s3 + $0x8c] sm:$0xf] %vm780_vm2, %v973_v6  ;;  %v570_v11 = vmax.f32 %v481_v7, 0.0 }
  0xfe   :  { %v379_v12 = vpop.f32.mrf.mxu0  ;;  %v483_v13 = vpop.f32.mrf.mxu1 }
  0xff   :  { %v948_v14 = vpack.c.bf16 %v544_v10, %v544_v10  ;;  %v380_v15 = vadd.f32 %v1358_v30, %v379_v12  ;;  %v974_v16 = vpack.c.bf16 %v570_v11, %v570_v11  ;;  %v484_v17 = vadd.f32 %v1358_v30, %v483_v13 }
 0x100   :  { %v1047_v18 = vpop.f32.mrf.mxu0  ;;  %v1099_v19 = vpop.f32.mrf.mxu1 }
 0x101   :  { %791 = vst.msk [vmem:[%s1608_s3 + $0x28] sm:$0xf] %vm780_vm2, %v948_v14  ;;  %v545_v20 = vmax.f32 %v380_v15, 0.0  ;;  %817 = vst.msk [vmem:[%s1608_s3 + $0x90] sm:$0xf] %vm780_vm2, %v974_v16  ;;  %v571_v21 = vmax.f32 %v484_v17, 0.0 }
 0x102   :  { %v384_v22 = vpop.f32.mrf.mxu0  ;;  %v488_v23 = vpop.f32.mrf.mxu1 }
 0x103   :  { %v949_v24 = vpack.c.bf16 %v545_v20, %v545_v20  ;;  %v385_v25 = vadd.f32 %v1358_v30, %v384_v22  ;;  %v975_v26 = vpack.c.bf16 %v571_v21, %v571_v21  ;;  %v489_v27 = vadd.f32 %v1358_v30, %v488_v23 }
 0x104   :  { %v1050_v28 = vpop.f32.mrf.mxu0  ;;  %v1102_v29 = vpop.f32.mrf.mxu1 }
 0x105   :  { %792 = vst.msk [vmem:[%s1608_s3 + $0x2c] sm:$0xf] %vm780_vm2, %v949_v24  ;;  %v546_v31 = vmax.f32 %v385_v25, 0.0  ;;  %818 = vst.msk [vmem:[%s1608_s3 + $0x94] sm:$0xf] %vm780_vm2, %v975_v26  ;;  %v572_v32 = vmax.f32 %v489_v27, 0.0 }
 0x106   :  { %v387_v33 = vpop.f32.mrf.mxu0  ;;  %v491_v34 = vpop.f32.mrf.mxu1 }
 0x107   :  { %v950_v35 = vpack.c.bf16 %v546_v31, %v546_v31  ;;  %v388_v36 = vadd.f32 %v1358_v30, %v387_v33  ;;  %v976_v37 = vpack.c.bf16 %v572_v32, %v572_v32  ;;  %v492_v38 = vadd.f32 %v1358_v30, %v491_v34 }
 0x108   :  { %v1051_v39 = vpop.f32.mrf.mxu0  ;;  %v1103_v40 = vpop.f32.mrf.mxu1 }
 0x109   :  { %793 = vst.msk [vmem:[%s1608_s3 + $0x30] sm:$0xf] %vm780_vm2, %v950_v35  ;;  %v547_v41 = vmax.f32 %v388_v36, 0.0  ;;  %819 = vst.msk [vmem:[%s1608_s3 + $0x98] sm:$0xf] %vm780_vm2, %v976_v37  ;;  %v573_v42 = vmax.f32 %v492_v38, 0.0 }
 0x10a   :  { %v392_v43 = vpop.f32.mrf.mxu0  ;;  %v496_v44 = vpop.f32.mrf.mxu1 }
 0x10b   :  { %v951_v45 = vpack.c.bf16 %v547_v41, %v547_v41  ;;  %v393_v46 = vadd.f32 %v1358_v30, %v392_v43  ;;  %v977_v47 = vpack.c.bf16 %v573_v42, %v573_v42  ;;  %v497_v48 = vadd.f32 %v1358_v30, %v496_v44 }
 0x10c   :  { %v1054_v49 = vpop.f32.mrf.mxu0  ;;  %v1106_v50 = vpop.f32.mrf.mxu1 }
 0x10d   :  { %794 = vst.msk [vmem:[%s1608_s3 + $0x34] sm:$0xf] %vm780_vm2, %v951_v45  ;;  %v548_v51 = vmax.f32 %v393_v46, 0.0  ;;  %820 = vst.msk [vmem:[%s1608_s3 + $0x9c] sm:$0xf] %vm780_vm2, %v977_v47  ;;  %v574_v52 = vmax.f32 %v497_v48, 0.0 }
 0x10e   :  { %v395_v53 = vpop.f32.mrf.mxu0  ;;  %v499_v54 = vpop.f32.mrf.mxu1 }
 0x10f   :  { %v952_v55 = vpack.c.bf16 %v548_v51, %v548_v51  ;;  %v396_v56 = vadd.f32 %v1358_v30, %v395_v53  ;;  %v978_v57 = vpack.c.bf16 %v574_v52, %v574_v52  ;;  %v500_v58 = vadd.f32 %v1358_v30, %v499_v54 }
 0x110   :  { %v1055_v59 = vpop.f32.mrf.mxu0  ;;  %v1107_v60 = vpop.f32.mrf.mxu1 }
 0x111   :  { %795 = vst.msk [vmem:[%s1608_s3 + $0x38] sm:$0xf] %vm780_vm2, %v952_v55  ;;  %v549_v61 = vmax.f32 %v396_v56, 0.0  ;;  %821 = vst.msk [vmem:[%s1608_s3 + $0xa0] sm:$0xf] %vm780_vm2, %v978_v57  ;;  %v575_v62 = vmax.f32 %v500_v58, 0.0 }
 0x112   :  { %v400_v63 = vpop.f32.mrf.mxu0  ;;  %v504_v0 = vpop.f32.mrf.mxu1 }
 0x113   :  { %v953_v1 = vpack.c.bf16 %v549_v61, %v549_v61  ;;  %v401_v2 = vadd.f32 %v1358_v30, %v400_v63  ;;  %v979_v3 = vpack.c.bf16 %v575_v62, %v575_v62  ;;  %v505_v4 = vadd.f32 %v1358_v30, %v504_v0 }
 0x114   :  { %v1058_v5 = vpop.f32.mrf.mxu0  ;;  %v1110_v6 = vpop.f32.mrf.mxu1 }
 0x115   :  { %796 = vst.msk [vmem:[%s1608_s3 + $0x3c] sm:$0xf] %vm780_vm2, %v953_v1  ;;  %v550_v7 = vmax.f32 %v401_v2, 0.0  ;;  %822 = vst.msk [vmem:[%s1608_s3 + $0xa4] sm:$0xf] %vm780_vm2, %v979_v3  ;;  %v576_v8 = vmax.f32 %v505_v4, 0.0 }
 0x116   :  { %v403_v9 = vpop.f32.mrf.mxu0  ;;  %v507_v10 = vpop.f32.mrf.mxu1 }
 0x117   :  { %v954_v11 = vpack.c.bf16 %v550_v7, %v550_v7  ;;  %v404_v12 = vadd.f32 %v1358_v30, %v403_v9  ;;  %v980_v13 = vpack.c.bf16 %v576_v8, %v576_v8  ;;  %v508_v14 = vadd.f32 %v1358_v30, %v507_v10 }
 0x118   :  { %v1059_v15 = vpop.f32.mrf.mxu0  ;;  %v1111_v16 = vpop.f32.mrf.mxu1 }
 0x119   :  { %797 = vst.msk [vmem:[%s1608_s3 + $0x40] sm:$0xf] %vm780_vm2, %v954_v11  ;;  %v551_v17 = vmax.f32 %v404_v12, 0.0  ;;  %823 = vst.msk [vmem:[%s1608_s3 + $0xa8] sm:$0xf] %vm780_vm2, %v980_v13  ;;  %v577_v18 = vmax.f32 %v508_v14, 0.0 }
 0x11a   :  { %v408_v19 = vpop.f32.mrf.mxu0  ;;  %v512_v20 = vpop.f32.mrf.mxu1 }
 0x11b   :  { %v955_v21 = vpack.c.bf16 %v551_v17, %v551_v17  ;;  %v409_v22 = vadd.f32 %v1358_v30, %v408_v19  ;;  %v981_v23 = vpack.c.bf16 %v577_v18, %v577_v18  ;;  %v513_v24 = vadd.f32 %v1358_v30, %v512_v20 }
 0x11c   :  { %v1062_v25 = vpop.f32.mrf.mxu0  ;;  %v1114_v26 = vpop.f32.mrf.mxu1 }
 0x11d   :  { %798 = vst.msk [vmem:[%s1608_s3 + $0x44] sm:$0xf] %vm780_vm2, %v955_v21  ;;  %v552_v27 = vmax.f32 %v409_v22, 0.0  ;;  %824 = vst.msk [vmem:[%s1608_s3 + $0xac] sm:$0xf] %vm780_vm2, %v981_v23  ;;  %v578_v28 = vmax.f32 %v513_v24, 0.0 }
 0x11e   :  { %v411_v29 = vpop.f32.mrf.mxu0  ;;  %v515_v31 = vpop.f32.mrf.mxu1 }
 0x11f   :  { %v956_v32 = vpack.c.bf16 %v552_v27, %v552_v27  ;;  %v412_v33 = vadd.f32 %v1358_v30, %v411_v29  ;;  %v982_v34 = vpack.c.bf16 %v578_v28, %v578_v28  ;;  %v516_v35 = vadd.f32 %v1358_v30, %v515_v31 }
 0x120   :  { %v1063_v36 = vpop.f32.mrf.mxu0  ;;  %v1115_v37 = vpop.f32.mrf.mxu1 }
 0x121   :  { %799 = vst.msk [vmem:[%s1608_s3 + $0x48] sm:$0xf] %vm780_vm2, %v956_v32  ;;  %v553_v38 = vmax.f32 %v412_v33, 0.0  ;;  %825 = vst.msk [vmem:[%s1608_s3 + $0xb0] sm:$0xf] %vm780_vm2, %v982_v34  ;;  %v579_v39 = vmax.f32 %v516_v35, 0.0 }
 0x122   :  { %v416_v40 = vpop.f32.mrf.mxu0  ;;  %v520_v41 = vpop.f32.mrf.mxu1 }
 0x123   :  { %v957_v42 = vpack.c.bf16 %v553_v38, %v553_v38  ;;  %v417_v43 = vadd.f32 %v1358_v30, %v416_v40  ;;  %v983_v44 = vpack.c.bf16 %v579_v39, %v579_v39  ;;  %v521_v45 = vadd.f32 %v1358_v30, %v520_v41 }
 0x124   :  { %v1066_v46 = vpop.f32.mrf.mxu0  ;;  %v1118_v47 = vpop.f32.mrf.mxu1 }
 0x125   :  { %800 = vst.msk [vmem:[%s1608_s3 + $0x4c] sm:$0xf] %vm780_vm2, %v957_v42  ;;  %v554_v48 = vmax.f32 %v417_v43, 0.0  ;;  %826 = vst.msk [vmem:[%s1608_s3 + $0xb4] sm:$0xf] %vm780_vm2, %v983_v44  ;;  %v580_v49 = vmax.f32 %v521_v45, 0.0 }
 0x126   :  { %v419_v50 = vpop.f32.mrf.mxu0  ;;  %v523_v51 = vpop.f32.mrf.mxu1 }
 0x127   :  { %v958_v52 = vpack.c.bf16 %v554_v48, %v554_v48  ;;  %v420_v53 = vadd.f32 %v1358_v30, %v419_v50  ;;  %v984_v54 = vpack.c.bf16 %v580_v49, %v580_v49  ;;  %v524_v55 = vadd.f32 %v1358_v30, %v523_v51 }
 0x128   :  { %v1067_v56 = vpop.f32.mrf.mxu0  ;;  %v1119_v57 = vpop.f32.mrf.mxu1 }
 0x129   :  { %801 = vst.msk [vmem:[%s1608_s3 + $0x50] sm:$0xf] %vm780_vm2, %v958_v52  ;;  %v555_v58 = vmax.f32 %v420_v53, 0.0  ;;  %827 = vst.msk [vmem:[%s1608_s3 + $0xb8] sm:$0xf] %vm780_vm2, %v984_v54  ;;  %v581_v59 = vmax.f32 %v524_v55, 0.0 }
 0x12a   :  { %v424_v60 = vpop.f32.mrf.mxu0  ;;  %v528_v61 = vpop.f32.mrf.mxu1 }
 0x12b   :  { %v959_v62 = vpack.c.bf16 %v555_v58, %v555_v58  ;;  %v425_v63 = vadd.f32 %v1358_v30, %v424_v60  ;;  %v985_v0 = vpack.c.bf16 %v581_v59, %v581_v59  ;;  %v529_v1 = vadd.f32 %v1358_v30, %v528_v61 }
 0x12c   :  { %v1070_v2 = vpop.f32.mrf.mxu0  ;;  %v1122_v3 = vpop.f32.mrf.mxu1 }
 0x12d   :  { %802 = vst.msk [vmem:[%s1608_s3 + $0x54] sm:$0xf] %vm780_vm2, %v959_v62  ;;  %v556_v4 = vmax.f32 %v425_v63, 0.0  ;;  %828 = vst.msk [vmem:[%s1608_s3 + $0xbc] sm:$0xf] %vm780_vm2, %v985_v0  ;;  %v582_v5 = vmax.f32 %v529_v1, 0.0 }
 0x12e   :  { %v427_v6 = vpop.f32.mrf.mxu0  ;;  %v531_v7 = vpop.f32.mrf.mxu1 }
 0x12f   :  { %v960_v8 = vpack.c.bf16 %v556_v4, %v556_v4  ;;  %v428_v9 = vadd.f32 %v1358_v30, %v427_v6  ;;  %v986_v10 = vpack.c.bf16 %v582_v5, %v582_v5 }
 0x130   :  { %v1071_v11 = vpop.f32.mrf.mxu0  ;;  %v1123_v12 = vpop.f32.mrf.mxu1 }
 0x131   :  { %803 = vst.msk [vmem:[%s1608_s3 + $0x58] sm:$0xf] %vm780_vm2, %v960_v8  ;;  %v557_v13 = vmax.f32 %v428_v9, 0.0  ;;  %829 = vst.msk [vmem:[%s1608_s3 + $0xc0] sm:$0xf] %vm780_vm2, %v986_v10 }
 0x132   :  { %v432_v14 = vpop.f32.mrf.mxu0 }
 0x133   :  { %v961_v15 = vpack.c.bf16 %v557_v13, %v557_v13  ;;  %v433_v16 = vadd.f32 %v1358_v30, %v432_v14 }
 0x134   :  { %v1074_v17 = vpop.f32.mrf.mxu0 }
 0x135   :  { %804 = vst.msk [vmem:[%s1608_s3 + $0x5c] sm:$0xf] %vm780_vm2, %v961_v15  ;;  %v558_v18 = vmax.f32 %v433_v16, 0.0 }
 0x136   :  { %v435_v19 = vpop.f32.mrf.mxu0 }
 0x137   :  { %v962_v20 = vpack.c.bf16 %v558_v18, %v558_v18  ;;  %v436_v21 = vadd.f32 %v1358_v30, %v435_v19 }
 0x138   :  { %v1075_v22 = vpop.f32.mrf.mxu0 }
 0x139   :  { %805 = vst.msk [vmem:[%s1608_s3 + $0x60] sm:$0xf] %vm780_vm2, %v962_v20  ;;  %v559_v23 = vmax.f32 %v436_v21, 0.0 }
 0x13b   :  { %v963_v24 = vpack.c.bf16 %v559_v23, %v559_v23 }
 0x13d   :  { %806 = vst.msk [vmem:[%s1608_s3 + $0x64] sm:$0xf] %vm780_vm2, %v963_v24 }

// kernel: mnist_classifier_forward.4
= control target key start
LH: loop header
LB: loop body
LE: loop exit
PB: predicated region body
PF: predicated region fallthrough
CT: control target
= control target key end

     0   :  { %s3582_s12 = smov 0   ;;  %s4326_s0 = inlined_call_operand.vmem [shape: bf16[2,7,10,256], index: 0, kind: input, shape index: {}]   ;;  %s4327_s1 = inlined_call_operand.vmem [shape: bf16[9,256,128], index: 1, kind: input, shape index: {}]   ;;  %s4328_s2 = inlined_call_operand.vmem [shape: f32[1,128], index: 2, kind: input, shape index: {}]   ;;  %s4329_s3 = inlined_call_operand.vmem [shape: bf16[2,5,5,128], index: 3, kind: output, shape index: {}]  }
   0x1 LB: > { %s2541_s13 = sadd.s32 4294967295, %s3560_s12   ;;  %p2545_p0 = scmp.ge.s32.totalorder %s3560_s12, 1  ;;  %s3560_s12 = sphi %s3582_s12, %s13_s12  }
   0x2   : > { %p137_p1 = scmp.lt.s32.totalorder %s3560_s12, 3 }
   0x4   : > { %p138_p2 = pnand %p2545_p0, %p137_p1 }
   0x5   : > { %p161_p3 = scmp.lt.s32.totalorder (!%p138_p2), %s2541_s13, 1 }
   0x6   : > { %141 = sbr.rel (%p138_p2) target bundleno = 391 (0x187), region = 32 }
   0xb   : > { %v3392_v0 = vld [vmem:[%s4327_s1 + $0xf8] sm:$0xff]   ;;  %v3396_v4 = vld [vmem:[%s4327_s1 + $0xf0] sm:$0xff]   ;;  %v3400_v8 = vld [vmem:[%s4327_s1 + $0xe8] sm:$0xff]   ;;  %s4337_s13 = smov (!%p161_p3, %s2541_s13), 1  ;;  %vm214_vm0 = vsmask.f32 3328 }
   0xc   : > { %v3393_v1 = vld [vmem:[%s4327_s1 + $0x78] sm:$0xff]   ;;  %3060 = vmatprep.subr.bf16.mxu0 %v3392_v0  ;;  %v3397_v5 = vld [vmem:[%s4327_s1 + $0x70] sm:$0xff]   ;;  %v3401_v9 = vld [vmem:[%s4327_s1 + $0x68] sm:$0xff]   ;;  %s3382_s16 = smul.u32 112, %s4337_s13  ;;  %vm215_vm1 = vsmask.f32 7440 }
   0xd   : > { %v3394_v2 = vld [vmem:[%s4327_s1 + $0xb8] sm:$0xff]   ;;  %3094 = vmatprep.subr.bf16.mxu1 %v3393_v1  ;;  %v3398_v6 = vld [vmem:[%s4327_s1 + $0xb0] sm:$0xff]   ;;  %v3402_v10 = vld [vmem:[%s4327_s1 + $0xa8] sm:$0xff]   ;;  %vm688_vm3 = vcmask 1042432   ;;  %vm689_vm4 = vcmask 1046532  }
   0xe   : > { %v3395_v3 = vld [vmem:[%s4327_s1 + $0x38] sm:$0xff]   ;;  %3061 = vmatpush3.bf16.msra.mxu0 %v3394_v2  ;;  %v3399_v7 = vld [vmem:[%s4327_s1 + $0x30] sm:$0xff]   ;;  %v3403_v11 = vld [vmem:[%s4327_s1 + $0x28] sm:$0xff]   ;;  %s3690_s27 = scalar_lea.vmem %s4326_s0, %s3382_s16  ;;  %vm2469_vm6 = vsmask.f32 2304 }
   0xf   : > { %3095 = vmatpush3.bf16.msra.mxu1 %v3395_v3  ;;  %3062 = vmatprep.subr.bf16.mxu0 %v3396_v4  ;;  %v3404_v12 = vld [vmem:[%s4327_s1 + $0xe0] sm:$0xff]   ;;  %v3408_v16 = vld [vmem:[%s4327_s1 + $0xd8] sm:$0xff]   ;;  %v3412_v20 = vld [vmem:[%s4327_s1 + $0xd0] sm:$0xff]  }
  0x10   : > { %3096 = vmatprep.subr.bf16.mxu1 %v3397_v5  ;;  %v3405_v13 = vld [vmem:[%s4327_s1 + $0x60] sm:$0xff]   ;;  %v3409_v17 = vld [vmem:[%s4327_s1 + $0x58] sm:$0xff]   ;;  %v3413_v21 = vld [vmem:[%s4327_s1 + $0x50] sm:$0xff]  }
  0x11   : > { %v3406_v14 = vld [vmem:[%s4327_s1 + $0xa0] sm:$0xff]   ;;  %v3410_v18 = vld [vmem:[%s4327_s1 + $0x98] sm:$0xff]   ;;  %v3414_v22 = vld [vmem:[%s4327_s1 + $0x90] sm:$0xff]  }
  0x12   : > { %3063 = vmatpush3.bf16.msra.mxu0 %v3398_v6  ;;  %v3407_v15 = vld [vmem:[%s4327_s1 + $0x20] sm:$0xff]   ;;  %v3411_v19 = vld [vmem:[%s4327_s1 + $0x18] sm:$0xff]   ;;  %v3415_v23 = vld [vmem:[%s4327_s1 + $0x10] sm:$0xff]  }
  0x13   : > { %3097 = vmatpush3.bf16.msra.mxu1 %v3399_v7  ;;  %3064 = vmatprep.subr.bf16.mxu0 %v3400_v8  ;;  %v3416_v24 = vld [vmem:[%s4327_s1 + $0xc8] sm:$0xff]   ;;  %v3420_v28 = vld [vmem:[%s4327_s1 + $0xc0] sm:$0xff]   ;;  %v3700_v33 = vld [vmem:[%s3690_s27 + $0x10] sm:$0xff] }
  0x14   : > { %3098 = vmatprep.subr.bf16.mxu1 %v3401_v9  ;;  %v3417_v25 = vld [vmem:[%s4327_s1 + $0x48] sm:$0xff]   ;;  %v3421_v29 = vld [vmem:[%s4327_s1 + $0x40] sm:$0xff]   ;;  %v3706_v35 = vld [vmem:[%s3690_s27 + $0x18] sm:$0x11]  ;;  %v232_v40 = vshrl.u32 %v3700_v33, 16  ;;  %v235_v41 = vshll.u32 %v3700_v33, 16 }
  0x15   : > { %v3418_v26 = vld [vmem:[%s4327_s1 + $0x88] sm:$0xff]   ;;  %v3422_v30 = vld [vmem:[%s4327_s1 + $0x80] sm:$0xff]   ;;  %v241_v42 = vshll.u32 %v3706_v35, 16  ;;  %v3426_v48 = vld [vmem:[%s4327_s1 + $0x178] sm:$0xff]  }
  0x16   : > { %3065 = vmatpush3.bf16.msra.mxu0 %v3402_v10  ;;  %v3419_v27 = vld [vmem:[%s4327_s1 + $0x8] sm:$0xff]   ;;  %v3423_v31 = vld [vmem:[%s4327_s1] sm:$0xff]   ;;  %v234_v46 = vrot.slane %v232_v40, 4  ;;  %v237_v47 = vrot.slane %v235_v41, 5  ;;  %v3427_v49 = vld [vmem:[%s4327_s1 + $0x1f8] sm:$0xff]  }
  0x17   : > { %3099 = vmatpush3.bf16.msra.mxu1 %v3403_v11  ;;  %3066 = vmatprep.subr.bf16.mxu0 %v3404_v12  ;;  %v172_v32 = vld [vmem:[%s3690_s27] sm:$0xff]  ;;  %v3703_v34 = vld [vmem:[%s3690_s27 + $0x8] sm:$0x11]  ;;  %vm3721_vm2 = vmor %vm214_vm0, %vm215_vm1  ;;  %v243_v54 = vrot.slane %v241_v42, 5 }
  0x18   : > { %3100 = vmatprep.subr.bf16.mxu1 %v3405_v13  ;;  %v218_v36 = vshrl.u32 %v172_v32, 16  ;;  %v221_v37 = vshll.u32 %v172_v32, 16  ;;  %v2603_v38 = vcombine.high %v172_v32, %v3700_v33  ;;  %v227_v39 = vshll.u32 %v3703_v34, 16  ;;  %v3429_v56 = vld [vmem:[%s4327_s1 + $0x1b8] sm:$0xff]   ;;  %v3431_v59 = vld [vmem:[%s4327_s1 + $0x1f0] sm:$0xff]   ;;  %v3435_v3 = vld [vmem:[%s4327_s1 + $0x1e8] sm:$0xff]  }
  0x19   : > { %v2602_v51 = vcombine.low %v172_v32, %v3700_v33  ;;  %v238_v53 = vor.u32 %v237_v47, %v234_v46  ;;  %v3428_v61 = vld [vmem:[%s4327_s1 + $0x138] sm:$0xff]   ;;  %v3433_v0 = vld [vmem:[%s4327_s1 + $0x1b0] sm:$0xff]   ;;  %v3434_v4 = vld [vmem:[%s4327_s1 + $0x168] sm:$0xff]  }
  0x1a   : > { %3067 = vmatpush3.bf16.msra.mxu0 %v3406_v14  ;;  %v220_v43 = vrot.slane %v218_v36, 4  ;;  %v223_v44 = vrot.slane %v221_v37, 5  ;;  %649 = vmatprep.mubr.bf16.mxu1 %v2603_v38  ;;  %v229_v45 = vrot.slane %v227_v39, 5  ;;  %v3430_v1 = vld [vmem:[%s4327_s1 + $0x170] sm:$0xff]   ;;  %v3437_v5 = vld [vmem:[%s4327_s1 + $0x1a8] sm:$0xff]   ;;  %v3760_v6 = vld [vmem:[%s3690_s27 + $0x20] sm:$0xff] }
  0x1b   : > { %3101 = vmatpush3.bf16.msra.mxu1 %v3407_v15  ;;  %3068 = vmatprep.subr.bf16.mxu0 %v3408_v16  ;;  %v3728_v57 = vrot.slane %v238_v53, 4  ;;  %v3432_v2 = vld [vmem:[%s4327_s1 + $0x130] sm:$0xff]   ;;  %v3766_v8 = vld [vmem:[%s3690_s27 + $0x28] sm:$0x11]  ;;  %v3769_v9 = vld [vmem:[%s3690_s27 + $0x38] sm:$0x11] }
  0x1c   : > { %3102 = vmatprep.subr.bf16.mxu1 %v3409_v17  ;;  %v224_v50 = vor.u32 %v223_v44, %v220_v43  ;;  %v3763_v7 = vld [vmem:[%s3690_s27 + $0x30] sm:$0xff]  ;;  %v246_v10 = vshrl.u32 %v3760_v6, 16  ;;  %v249_v11 = vshll.u32 %v3760_v6, 16  ;;  %v255_v12 = vshll.u32 %v3766_v8, 16  ;;  %v3436_v15 = vld [vmem:[%s4327_s1 + $0x128] sm:$0xff]   ;;  %v3444_v36 = vld [vmem:[%s4327_s1 + $0x158] sm:$0xff]  }
  0x1d   : > { %v244_v60 = vsel %vm3721_vm2, %v3728_v57, %v243_v54  ;;  %v260_v13 = vshrl.u32 %v3763_v7, 16  ;;  %v263_v14 = vshll.u32 %v3763_v7, 16  ;;  %v269_v17 = vshll.u32 %v3769_v9, 16  ;;  %v3445_v37 = vld [vmem:[%s4327_s1 + $0x1d8] sm:$0xff]   ;;  %v3819_v44 = vld [vmem:[%s3690_s27 + $0x40] sm:$0xff]  ;;  %v3452_v53 = vld [vmem:[%s4327_s1 + $0x110] sm:$0xff]  }
  0x1e   : > { %3069 = vmatpush3.bf16.msra.mxu0 %v3410_v18  ;;  %v225_v55 = vrot.slane %v224_v50, 4  ;;  %v248_v16 = vrot.slane %v246_v10, 4  ;;  %v2605_v18 = vcombine.high %v3760_v6, %v3763_v7  ;;  %v3446_v40 = vld [vmem:[%s4327_s1 + $0x118] sm:$0xff]   ;;  %v277_v46 = vshll.u32 %v3819_v44, 16  ;;  %v3451_v50 = vld [vmem:[%s4327_s1 + $0x1d0] sm:$0xff]   ;;  %vm3850_vm5 = vmor %vm688_vm3, %vm689_vm4 }
  0x1f   : > { %3103 = vmatpush3.bf16.msra.mxu1 %v3411_v19  ;;  %3070 = vmatprep.subr.bf16.mxu0 %v3412_v20  ;;  %v2604_v19 = vcombine.low %v3760_v6, %v3763_v7  ;;  %v3441_v20 = vld [vmem:[%s4327_s1 + $0x1e0] sm:$0xff]   ;;  %v3447_v43 = vld [vmem:[%s4327_s1 + $0x198] sm:$0xff]   ;;  %v2607_v47 = vcombine.high %v3819_v44, %v3819_v44  ;;  %vm4293_vm7 = vmand %vm688_vm3, %vm2469_vm6 }
  0x20   : > { %3104 = vmatprep.subr.bf16.mxu1 %v3413_v21  ;;  %v230_v58 = vsel %vm3721_vm2, %v225_v55, %v229_v45  ;;  %v251_v21 = vrot.slane %v249_v11, 5  ;;  %v274_v45 = vshrl.u32 %v3819_v44, 16  ;;  %v3453_v55 = vld [vmem:[%s4327_s1 + $0x190] sm:$0xff]   ;;  %v3459_v10 = vld [vmem:[%s4327_s1 + $0x1c0] sm:$0xff]   ;;  %v693_v11 = vrot.slane %v3703_v34, 5 }
  0x21   : > { %v2580_v62 = vcombine.low %v230_v58, %v244_v60  ;;  %v2581_v63 = vcombine.high %v230_v58, %v244_v60  ;;  %v279_v58 = vrot.slane %v277_v46, 5  ;;  %v3454_v60 = vld [vmem:[%s4327_s1 + $0x148] sm:$0xff]  }
  0x22   : > { %3071 = vmatpush3.bf16.msra.mxu0 %v3414_v22  ;;  %v262_v22 = vrot.slane %v260_v13, 4  ;;  %v276_v54 = vrot.slane %v274_v45, 4  ;;  %v3475_v46 = vld [vmem:[%s4327_s1 + $0x228] sm:$0xff]  }
  0x23   : > { %3105 = vmatpush3.bf16.msra.mxu1 %v3415_v23  ;;  %3072 = vmatprep.subr.bf16.mxu0 %v3416_v24  ;;  %v265_v23 = vrot.slane %v263_v14, 5  ;;  %v3440_v24 = vld [vmem:[%s4327_s1 + $0x160] sm:$0xff]  }
  0x24   : > { %3106 = vmatprep.subr.bf16.mxu1 %v3417_v25  ;;  %470 = vmatprep.mubr.bf16.mxu0 %v2581_v63  ;;  %v257_v25 = vrot.slane %v255_v12, 5  ;;  %v3455_v63 = vld [vmem:[%s4327_s1 + $0x1c8] sm:$0xff]   ;;  %v3460_v14 = vld [vmem:[%s4327_s1 + $0x100] sm:$0xff]  }
  0x26   : > { %3073 = vmatpush3.bf16.msra.mxu0 %v3418_v26  ;;  %v271_v26 = vrot.slane %v269_v17, 5  ;;  %v673_v17 = vld [vmem:[%s3690_s27] sm:$0xee] }
  0x27   : > { %3107 = vmatpush3.bf16.msra.mxu1 %v3419_v27  ;;  %3074 = vmatprep.subr.bf16.mxu0 %v3420_v28  ;;  %v252_v27 = vor.u32 %v251_v21, %v248_v16  ;;  %v266_v28 = vor.u32 %v265_v23, %v262_v22  ;;  %v3461_v16 = vld [vmem:[%s4327_s1 + $0x180] sm:$0xff]   ;;  %v2624_v34 = vrot.slane %v673_v17, 9  ;;  %v3465_v21 = vld [vmem:[%s4327_s1 + $0x2f8] sm:$0xff]  }
  0x28   : > { %3108 = vmatprep.subr.bf16.mxu1 %v3421_v29  ;;  %v3442_v29 = vld [vmem:[%s4327_s1 + $0x120] sm:$0xff]  }
  0x29   : > { %v3798_v32 = vrot.slane %v266_v28, 4  ;;  %v694_v22 = vsel %vm3850_vm5, %v2624_v34, %v693_v11  ;;  %v3468_v28 = vld [vmem:[%s4327_s1 + $0x270] sm:$0xff]   ;;  %v3496_v17 = vld [vmem:[%s4327_s1 + $0x240] sm:$0xff]  }
  0x2a   : > { %3075 = vmatpush3.bf16.msra.mxu0 %v3422_v30  ;;  %v3443_v30 = vld [vmem:[%s4327_s1 + $0x1a0] sm:$0xff]   ;;  %v3490_v11 = vld [vmem:[%s4327_s1 + $0x210] sm:$0xff]  }
  0x2b   : > { %3109 = vmatpush3.bf16.msra.mxu1 %v3423_v31  ;;  %3128 = vmatprep.subr.bf16.mxu0 %v3426_v48  ;;  %v3796_v31 = vrot.slane %v252_v27, 4  ;;  %v272_v39 = vsel %vm3721_vm2, %v3798_v32, %v271_v26  ;;  %v2606_v48 = vcombine.low %v3819_v44, %v3819_v44  ;;  %v3466_v26 = vld [vmem:[%s4327_s1 + $0x238] sm:$0xff]   ;;  %v3469_v27 = vld [vmem:[%s4327_s1 + $0x2f0] sm:$0xff]   ;;  %v3498_v34 = vld [vmem:[%s4327_s1 + $0x200] sm:$0xff]  }
  0x2c   : > { %3162 = vmatprep.subr.bf16.mxu1 %v3427_v49  ;;  %v3450_v49 = vld [vmem:[%s4327_s1 + $0x150] sm:$0xff]  }
  0x2d   : > { %471 = vmatmul.mubr.bf16.vlgmr.msra.gmra.mxu0 %v2580_v62  ;;  %v258_v38 = vsel %vm3721_vm2, %v3796_v31, %v257_v25  ;;  %v280_v62 = vor.u32 %v279_v58, %v276_v54  ;;  %v677_v54 = vld [vmem:[%s3690_s27 + $0x40] sm:$0xee]  ;;  %v3482_v58 = vld [vmem:[%s4327_s1 + $0x258] sm:$0xff]  }
  0x2e   : > { %650 = vmatmul.mubr.bf16.vlgmr.msra.gmra.mxu1 %v2602_v51  ;;  %3129 = vmatpush3.bf16.msra.mxu0 %v3428_v61  ;;  %v2583_v41 = vcombine.high %v258_v38, %v272_v39  ;;  %v2582_v42 = vcombine.low %v258_v38, %v272_v39  ;;  %v2721_v51 = vcombine.high %v3700_v33, %v3760_v6  ;;  %v705_v38 = vrot.slane %v3769_v9, 5  ;;  %v676_v39 = vld [vmem:[%s3690_s27 + $0x30] sm:$0xee] }
  0x2f   : > { %3163 = vmatpush3.bf16.msra.mxu1 %v3429_v56  ;;  %3130 = vmatprep.subr.bf16.mxu0 %v3430_v1  ;;  %v3842_v56 = vld [vmem:[%s3690_s27 + $0x48] sm:$0x11] }
  0x30   : > { %3164 = vmatprep.subr.bf16.mxu1 %v3431_v59  ;;  %657 = vmatprep.mubr.bf16.mxu1 %v2605_v18  ;;  %v283_v59 = vshll.u32 %v3842_v56, 16  ;;  %v3456_v1 = vld [vmem:[%s4327_s1 + $0x108] sm:$0xff]   ;;  %v674_v18 = vld [vmem:[%s3690_s27 + $0x10] sm:$0xee] }
  0x31   : > { %478 = vmatprep.mubr.bf16.mxu0 %v2583_v41  ;;  %v2722_v41 = vcombine.low %v3763_v7, %v3819_v44 }
  0x32   : > { %3131 = vmatpush3.bf16.msra.mxu0 %v3432_v2  ;;  %v3860_v2 = vrot.slane %v280_v62, 4 }
  0x33   : > { %3165 = vmatpush3.bf16.msra.mxu1 %v3433_v0  ;;  %3132 = vmatprep.subr.bf16.mxu0 %v3434_v4  ;;  %v285_v0 = vrot.slane %v283_v59, 5  ;;  %v3458_v4 = vld [vmem:[%s4327_s1 + $0x140] sm:$0xff]   ;;  %v3483_v59 = vld [vmem:[%s4327_s1 + $0x2d8] sm:$0xff]  }
  0x34   : > { %3166 = vmatprep.subr.bf16.mxu1 %v3435_v3  ;;  %v3457_v3 = vld [vmem:[%s4327_s1 + $0x188] sm:$0xff]  }
  0x35   : > { %479 = vmatmul.mubr.bf16.gmra.mxu0 %v2582_v42  ;;  %v2627_v42 = vrot.slane %v676_v39, 9 }
  0x36   : > { %658 = vmatmul.mubr.bf16.gmra.mxu1 %v2604_v19  ;;  %3133 = vmatpush3.bf16.msra.mxu0 %v3436_v15  ;;  %v697_v15 = vrot.slane %v3706_v35, 5  ;;  %v2625_v19 = vrot.slane %v674_v18, 9  ;;  %v3464_v35 = vld [vmem:[%s4327_s1 + $0x278] sm:$0xff]   ;;  %v3497_v18 = vld [vmem:[%s4327_s1 + $0x2c0] sm:$0xff]  }
  0x37   : > { %3167 = vmatpush3.bf16.msra.mxu1 %v3437_v5  ;;  %3134 = vmatprep.subr.bf16.mxu0 %v3440_v24  ;;  %v286_v5 = vsel %vm3721_vm2, %v3860_v2, %v285_v0  ;;  %v2723_v24 = vcombine.high %v3763_v7, %v3819_v44  ;;  %v706_v45 = vsel %vm3850_vm5, %v2627_v42, %v705_v38  ;;  %v3502_v42 = vld [vmem:[%s4327_s1 + $0x338] sm:$0xff]  }
  0x38   : > { %3168 = vmatprep.subr.bf16.mxu1 %v3441_v20  ;;  %665 = vmatprep.mubr.bf16.mxu1 %v2607_v47  ;;  %v2585_v12 = vcombine.high %v286_v5, %v286_v5  ;;  %v2584_v13 = vcombine.low %v286_v5, %v286_v5  ;;  %v2720_v20 = vcombine.low %v3700_v33, %v3760_v6  ;;  %v3467_v6 = vld [vmem:[%s4327_s1 + $0x2b8] sm:$0xff]   ;;  %v3476_v47 = vld [vmem:[%s4327_s1 + $0x2a8] sm:$0xff]   ;;  %v3488_v5 = vld [vmem:[%s4327_s1 + $0x250] sm:$0xff]  }
  0x39   : > { %v698_v23 = vsel %vm3850_vm5, %v2625_v19, %v697_v15  ;;  %v3494_v15 = vld [vmem:[%s4327_s1 + $0x208] sm:$0xff]   ;;  %v3499_v19 = vld [vmem:[%s4327_s1 + $0x280] sm:$0xff]  }
  0x3a   : > { %3135 = vmatpush3.bf16.msra.mxu0 %v3442_v29  ;;  %486 = vmatprep.mubr.bf16.mxu0 %v2585_v12  ;;  %v2662_v33 = vcombine.high %v694_v22, %v698_v23  ;;  %v2661_v25 = vcombine.low %v694_v22, %v698_v23  ;;  %v701_v29 = vrot.slane %v3766_v8, 5  ;;  %v3472_v8 = vld [vmem:[%s4327_s1 + $0x268] sm:$0xff]   ;;  %v3491_v12 = vld [vmem:[%s4327_s1 + $0x290] sm:$0xff]  }
  0x3b   : > { %3169 = vmatpush3.bf16.msra.mxu1 %v3443_v30  ;;  %3136 = vmatprep.subr.bf16.mxu0 %v3444_v36  ;;  %v3470_v30 = vld [vmem:[%s4327_s1 + $0x230] sm:$0xff]  }
  0x3c   : > { %3170 = vmatprep.subr.bf16.mxu1 %v3445_v37  ;;  %v3471_v36 = vld [vmem:[%s4327_s1 + $0x2b0] sm:$0xff]   ;;  %v675_v37 = vld [vmem:[%s3690_s27 + $0x20] sm:$0xee] }
  0x3d   : > { %487 = vmatmul.mubr.bf16.gmra.mxu0 %v2584_v13  ;;  %v3492_v13 = vld [vmem:[%s4327_s1 + $0x248] sm:$0xff]   ;;  %v2806_v22 = vld [vmem:[%s3690_s27 + $0x10] sm:$0xee] }
  0x3e   : > { %3137 = vmatpush3.bf16.msra.mxu0 %v3446_v40  ;;  %666 = vmatmul.mubr.bf16.gmra.mxu1 %v2606_v48  ;;  %v2626_v40 = vrot.slane %v675_v37, 9  ;;  %v3478_v48 = vld [vmem:[%s4327_s1 + $0x260] sm:$0xff]   ;;  %v3501_v37 = vld [vmem:[%s4327_s1 + $0x3f8] sm:$0xff]  }
  0x3f   : > { %3171 = vmatpush3.bf16.msra.mxu1 %v3447_v43  ;;  %3138 = vmatprep.subr.bf16.mxu0 %v3450_v49  ;;  %v3473_v43 = vld [vmem:[%s4327_s1 + $0x2e8] sm:$0xff]   ;;  %v3479_v49 = vld [vmem:[%s4327_s1 + $0x2e0] sm:$0xff]  }
  0x40   : > { %3172 = vmatprep.subr.bf16.mxu1 %v3451_v50  ;;  %1117 = vmatprep.mubr.bf16.mxu1 %v2721_v51  ;;  %v702_v9 = vsel %vm3850_vm5, %v2626_v40, %v701_v29  ;;  %v3480_v50 = vld [vmem:[%s4327_s1 + $0x220] sm:$0xff]   ;;  %v709_v51 = vrot.slane %v3842_v56, 5 }
  0x41   : > { %894 = vmatprep.mubr.bf16.mxu0 %v2662_v33  ;;  %v2664_v7 = vcombine.high %v702_v9, %v706_v45  ;;  %v2663_v44 = vcombine.low %v702_v9, %v706_v45  ;;  %v2807_v33 = vld [vmem:[%s3690_s27 + $0x20] sm:$0xee] }
  0x42   : > { %3139 = vmatpush3.bf16.msra.mxu0 %v3452_v53  ;;  %v3481_v53 = vld [vmem:[%s4327_s1 + $0x2a0] sm:$0xff]  }
  0x43   : > { %3173 = vmatpush3.bf16.msra.mxu1 %v3453_v55  ;;  %3140 = vmatprep.subr.bf16.mxu0 %v3454_v60  ;;  %v2628_v55 = vrot.slane %v677_v54, 9  ;;  %v3959_v60 = vld [vmem:[%s3690_s27 + $0x50] sm:$0xff]  ;;  %v3508_v54 = vld [vmem:[%s4327_s1 + $0x368] sm:$0xff]  }
  0x44   : > { %3174 = vmatprep.subr.bf16.mxu1 %v3455_v63  ;;  %v2725_v62 = vcombine.high %v3959_v60, %v3959_v60  ;;  %v3485_v63 = vld [vmem:[%s4327_s1 + $0x218] sm:$0xff]   ;;  %v1216_v45 = vshll.u32 %v3959_v60, 16 }
  0x45   : > { %v710_v56 = vsel %vm3850_vm5, %v2628_v55, %v709_v51 }
  0x46   : > { %3141 = vmatpush3.bf16.msra.mxu0 %v3456_v1  ;;  %v2666_v0 = vcombine.high %v710_v56, %v710_v56  ;;  %v2665_v1 = vcombine.low %v710_v56, %v710_v56  ;;  %v3509_v56 = vld [vmem:[%s4327_s1 + $0x3e8] sm:$0xff]  }
  0x47   : > { %3175 = vmatpush3.bf16.msra.mxu1 %v3457_v3  ;;  %3142 = vmatprep.subr.bf16.mxu0 %v3458_v4  ;;  %v3486_v3 = vld [vmem:[%s4327_s1 + $0x298] sm:$0xff]   ;;  %v2724_v4 = vcombine.low %v3959_v60, %v3959_v60 }
  0x48   : > { %3176 = vmatprep.subr.bf16.mxu1 %v3459_v10  ;;  %v3489_v10 = vld [vmem:[%s4327_s1 + $0x2d0] sm:$0xff]  }
  0x4a   : > { %3143 = vmatpush3.bf16.msra.mxu0 %v3460_v14  ;;  %v3493_v14 = vld [vmem:[%s4327_s1 + $0x2c8] sm:$0xff]  }
  0x4b   : > { %3177 = vmatpush3.bf16.msra.mxu1 %v3461_v16  ;;  %3196 = vmatprep.subr.bf16.mxu0 %v3464_v35  ;;  %v3495_v16 = vld [vmem:[%s4327_s1 + $0x288] sm:$0xff]   ;;  %v2743_v35 = vld [vmem:[%s3690_s27 + $0x18] sm:$0x11] }
  0x4c   : > { %3230 = vmatprep.subr.bf16.mxu1 %v3465_v21  ;;  %v2745_v21 = vld [vmem:[%s3690_s27 + $0x28] sm:$0x11]  ;;  %v1166_v23 = vshll.u32 %v2743_v35, 16 }
  0x4d   : > { %895 = vmatmul.mubr.bf16.vlgmr.msra.gmra.mxu0 %v2661_v25  ;;  %v1455_v25 = vrot.slane %v2743_v35, 5 }
  0x4e   : > { %1118 = vmatmul.mubr.bf16.vlgmr.msra.gmra.mxu1 %v2720_v20  ;;  %3197 = vmatpush3.bf16.msra.mxu0 %v3466_v26  ;;  %v1213_v20 = vshrl.u32 %v3959_v60, 16  ;;  %v2812_v26 = vrot.slane %v2807_v33, 9 }
  0x4f   : > { %3231 = vmatpush3.bf16.msra.mxu1 %v3467_v6  ;;  %1125 = vmatprep.mubr.bf16.mxu1 %v2723_v24  ;;  %v1180_v24 = vshll.u32 %v2745_v21, 16  ;;  %v2811_v6 = vrot.slane %v2806_v22, 9  ;;  %v3516_v22 = vld [vmem:[%s4327_s1 + $0x358] sm:$0xff]  }
  0x50   : > { %3232 = vmatprep.subr.bf16.mxu1 %v3469_v27  ;;  %3198 = vmatprep.subr.bf16.mxu0 %v3468_v28  ;;  %v1459_v27 = vrot.slane %v2745_v21, 5  ;;  %v1168_v28 = vrot.slane %v1166_v23, 5  ;;  %v3517_v23 = vld [vmem:[%s4327_s1 + $0x3d8] sm:$0xff]  }
  0x51   : > { %902 = vmatprep.mubr.bf16.mxu0 %v2664_v7  ;;  %v1182_v29 = vrot.slane %v1180_v24, 5  ;;  %v3506_v7 = vld [vmem:[%s4327_s1 + $0x330] sm:$0xff]  }
  0x52   : > { %3199 = vmatpush3.bf16.msra.mxu0 %v3470_v30  ;;  %v1456_v30 = vsel %vm3850_vm5, %v2811_v6, %v1455_v25  ;;  %v1460_v38 = vsel %vm3850_vm5, %v2812_v26, %v1459_v27  ;;  %v1169_v39 = vsel %vm3721_vm2, %v3728_v57, %v1168_v28  ;;  %v3503_v57 = vld [vmem:[%s4327_s1 + $0x3b8] sm:$0xff]   ;;  %v2810_v24 = vld [vmem:[%s3690_s27 + $0x50] sm:$0xee] }
  0x53   : > { %3233 = vmatpush3.bf16.msra.mxu1 %v3471_v36  ;;  %3200 = vmatprep.subr.bf16.mxu0 %v3472_v8  ;;  %v3500_v36 = vld [vmem:[%s4327_s1 + $0x378] sm:$0xff]   ;;  %v1183_v40 = vsel %vm3721_vm2, %v3796_v31, %v1182_v29  ;;  %v2848_v8 = vcombine.low %v1456_v30, %v1460_v38  ;;  %v3504_v31 = vld [vmem:[%s4327_s1 + $0x370] sm:$0xff]   ;;  %v2815_v25 = vrot.slane %v2810_v24, 9  ;;  %v3541_v24 = vld [vmem:[%s4327_s1 + $0x428] sm:$0xff]  }
  0x54   : > { %3234 = vmatprep.subr.bf16.mxu1 %v3473_v43  ;;  %v2784_v43 = vcombine.low %v1169_v39, %v1183_v40  ;;  %v2785_v9 = vcombine.high %v1169_v39, %v1183_v40  ;;  %v3518_v26 = vld [vmem:[%s4327_s1 + $0x318] sm:$0xff]   ;;  %v3520_v39 = vld [vmem:[%s4327_s1 + $0x350] sm:$0xff]  }
  0x55   : > { %903 = vmatmul.mubr.bf16.gmra.mxu0 %v2663_v44  ;;  %v1215_v44 = vrot.slane %v1213_v20, 4  ;;  %v2751_v20 = vld [vmem:[%s3690_s27 + $0x58] sm:$0x11]  ;;  %v3521_v40 = vld [vmem:[%s4327_s1 + $0x3d0] sm:$0xff]  }
  0x56   : > { %1126 = vmatmul.mubr.bf16.gmra.mxu1 %v2722_v41  ;;  %3201 = vmatpush3.bf16.msra.mxu0 %v3475_v46  ;;  %v2849_v41 = vcombine.high %v1456_v30, %v1460_v38  ;;  %v3505_v46 = vld [vmem:[%s4327_s1 + $0x3f0] sm:$0xff]   ;;  %v1222_v21 = vshll.u32 %v2751_v20, 16  ;;  %v1471_v33 = vrot.slane %v2751_v20, 5  ;;  %v3519_v29 = vld [vmem:[%s4327_s1 + $0x398] sm:$0xff]  }
  0x57   : > { %3235 = vmatpush3.bf16.msra.mxu1 %v3476_v47  ;;  %3202 = vmatprep.subr.bf16.mxu0 %v3478_v48  ;;  %v3507_v47 = vld [vmem:[%s4327_s1 + $0x3b0] sm:$0xff]   ;;  %v2747_v48 = vld [vmem:[%s3690_s27 + $0x38] sm:$0x11] }
  0x58   : > { %3236 = vmatprep.subr.bf16.mxu1 %v3479_v49  ;;  %1133 = vmatprep.mubr.bf16.mxu1 %v2725_v62  ;;  %v2749_v49 = vld [vmem:[%s3690_s27 + $0x48] sm:$0x11]  ;;  %v1194_v51 = vshll.u32 %v2747_v48, 16  ;;  %v1463_v55 = vrot.slane %v2747_v48, 5  ;;  %v2808_v62 = vld [vmem:[%s3690_s27 + $0x30] sm:$0xee]  ;;  %v1472_v28 = vsel %vm3850_vm5, %v2815_v25, %v1471_v33 }
  0x59   : > { %910 = vmatprep.mubr.bf16.mxu0 %v2666_v0  ;;  %v2809_v0 = vld [vmem:[%s3690_s27 + $0x40] sm:$0xee]  ;;  %v1224_v6 = vrot.slane %v1222_v21, 5  ;;  %v2852_v38 = vcombine.low %v1472_v28, %v1472_v28  ;;  %v4178_v20 = vld [vmem:[%s3690_s27 + $0x58] sm:$0x11] }
  0x5a   : > { %3203 = vmatpush3.bf16.msra.mxu0 %v3480_v50  ;;  %v1218_v50 = vrot.slane %v1216_v45, 5  ;;  %v3528_v45 = vld [vmem:[%s4327_s1 + $0x340] sm:$0xff]   ;;  %v1970_v33 = vshll.u32 %v4178_v20, 16 }
  0x5b   : > { %3237 = vmatpush3.bf16.msra.mxu1 %v3481_v53  ;;  %3204 = vmatprep.subr.bf16.mxu0 %v3482_v58  ;;  %v1208_v53 = vshll.u32 %v2749_v49, 16  ;;  %v1196_v58 = vrot.slane %v1194_v51, 5  ;;  %v4150_v51 = vld [vmem:[%s3690_s27 + $0x38] sm:$0x11] }
  0x5c   : > { %3238 = vmatprep.subr.bf16.mxu1 %v3483_v59 }
  0x5d   : > { %911 = vmatmul.mubr.bf16.gmra.mxu0 %v2665_v1  ;;  %v1210_v59 = vrot.slane %v1208_v53, 5  ;;  %v2813_v1 = vrot.slane %v2808_v62, 9 }
  0x5e   : > { %1134 = vmatmul.mubr.bf16.gmra.mxu1 %v2724_v4  ;;  %3205 = vmatpush3.bf16.msra.mxu0 %v3485_v63  ;;  %v1467_v63 = vrot.slane %v2749_v49, 5  ;;  %v1197_v4 = vsel %vm3721_vm2, %v3798_v32, %v1196_v58 }
  0x5f   : > { %3239 = vmatpush3.bf16.msra.mxu1 %v3486_v3  ;;  %3206 = vmatprep.subr.bf16.mxu0 %v3488_v5  ;;  %v3510_v3 = vld [vmem:[%s4327_s1 + $0x328] sm:$0xff]   ;;  %v1211_v5 = vsel %vm3721_vm2, %v3860_v2, %v1210_v59  ;;  %v3512_v2 = vld [vmem:[%s4327_s1 + $0x360] sm:$0xff]  }
  0x60   : > { %3240 = vmatprep.subr.bf16.mxu1 %v3489_v10  ;;  %1656 = vmatprep.mubr.bf16.mxu1 %v2849_v41  ;;  %v2814_v10 = vrot.slane %v2809_v0, 9  ;;  %v3523_v41 = vld [vmem:[%s4327_s1 + $0x390] sm:$0xff]   ;;  %v3534_v0 = vld [vmem:[%s4327_s1 + $0x478] sm:$0xff]  }
  0x61   : > { %1409 = vmatprep.mubr.bf16.mxu0 %v2785_v9  ;;  %v3526_v9 = vld [vmem:[%s4327_s1 + $0x308] sm:$0xff]  }
  0x62   : > { %3207 = vmatpush3.bf16.msra.mxu0 %v3490_v11  ;;  %v3511_v11 = vld [vmem:[%s4327_s1 + $0x3a8] sm:$0xff]   ;;  %v1468_v32 = vsel %vm3850_vm5, %v2814_v10, %v1467_v63 }
  0x63   : > { %3241 = vmatpush3.bf16.msra.mxu1 %v3491_v12  ;;  %3208 = vmatprep.subr.bf16.mxu0 %v3492_v13  ;;  %v2787_v12 = vcombine.high %v1197_v4, %v1211_v5  ;;  %v2786_v13 = vcombine.low %v1197_v4, %v1211_v5 }
  0x64   : > { %3242 = vmatprep.subr.bf16.mxu1 %v3493_v14  ;;  %v1464_v14 = vsel %vm3850_vm5, %v2813_v1, %v1463_v55  ;;  %v3535_v1 = vld [vmem:[%s4327_s1 + $0x438] sm:$0xff]  }
  0x66   : > { %3209 = vmatpush3.bf16.msra.mxu0 %v3494_v15  ;;  %v1219_v15 = vor.u32 %v1218_v50, %v1215_v44  ;;  %v2870_v44 = vld [vmem:[%s3690_s27 + $0x20] sm:$0xff]  ;;  %v4147_v50 = vld [vmem:[%s3690_s27 + $0x28] sm:$0x11] }
  0x67   : > { %3243 = vmatpush3.bf16.msra.mxu1 %v3495_v16  ;;  %3210 = vmatprep.subr.bf16.mxu0 %v3496_v17  ;;  %v2851_v16 = vcombine.high %v1464_v14, %v1468_v32  ;;  %v2850_v17 = vcombine.low %v1464_v14, %v1468_v32  ;;  %v1919_v53 = vshrl.u32 %v2870_v44, 16  ;;  %v1928_v55 = vshll.u32 %v4147_v50, 16  ;;  %v2872_v32 = vld [vmem:[%s3690_s27 + $0x40] sm:$0xff] }
  0x68   : > { %3244 = vmatprep.subr.bf16.mxu1 %v3497_v18  ;;  %v3513_v18 = vld [vmem:[%s4327_s1 + $0x3e0] sm:$0xff]   ;;  %v4088_v35 = vrot.slane %v1219_v15, 4  ;;  %v3537_v15 = vld [vmem:[%s4327_s1 + $0x430] sm:$0xff]   ;;  %v1947_v21 = vshrl.u32 %v2872_v32, 16 }
  0x69   : > { %v1921_v62 = vrot.slane %v1919_v53, 4  ;;  %v3548_v53 = vld [vmem:[%s4327_s1 + $0x450] sm:$0xff]  }
  0x6a   : > { %3211 = vmatpush3.bf16.msra.mxu0 %v3498_v34  ;;  %v3514_v34 = vld [vmem:[%s4327_s1 + $0x320] sm:$0xff]   ;;  %v1225_v27 = vsel %vm3721_vm2, %v4088_v35, %v1224_v6 }
  0x6b   : > { %3245 = vmatpush3.bf16.msra.mxu1 %v3499_v19  ;;  %3264 = vmatprep.subr.bf16.mxu0 %v3500_v36  ;;  %v3515_v19 = vld [vmem:[%s4327_s1 + $0x3a0] sm:$0xff]   ;;  %v2789_v30 = vcombine.high %v1225_v27, %v1225_v27  ;;  %v2788_v36 = vcombine.low %v1225_v27, %v1225_v27  ;;  %v1949_v27 = vrot.slane %v1947_v21, 4 }
  0x6c   : > { %3298 = vmatprep.subr.bf16.mxu1 %v3501_v37  ;;  %v2853_v37 = vcombine.high %v1472_v28, %v1472_v28  ;;  %v3542_v6 = vld [vmem:[%s4327_s1 + $0x460] sm:$0xff]  }
  0x6d   : > { %1410 = vmatmul.mubr.bf16.vlgmr.msra.gmra.mxu0 %v2784_v43  ;;  %v3525_v43 = vld [vmem:[%s4327_s1 + $0x3c8] sm:$0xff]  }
  0x6e   : > { %1657 = vmatmul.mubr.bf16.vlgmr.msra.gmra.mxu1 %v2848_v8  ;;  %3265 = vmatpush3.bf16.msra.mxu0 %v3502_v42  ;;  %v3522_v8 = vld [vmem:[%s4327_s1 + $0x310] sm:$0xff]   ;;  %v3524_v42 = vld [vmem:[%s4327_s1 + $0x348] sm:$0xff]  }
  0x6f   : > { %3299 = vmatpush3.bf16.msra.mxu1 %v3503_v57  ;;  %3266 = vmatprep.subr.bf16.mxu0 %v3504_v31  ;;  %v3527_v57 = vld [vmem:[%s4327_s1 + $0x388] sm:$0xff]   ;;  %v3529_v31 = vld [vmem:[%s4327_s1 + $0x3c0] sm:$0xff]  }
  0x70   : > { %3300 = vmatprep.subr.bf16.mxu1 %v3505_v46  ;;  %1417 = vmatprep.mubr.bf16.mxu0 %v2787_v12  ;;  %v3530_v46 = vld [vmem:[%s4327_s1 + $0x300] sm:$0xff]  }
  0x71   : > { %1664 = vmatprep.mubr.bf16.mxu1 %v2851_v16  ;;  %v2910_v16 = vcombine.high %v2872_v32, %v3959_v60 }
  0x72   : > { %3267 = vmatpush3.bf16.msra.mxu0 %v3506_v7  ;;  %v3531_v7 = vld [vmem:[%s4327_s1 + $0x380] sm:$0xff]  }
  0x73   : > { %3301 = vmatpush3.bf16.msra.mxu1 %v3507_v47  ;;  %3268 = vmatprep.subr.bf16.mxu0 %v3508_v54  ;;  %v2871_v47 = vld [vmem:[%s3690_s27 + $0x30] sm:$0xff]  ;;  %v1922_v54 = vshll.u32 %v2870_v44, 16 }
  0x74   : > { %3302 = vmatprep.subr.bf16.mxu1 %v3509_v56  ;;  %v2907_v48 = vcombine.low %v2870_v44, %v2871_v47  ;;  %v2908_v49 = vcombine.high %v2870_v44, %v2871_v47  ;;  %v1933_v58 = vshrl.u32 %v2871_v47, 16  ;;  %v1936_v59 = vshll.u32 %v2871_v47, 16 }
  0x75   : > { %1418 = vmatmul.mubr.bf16.gmra.mxu0 %v2786_v13  ;;  %v1942_v56 = vshll.u32 %v4150_v51, 16  ;;  %v1924_v63 = vrot.slane %v1922_v54, 5  ;;  %v3536_v13 = vld [vmem:[%s4327_s1 + $0x470] sm:$0xff]   ;;  %v2217_v54 = vrot.slane %v4147_v50, 5 }
  0x76   : > { %3269 = vmatpush3.bf16.msra.mxu0 %v3510_v3  ;;  %1665 = vmatmul.mubr.bf16.gmra.mxu1 %v2850_v17  ;;  %v1930_v3 = vrot.slane %v1928_v55, 5  ;;  %v1935_v4 = vrot.slane %v1933_v58, 4  ;;  %v1938_v5 = vrot.slane %v1936_v59, 5  ;;  %v2909_v17 = vcombine.low %v2872_v32, %v3959_v60 }
  0x77   : > { %3303 = vmatpush3.bf16.msra.mxu1 %v3511_v11  ;;  %3270 = vmatprep.subr.bf16.mxu0 %v3512_v2  ;;  %v1925_v10 = vor.u32 %v1924_v63, %v1921_v62  ;;  %v1944_v12 = vrot.slane %v1942_v56, 5  ;;  %v2221_v55 = vrot.slane %v4150_v51, 5  ;;  %v3549_v56 = vld [vmem:[%s4327_s1 + $0x410] sm:$0xff]   ;;  %v2993_v62 = vld [vmem:[%s3690_s27 + $0x20] sm:$0xee]  ;;  %v2229_v63 = vrot.slane %v4178_v20, 5 }
  0x78   : > { %3304 = vmatprep.subr.bf16.mxu1 %v3513_v18  ;;  %1425 = vmatprep.mubr.bf16.mxu0 %v2789_v30  ;;  %v1939_v11 = vor.u32 %v1938_v5, %v1935_v4  ;;  %v3540_v18 = vld [vmem:[%s4327_s1 + $0x468] sm:$0xff]   ;;  %v2997_v20 = vld [vmem:[%s3690_s27 + $0x60] sm:$0xee] }
  0x79   : > { %1672 = vmatprep.mubr.bf16.mxu1 %v2853_v37  ;;  %v1926_v14 = vrot.slane %v1925_v10, 4  ;;  %v2874_v37 = vld [vmem:[%s3690_s27 + $0x60] sm:$0xff]  ;;  %v3550_v51 = vld [vmem:[%s4327_s1 + $0x448] sm:$0xff]   ;;  %v2996_v10 = vld [vmem:[%s3690_s27 + $0x50] sm:$0xee]  ;;  %v3002_v21 = vrot.slane %v2997_v20, 9 }
  0x7a   : > { %3271 = vmatpush3.bf16.msra.mxu0 %v3514_v34  ;;  %v1940_v2 = vrot.slane %v1939_v11, 4  ;;  %v4173_v34 = vld [vmem:[%s3690_s27 + $0x48] sm:$0x11] }
  0x7b   : > { %3305 = vmatpush3.bf16.msra.mxu1 %v3515_v19  ;;  %3272 = vmatprep.subr.bf16.mxu0 %v3516_v22  ;;  %v1931_v19 = vsel %vm3721_vm2, %v1926_v14, %v1930_v3  ;;  %v1950_v22 = vshll.u32 %v2872_v32, 16  ;;  %v2225_v59 = vrot.slane %v4173_v34, 5  ;;  %v2995_v3 = vld [vmem:[%s3690_s27 + $0x40] sm:$0xee]  ;;  %v3551_v14 = vld [vmem:[%s4327_s1 + $0x408] sm:$0xff]  }
  0x7c   : > { %3306 = vmatprep.subr.bf16.mxu1 %v3517_v23  ;;  %v1956_v23 = vshll.u32 %v4173_v34, 16  ;;  %v1945_v60 = vsel %vm3721_vm2, %v1940_v2, %v1944_v12  ;;  %v3000_v11 = vrot.slane %v2995_v3, 9  ;;  %v3552_v2 = vld [vmem:[%s4327_s1 + $0x440] sm:$0xff]  }
  0x7d   : > { %1426 = vmatmul.mubr.bf16.gmra.mxu0 %v2788_v36  ;;  %v2971_v25 = vcombine.low %v1931_v19, %v1945_v60  ;;  %v1952_v28 = vrot.slane %v1950_v22, 5  ;;  %v3553_v34 = vld [vmem:[%s4327_s1 + $0x400] sm:$0xff]  }
  0x7e   : > { %3273 = vmatpush3.bf16.msra.mxu0 %v3518_v26  ;;  %1673 = vmatmul.mubr.bf16.gmra.mxu1 %v2852_v38  ;;  %v2972_v26 = vcombine.high %v1931_v19, %v1945_v60  ;;  %v1958_v36 = vrot.slane %v1956_v23, 5  ;;  %v3543_v38 = vld [vmem:[%s4327_s1 + $0x420] sm:$0xff]   ;;  %v2226_v32 = vsel %vm3850_vm5, %v3000_v11, %v2225_v59 }
  0x7f   : > { %3307 = vmatpush3.bf16.msra.mxu1 %v3519_v29  ;;  %3274 = vmatprep.subr.bf16.mxu0 %v3520_v39  ;;  %v1972_v29 = vrot.slane %v1970_v33, 5  ;;  %v1953_v30 = vor.u32 %v1952_v28, %v1949_v27  ;;  %v2912_v39 = vcombine.high %v2874_v37, %v2874_v37 }
  0x80   : > { %3308 = vmatprep.subr.bf16.mxu1 %v3521_v40  ;;  %1879 = vmatprep.mubr.bf16.mxu0 %v2908_v49  ;;  %v4195_v40 = vld [vmem:[%s3690_s27 + $0x68] sm:$0x11] }
  0x81   : > { %2171 = vmatprep.mubr.bf16.mxu1 %v2972_v26  ;;  %v2233_v22 = vrot.slane %v4195_v40, 5 }
  0x82   : > { %3275 = vmatpush3.bf16.msra.mxu0 %v3522_v8  ;;  %v1975_v8 = vshrl.u32 %v2874_v37, 16 }
  0x83   : > { %3309 = vmatpush3.bf16.msra.mxu1 %v3523_v41  ;;  %3276 = vmatprep.subr.bf16.mxu0 %v3524_v42  ;;  %v1954_v41 = vrot.slane %v1953_v30, 4  ;;  %v1973_v42 = vsel %vm3721_vm2, %v4088_v35, %v1972_v29  ;;  %v3547_v35 = vld [vmem:[%s4327_s1 + $0x418] sm:$0xff]   ;;  %v2234_v23 = vsel %vm3850_vm5, %v3002_v21, %v2233_v22 }
  0x84   : > { %3310 = vmatprep.subr.bf16.mxu1 %v3525_v43  ;;  %v3546_v43 = vld [vmem:[%s4327_s1 + $0x458] sm:$0xff]   ;;  %v3040_v60 = vcombine.high %v2234_v23, %v2234_v23  ;;  %v3039_v33 = vcombine.low %v2234_v23, %v2234_v23 }
  0x86   : > { %3277 = vmatpush3.bf16.msra.mxu0 %v3526_v9  ;;  %v1978_v9 = vshll.u32 %v2874_v37, 16 }
  0x87   : > { %3311 = vmatpush3.bf16.msra.mxu1 %v3527_v57  ;;  %3278 = vmatprep.subr.bf16.mxu0 %v3528_v45  ;;  %v1984_v57 = vshll.u32 %v4195_v40, 16  ;;  %v1977_v45 = vrot.slane %v1975_v8, 4 }
  0x88   : > { %3312 = vmatprep.subr.bf16.mxu1 %v3529_v31  ;;  %v1959_v31 = vsel %vm3721_vm2, %v1954_v41, %v1958_v36 }
  0x89   : > { %v2974_v44 = vcombine.high %v1959_v31, %v1973_v42  ;;  %v2973_v47 = vcombine.low %v1959_v31, %v1973_v42  ;;  %v1986_v49 = vrot.slane %v1984_v57, 5 }
  0x8a   : > { %3279 = vmatpush3.bf16.msra.mxu0 %v3530_v46  ;;  %v2911_v46 = vcombine.low %v2874_v37, %v2874_v37 }
  0x8b   : > { %3313 = vmatpush3.bf16.msra.mxu1 %v3531_v7  ;;  %3332 = vmatprep.subr.bf16.mxu0 %v3534_v0  ;;  %v1980_v7 = vrot.slane %v1978_v9, 5 }
  0x8c   : > { %3366 = vmatprep.subr.bf16.mxu1 %v3534_v0  ;;  %v2994_v0 = vld [vmem:[%s3690_s27 + $0x30] sm:$0xee]  ;;  %s3383_s27 = smul.u32 20, %s4337_s13 }
  0x8d   : > { %1880 = vmatmul.mubr.bf16.vlgmr.msra.gmra.mxu0 %v2907_v48  ;;  %v1981_v48 = vor.u32 %v1980_v7, %v1977_v45  ;;  %v2999_v5 = vrot.slane %v2994_v0, 9 }
  0x8e   : > { %3333 = vmatpush3.bf16.msra.mxu0 %v3535_v1  ;;  %1887 = vmatprep.mubr.bf16.mxu0 %v2910_v16  ;;  %s4286_s18 = scalar_lea.vmem %s4329_s3, %s3383_s27 }
  0x8f   : > { %3334 = vmatprep.subr.bf16.mxu0 %v3536_v13  ;;  %2172 = vmatmul.mubr.bf16.vlgmr.msra.gmra.mxu1 %v2971_v25  ;;  %v1982_v58 = vrot.slane %v1981_v48, 4 }
  0x90   : > { %3374 = vmatpush3.bf16.msra.mxu1 %v3535_v1  ;;  %2179 = vmatprep.mubr.bf16.mxu1 %v2974_v44  ;;  %v2998_v1 = vrot.slane %v2993_v62, 9 }
  0x91   : > { %3367 = vmatprep.subr.bf16.mxu1 %v3536_v13  ;;  %v1987_v50 = vsel %vm3721_vm2, %v1982_v58, %v1986_v49  ;;  %v3001_v13 = vrot.slane %v2996_v10, 9 }
  0x92   : > { %3335 = vmatpush3.bf16.msra.mxu0 %v3537_v15  ;;  %v2976_v4 = vcombine.high %v1987_v50, %v1987_v50  ;;  %v2218_v12 = vsel %vm3850_vm5, %v2998_v1, %v2217_v54  ;;  %v2975_v52 = vcombine.low %v1987_v50, %v1987_v50 }
  0x93   : > { %3336 = vmatprep.subr.bf16.mxu0 %v3540_v18 }
  0x94   : > { %3375 = vmatpush3.bf16.msra.mxu1 %v3537_v15  ;;  %v2222_v15 = vsel %vm3850_vm5, %v2999_v5, %v2221_v55 }
  0x95   : > { %1888 = vmatmul.mubr.bf16.gmra.mxu0 %v2909_v17  ;;  %3368 = vmatprep.subr.bf16.mxu1 %v3540_v18  ;;  %v3036_v16 = vcombine.high %v2218_v12, %v2222_v15  ;;  %v2230_v17 = vsel %vm3850_vm5, %v3001_v13, %v2229_v63  ;;  %v3035_v19 = vcombine.low %v2218_v12, %v2222_v15 }
  0x96   : > { %3337 = vmatpush3.bf16.msra.mxu0 %v3541_v24  ;;  %1895 = vmatprep.mubr.bf16.mxu0 %v2912_v39  ;;  %v3038_v18 = vcombine.high %v2226_v32, %v2230_v17 }
  0x97   : > { %3338 = vmatprep.subr.bf16.mxu0 %v3542_v6  ;;  %2180 = vmatmul.mubr.bf16.gmra.mxu1 %v2973_v47 }
  0x98   : > { %3376 = vmatpush3.bf16.msra.mxu1 %v3541_v24  ;;  %2187 = vmatprep.mubr.bf16.mxu1 %v2976_v4  ;;  %v3037_v24 = vcombine.low %v2226_v32, %v2230_v17 }
  0x99   : > { %3369 = vmatprep.subr.bf16.mxu1 %v3542_v6 }
  0x9a   : > { %3339 = vmatpush3.bf16.msra.mxu0 %v3543_v38 }
  0x9b   : > { %3340 = vmatprep.subr.bf16.mxu0 %v3546_v43 }
  0x9c   : > { %3377 = vmatpush3.bf16.msra.mxu1 %v3543_v38 }
  0x9d   : > { %1896 = vmatmul.mubr.bf16.gmra.mxu0 %v2911_v46  ;;  %3370 = vmatprep.subr.bf16.mxu1 %v3546_v43 }
  0x9e   : > { %3341 = vmatpush3.bf16.msra.mxu0 %v3547_v35  ;;  %2418 = vmatprep.mubr.bf16.mxu0 %v3036_v16 }
  0x9f   : > { %3342 = vmatprep.subr.bf16.mxu0 %v3548_v53  ;;  %2188 = vmatmul.mubr.bf16.gmra.mxu1 %v2975_v52 }
  0xa0   : > { %3378 = vmatpush3.bf16.msra.mxu1 %v3547_v35  ;;  %2426 = vmatprep.mubr.bf16.mxu1 %v3038_v18 }
  0xa1   : > { %3371 = vmatprep.subr.bf16.mxu1 %v3548_v53 }
  0xa2   : > { %3343 = vmatpush3.bf16.msra.mxu0 %v3549_v56 }
  0xa3   : > { %3344 = vmatprep.subr.bf16.mxu0 %v3550_v51 }
  0xa4   : > { %3379 = vmatpush3.bf16.msra.mxu1 %v3549_v56 }
  0xa5   : > { %3372 = vmatprep.subr.bf16.mxu1 %v3550_v51 }
  0xa6   : > { %3345 = vmatpush3.bf16.msra.mxu0 %v3551_v14 }
  0xa7   : > { %3346 = vmatprep.subr.bf16.mxu0 %v3552_v2 }
  0xa8   : > { %3380 = vmatpush3.bf16.msra.mxu1 %v3551_v14 }
  0xa9   : > { %3373 = vmatprep.subr.bf16.mxu1 %v3552_v2 }
  0xaa   : > { %3347 = vmatpush3.bf16.msra.mxu0 %v3553_v34 }
  0xac   : > { %3381 = vmatpush3.bf16.msra.mxu1 %v3553_v34 }
  0xad   : > { %2419 = vmatmul.mubr.bf16.vlgmr.msra.gmra.mxu0 %v3035_v19 }
  0xaf   : > { %2427 = vmatmul.mubr.bf16.vlgmr.msra.gmra.mxu1 %v3037_v24 }
  0xb0   : > { %2434 = vmatprep.mubr.bf16.mxu1 %v3040_v60 }
  0xb7   : > { %2435 = vmatmul.mubr.bf16.gmra.mxu1 %v3039_v33 }
  0xed   : > { %v3076_v29 = vpop.f32.mrf.mxu0 }
  0xee   : > { %v3110_v6 = vpop.f32.mrf.mxu1 }
  0xef   : > { %v3077_v36 = vpop.f32.mrf.mxu0 }
  0xf0   : > { %v3111_v25 = vpop.f32.mrf.mxu1  ;;  %v3078_v37 = vadd.f32 %v3077_v36, %v3076_v29 }
  0xf1   : > { %v3112_v26 = vadd.f32 %v3111_v25, %v3110_v6  ;;  %v3079_v38 = vpop.f32.mrf.mxu0 }
  0xf2   : > { %v3113_v27 = vpop.f32.mrf.mxu1 }
  0xf3   : > { %v652_v39 = vadd.f32 %v3112_v26, %v3078_v37  ;;  %v3080_v61 = vpop.f32.mrf.mxu0 }
  0xf4   : > { %v3114_v28 = vpop.f32.mrf.mxu1  ;;  %v3081_v40 = vadd.f32 %v3080_v61, %v3079_v38 }
  0xf5   : > { %v3115_v30 = vadd.f32 %v3114_v28, %v3113_v27  ;;  %v3082_v31 = vpop.f32.mrf.mxu0 }
  0xf6   : > { %v3116_v8 = vpop.f32.mrf.mxu1 }
  0xf7   : > { %v655_v41 = vadd.f32 %v3115_v30, %v3081_v40  ;;  %v3083_v46 = vpop.f32.mrf.mxu0 }
  0xf8   : > { %v3117_v42 = vpop.f32.mrf.mxu1  ;;  %v3084_v44 = vadd.f32 %v3083_v46, %v3082_v31 }
  0xf9   : > { %v3118_v43 = vadd.f32 %v3117_v42, %v3116_v8  ;;  %v3085_v47 = vpop.f32.mrf.mxu0 }
  0xfa   : > { %v3119_v9 = vpop.f32.mrf.mxu1 }
  0xfb   : > { %v660_v48 = vadd.f32 %v3118_v43, %v3084_v44  ;;  %v3086_v53 = vpop.f32.mrf.mxu0 }
  0xfc   : > { %v3120_v57 = vpop.f32.mrf.mxu1  ;;  %v3087_v55 = vadd.f32 %v3086_v53, %v3085_v47 }
  0xfd   : > { %v3121_v45 = vadd.f32 %v3120_v57, %v3119_v9  ;;  %v3088_v56 = vpop.f32.mrf.mxu0 }
  0xfe   : > { %v3122_v7 = vpop.f32.mrf.mxu1 }
  0xff   : > { %v663_v59 = vadd.f32 %v3121_v45, %v3087_v55  ;;  %v3089_v62 = vpop.f32.mrf.mxu0 }
 0x100   : > { %v3123_v35 = vpop.f32.mrf.mxu1  ;;  %v3090_v63 = vadd.f32 %v3089_v62, %v3088_v56 }
 0x101   : > { %v3124_v49 = vadd.f32 %v3123_v35, %v3122_v7  ;;  %v3091_v50 = vpop.f32.mrf.mxu0 }
 0x102   : > { %v3125_v54 = vpop.f32.mrf.mxu1 }
 0x103   : > { %v668_v0 = vadd.f32 %v3124_v49, %v3090_v63  ;;  %v3092_v1 = vpop.f32.mrf.mxu0 }
 0x104   : > { %v3126_v58 = vpop.f32.mrf.mxu1 }
 0x10d   : > { %v3144_v5 = vpop.f32.mrf.mxu0 }
 0x10e   : > { %v3178_v51 = vpop.f32.mrf.mxu1 }
 0x10f   : > { %v3145_v11 = vpop.f32.mrf.mxu0 }
 0x110   : > { %v3179_v3 = vpop.f32.mrf.mxu1  ;;  %v3146_v13 = vadd.f32 %v3145_v11, %v3144_v5 }
 0x111   : > { %v3180_v4 = vadd.f32 %v3179_v3, %v3178_v51  ;;  %v3147_v14 = vpop.f32.mrf.mxu0 }
 0x112   : > { %v3181_v10 = vpop.f32.mrf.mxu1  ;;  %v918_v32 = vadd.f32 %v3146_v13, %v652_v39 }
 0x113   : > { %v3148_v2 = vpop.f32.mrf.mxu0 }
 0x114   : > { %v3182_v12 = vpop.f32.mrf.mxu1  ;;  %v4249_v17 = vadd.f32 %v3180_v4, %v918_v32  ;;  %v3149_v18 = vadd.f32 %v3148_v2, %v3147_v14 }
 0x115   : > { %v3183_v52 = vadd.f32 %v3182_v12, %v3181_v10  ;;  %v3150_v19 = vpop.f32.mrf.mxu0 }
 0x116   : > { %v3184_v15 = vpop.f32.mrf.mxu1  ;;  %v919_v21 = vadd.f32 %v3149_v18, %v655_v41 }
 0x117   : > { %v3151_v22 = vpop.f32.mrf.mxu0 }
 0x118   : > { %v3185_v16 = vpop.f32.mrf.mxu1  ;;  %v4251_v24 = vadd.f32 %v3183_v52, %v919_v21  ;;  %v3152_v60 = vadd.f32 %v3151_v22, %v3150_v19 }
 0x119   : > { %v3186_v34 = vadd.f32 %v3185_v16, %v3184_v15  ;;  %v3153_v6 = vpop.f32.mrf.mxu0 }
 0x11a   : > { %v3187_v20 = vpop.f32.mrf.mxu1  ;;  %v920_v25 = vadd.f32 %v3152_v60, %v660_v48 }
 0x11b   : > { %v3154_v26 = vpop.f32.mrf.mxu0 }
 0x11c   : > { %v3188_v23 = vpop.f32.mrf.mxu1  ;;  %v4253_v27 = vadd.f32 %v3186_v34, %v920_v25  ;;  %v3155_v28 = vadd.f32 %v3154_v26, %v3153_v6 }
 0x11d   : > { %v3189_v33 = vadd.f32 %v3188_v23, %v3187_v20  ;;  %v3156_v29 = vpop.f32.mrf.mxu0 }
 0x11e   : > { %v3190_v30 = vpop.f32.mrf.mxu1  ;;  %v921_v36 = vadd.f32 %v3155_v28, %v663_v59 }
 0x11f   : > { %v3157_v37 = vpop.f32.mrf.mxu0 }
 0x120   : > { %v3191_v38 = vpop.f32.mrf.mxu1  ;;  %v4255_v39 = vadd.f32 %v3189_v33, %v921_v36  ;;  %v3158_v61 = vadd.f32 %v3157_v37, %v3156_v29 }
 0x121   : > { %v3192_v40 = vadd.f32 %v3191_v38, %v3190_v30  ;;  %v3159_v41 = vpop.f32.mrf.mxu0 }
 0x122   : > { %v3193_v8 = vpop.f32.mrf.mxu1  ;;  %v922_v42 = vadd.f32 %v3158_v61, %v668_v0 }
 0x123   : > { %v3160_v9 = vpop.f32.mrf.mxu0 }
 0x124   : > { %v3194_v43 = vpop.f32.mrf.mxu1  ;;  %v4257_v57 = vadd.f32 %v3192_v40, %v922_v42 }
 0x12d   : > { %v3212_v31 = vpop.f32.mrf.mxu0 }
 0x12e   : > { %v3246_v45 = vpop.f32.mrf.mxu1 }
 0x12f   : > { %v3213_v46 = vpop.f32.mrf.mxu0 }
 0x130   : > { %v3247_v7 = vpop.f32.mrf.mxu1  ;;  %v3214_v60 = vadd.f32 %v3213_v46, %v3212_v31 }
 0x131   : > { %v3215_v44 = vpop.f32.mrf.mxu0  ;;  %v3248_v30 = vadd.f32 %v3247_v7, %v3246_v45 }
 0x132   : > { %v3249_v47 = vpop.f32.mrf.mxu1  ;;  %v1433_v26 = vadd.f32 %v3214_v60, %v4249_v17 }
 0x133   : > { %v3216_v35 = vpop.f32.mrf.mxu0 }
 0x134   : > { %v3250_v48 = vpop.f32.mrf.mxu1  ;;  %v3217_v28 = vadd.f32 %v3216_v35, %v3215_v44  ;;  %v1680_v38 = vadd.f32 %v3248_v30, %v1433_v26 }
 0x135   : > { %v3218_v49 = vpop.f32.mrf.mxu0  ;;  %v3251_v41 = vadd.f32 %v3250_v48, %v3249_v47  ;;  %v4278_v47 = vld [vmem:[%s4328_s2] ss:$0 sm:$0xff] }
 0x136   : > { %v3252_v54 = vpop.f32.mrf.mxu1  ;;  %v1434_v61 = vadd.f32 %v3217_v28, %v4251_v24  ;;  %v2474_v28 = vld [vmem:[%s4286_s18 + $0x4] sm:$0x7] }
 0x137   : > { %v3219_v53 = vpop.f32.mrf.mxu0 }
 0x138   : > { %v3253_v58 = vpop.f32.mrf.mxu1  ;;  %v3220_v8 = vadd.f32 %v3219_v53, %v3218_v49  ;;  %v1681_v46 = vadd.f32 %v3251_v41, %v1434_v61 }
 0x139   : > { %v3221_v55 = vpop.f32.mrf.mxu0  ;;  %v3254_v35 = vadd.f32 %v3253_v58, %v3252_v54 }
 0x13a   : > { %v4259_v56 = vpop.f32.mrf.mxu1  ;;  %v1435_v44 = vadd.f32 %v3220_v8, %v4253_v27 }
 0x13b   : > { %v3222_v59 = vpop.f32.mrf.mxu0 }
 0x13c   : > { %v4261_v62 = vpop.f32.mrf.mxu1  ;;  %v3223_v45 = vadd.f32 %v3222_v59, %v3221_v55 }
 0x13d   : > { %v3224_v63 = vpop.f32.mrf.mxu0  ;;  %v3257_v54 = vadd.f32 %v4261_v62, %v4259_v56 }
 0x13e   : > { %v4263_v50 = vpop.f32.mrf.mxu1  ;;  %v1436_v27 = vadd.f32 %v3223_v45, %v4255_v39  ;;  %v2480_v45 = vld [vmem:[%s4286_s18 + $0xc] sm:$0x7] }
 0x13f   : > { %v3225_v51 = vpop.f32.mrf.mxu0 }
 0x140   : > { %v4265_v0 = vpop.f32.mrf.mxu1  ;;  %v3226_v49 = vadd.f32 %v3225_v51, %v3224_v63 }
 0x141   : > { %v3227_v3 = vpop.f32.mrf.mxu0  ;;  %v3260_v56 = vadd.f32 %v4265_v0, %v4263_v50 }
 0x142   : > { %v3261_v1 = vpop.f32.mrf.mxu1  ;;  %v1437_v39 = vadd.f32 %v3226_v49, %v4257_v57 }
 0x143   : > { %v3228_v5 = vpop.f32.mrf.mxu0 }
 0x144   : > { %v3262_v4 = vpop.f32.mrf.mxu1 }
 0x14d   : > { %v3280_v10 = vpop.f32.mrf.mxu0 }
 0x14f   : > { %v3281_v11 = vpop.f32.mrf.mxu0  ;;  %v3314_v14 = vpop.f32.mrf.mxu1 }
 0x150   : > { %v3282_v36 = vadd.f32 %v3281_v11, %v3280_v10  ;;  %v1682_v10 = vadd.f32 %v3254_v35, %v1435_v44 }
 0x151   : > { %v3283_v12 = vpop.f32.mrf.mxu0  ;;  %v3315_v32 = vpop.f32.mrf.mxu1 }
 0x152   : > { %v1903_v42 = vadd.f32 %v3282_v36, %v1680_v38  ;;  %v3316_v17 = vadd.f32 %v3315_v32, %v3314_v14  ;;  %v1683_v14 = vadd.f32 %v3257_v54, %v1436_v27  ;;  %v2471_v32 = vld [vmem:[%s4286_s18] sm:$0x7] }
 0x153   : > { %v3284_v13 = vpop.f32.mrf.mxu0  ;;  %v3317_v16 = vpop.f32.mrf.mxu1 }
 0x154   : > { %v3285_v43 = vadd.f32 %v3284_v13, %v3283_v12  ;;  %v2195_v1 = vadd.f32 %v3316_v17, %v1903_v42  ;;  %v2477_v42 = vld [vmem:[%s4286_s18 + $0x8] sm:$0x7] }
 0x155   : > { %v3286_v52 = vpop.f32.mrf.mxu0  ;;  %v3318_v34 = vpop.f32.mrf.mxu1 }
 0x156   : > { %v1904_v3 = vadd.f32 %v3285_v43, %v1681_v46  ;;  %v3319_v53 = vadd.f32 %v3318_v34, %v3317_v16 }
 0x157   : > { %v3287_v15 = vpop.f32.mrf.mxu0  ;;  %v3320_v20 = vpop.f32.mrf.mxu1 }
 0x158   : > { %v3288_v24 = vadd.f32 %v3287_v15, %v3286_v52  ;;  %v2196_v58 = vadd.f32 %v3319_v53, %v1904_v3 }
 0x159   : > { %v3289_v2 = vpop.f32.mrf.mxu0  ;;  %v3321_v22 = vpop.f32.mrf.mxu1 }
 0x15a   : > { %v1905_v51 = vadd.f32 %v3288_v24, %v1682_v10  ;;  %v3322_v11 = vadd.f32 %v3321_v22, %v3320_v20  ;;  %v1684_v22 = vadd.f32 %v3260_v56, %v1437_v39 }
 0x15b   : > { %v3290_v18 = vpop.f32.mrf.mxu0  ;;  %v3323_v33 = vpop.f32.mrf.mxu1 }
 0x15c   : > { %v3291_v12 = vadd.f32 %v3290_v18, %v3289_v2  ;;  %v2197_v18 = vadd.f32 %v3322_v11, %v1905_v51 }
 0x15d   : > { %v3292_v19 = vpop.f32.mrf.mxu0  ;;  %v3324_v25 = vpop.f32.mrf.mxu1 }
 0x15e   : > { %v1906_v20 = vadd.f32 %v3291_v12, %v1683_v14  ;;  %v3325_v50 = vadd.f32 %v3324_v25, %v3323_v33 }
 0x15f   : > { %v3293_v21 = vpop.f32.mrf.mxu0  ;;  %v4268_v29 = vpop.f32.mrf.mxu1 }
 0x160   : > { %v3294_v16 = vadd.f32 %v3293_v21, %v3292_v19  ;;  %v2198_v36 = vadd.f32 %v3325_v50, %v1906_v20 }
 0x161   : > { %v3295_v23 = vpop.f32.mrf.mxu0  ;;  %v4270_v37 = vpop.f32.mrf.mxu1 }
 0x162   : > { %v1907_v19 = vadd.f32 %v3294_v16, %v1684_v22  ;;  %v3328_v38 = vadd.f32 %v4270_v37, %v4268_v29 }
 0x163   : > { %v3296_v6 = vpop.f32.mrf.mxu0  ;;  %v3329_v40 = vpop.f32.mrf.mxu1 }
 0x165   : > { %v3330_v9 = vpop.f32.mrf.mxu1 }
 0x166   : > { %v2199_v9 = vadd.f32 %v3328_v38, %v1907_v19 }
 0x16d   : > { %v3348_v31 = vpop.f32.mrf.mxu0 }
 0x16f   : > { %v3349_v7 = vpop.f32.mrf.mxu0  ;;  %v3354_v62 = vpop.f32.mrf.mxu1 }
 0x170   : > { %v3350_v4 = vadd.f32 %v3349_v7, %v3348_v31 }
 0x171   : > { %v3351_v48 = vpop.f32.mrf.mxu0  ;;  %v3355_v2 = vpop.f32.mrf.mxu1 }
 0x172   : > { %v2442_v5 = vadd.f32 %v3350_v4, %v2195_v1  ;;  %v3356_v0 = vadd.f32 %v3355_v2, %v3354_v62 }
 0x173   : > { %v3352_v55 = vpop.f32.mrf.mxu0  ;;  %v3357_v60 = vpop.f32.mrf.mxu1 }
 0x174   : > { %v2454_v59 = vadd.f32 %v4278_v47, %v2442_v5  ;;  %v3353_v63 = vadd.f32 %v3352_v55, %v3351_v48  ;;  %v2444_v26 = vadd.f32 %v3356_v0, %v2197_v18  ;;  %v2483_v48 = vld [vmem:[%s4286_s18 + $0x10] sm:$0x7] }
 0x175   : > { %v3358_v30 = vpop.f32.mrf.mxu1 }
 0x176   : > { %v2459_v13 = vmax.f32 %v2454_v59, 0.0  ;;  %v2443_v52 = vadd.f32 %v3353_v63, %v2196_v58  ;;  %v2456_v33 = vadd.f32 %v4278_v47, %v2444_v26  ;;  %v3359_v25 = vadd.f32 %v3358_v30, %v3357_v60 }
 0x177   : > { %v3360_v40 = vpop.f32.mrf.mxu1 }
 0x178   : > { %v2464_v34 = vpack.c.bf16 %v2459_v13, %v2459_v13  ;;  %v2455_v57 = vadd.f32 %v4278_v47, %v2443_v52  ;;  %v2461_v8 = vmax.f32 %v2456_v33, 0.0  ;;  %v2445_v41 = vadd.f32 %v3359_v25, %v2198_v36 }
 0x179   : > { %v3361_v43 = vpop.f32.mrf.mxu1 }
 0x17a   : > { %v2472_v23 = vsel %vm4293_vm7, %v2464_v34, %v2471_v32  ;;  %v2460_v6 = vmax.f32 %v2455_v57, 0.0  ;;  %v2466_v31 = vpack.c.bf16 %v2461_v8, %v2461_v8  ;;  %v2457_v29 = vadd.f32 %v4278_v47, %v2445_v41 }
 0x17b   : > { %2473 = vst [vmem:[%s4286_s18] sm:$0x7] %v2472_v23  ;;  %v3362_v37 = vadd.f32 %v3361_v43, %v3360_v40  ;;  %v3363_v46 = vpop.f32.mrf.mxu1 }
 0x17c   : > { %v2465_v21 = vpack.c.bf16 %v2460_v6, %v2460_v6  ;;  %v2478_v17 = vsel %vm4293_vm7, %v2466_v31, %v2477_v42  ;;  %v2462_v44 = vmax.f32 %v2457_v29, 0.0 }
 0x17d   : > { %v2446_v35 = vadd.f32 %v3362_v37, %v2199_v9  ;;  %2479 = vst [vmem:[%s4286_s18 + $0x8] sm:$0x7] %v2478_v17  ;;  %v3364_v7 = vpop.f32.mrf.mxu1 }
 0x17e   : > { %v2475_v61 = vsel %vm4293_vm7, %v2465_v21, %v2474_v28  ;;  %v2467_v1 = vpack.c.bf16 %v2462_v44, %v2462_v44 }
 0x17f   : > { %2476 = vst [vmem:[%s4286_s18 + $0x4] sm:$0x7] %v2475_v61  ;;  %v2458_v3 = vadd.f32 %v4278_v47, %v2446_v35 }
 0x180   : > { %v2481_v4 = vsel %vm4293_vm7, %v2467_v1, %v2480_v45 }
 0x181   : > { %v2463_v24 = vmax.f32 %v2458_v3, 0.0  ;;  %2482 = vst [vmem:[%s4286_s18 + $0xc] sm:$0x7] %v2481_v4 }
 0x183   : > { %v2468_v49 = vpack.c.bf16 %v2463_v24, %v2463_v24 }
 0x185   : > { %v2484_v53 = vsel %vm4293_vm7, %v2468_v49, %v2483_v48 }
 0x186   : > { %2485 = vst [vmem:[%s4286_s18 + $0x10] sm:$0x7] %v2484_v53 }
 0x187 PF: > { %s13_s12 = sadd.s32 1, %s3560_s12  }
 0x188   : > { %p10_p4 = scmp.ge.s32.totalorder %s13_s12, 4  }
 0x18a   :  { %12 = sbr.rel (!%p10_p4) target bundleno = 1 (0x1), region = 72 }

// kernel: mnist_classifier_forward.5
= control target key start
LH: loop header
LB: loop body
LE: loop exit
PB: predicated region body
PF: predicated region fallthrough
CT: control target
= control target key end

     0   :  { %v441_v27 = vlaneseq  ;;  %v3241_v35 = vmov 1966171168   ;;  %vm3243_vm0 = vmmov 0   ;;  %s3974_s0 = inlined_call_operand.vmem [shape: bf16[2,3200], index: 0, kind: input, shape index: {}]   ;;  %s3975_s1 = inlined_call_operand.vmem [shape: bf16[3200,128], index: 1, kind: input, shape index: {}]   ;;  %s3976_s2 = inlined_call_operand.vmem [shape: f32[1,128], index: 2, kind: input, shape index: {}]   ;;  %s3977_s3 = inlined_call_operand.vmem [shape: bf16[128,128], index: 3, kind: input, shape index: {}]   ;;  %s3978_s4 = inlined_call_operand.vmem [shape: f32[1,128], index: 4, kind: input, shape index: {}]   ;;  %s3979_s5 = inlined_call_operand.hbm [shape: f32[2,128], index: 5, kind: output, shape index: {}]  }
   0x1   :  { %v3008_v0 = vld [vmem:[%s3975_s1 + $0x78] sm:$0xff]   ;;  %v3012_v4 = vld [vmem:[%s3975_s1 + $0x70] sm:$0xff]   ;;  %v3016_v8 = vld [vmem:[%s3975_s1 + $0x68] sm:$0xff]   ;;  %v439_v36 = vunpack.c.l.s4 %v3241_v35 }
   0x2   :  { %v3009_v1 = vld [vmem:[%s3975_s1 + $0x38] sm:$0xff]   ;;  %2682 = vmatprep.subr.bf16.mxu0 %v3008_v0  ;;  %v3013_v5 = vld [vmem:[%s3975_s1 + $0x30] sm:$0xff]   ;;  %v3017_v9 = vld [vmem:[%s3975_s1 + $0x28] sm:$0xff]   ;;  %v442_v32 = vshrl.u32 %v441_v27, 7 }
   0x3   :  { %v3010_v2 = vld [vmem:[%s3975_s1 + $0xf8] sm:$0xff]   ;;  %2683 = vmatpush3.bf16.msra.mxu0 %v3009_v1  ;;  %v3014_v6 = vld [vmem:[%s3975_s1 + $0xf0] sm:$0xff]   ;;  %v3018_v10 = vld [vmem:[%s3975_s1 + $0xe8] sm:$0xff]   ;;  %v440_v39 = vunpack.c.0.s8 %v439_v36 }
   0x4   :  { %v3011_v3 = vld [vmem:[%s3975_s1 + $0xb8] sm:$0xff]   ;;  %2704 = vmatprep.subr.bf16.mxu1 %v3010_v2  ;;  %2684 = vmatprep.subr.bf16.mxu0 %v3012_v4  ;;  %v3015_v7 = vld [vmem:[%s3975_s1 + $0xb0] sm:$0xff]   ;;  %v3019_v11 = vld [vmem:[%s3975_s1 + $0xa8] sm:$0xff]  }
   0x5   :  { %2705 = vmatpush3.bf16.msra.mxu1 %v3011_v3  ;;  %v3020_v12 = vld [vmem:[%s3975_s1 + $0x60] sm:$0xff]   ;;  %v3024_v16 = vld [vmem:[%s3975_s1 + $0x58] sm:$0xff]   ;;  %v3028_v20 = vld [vmem:[%s3975_s1 + $0x50] sm:$0xff]   ;;  %v3380_v41 = vsub.s32 %v440_v39, %v442_v32 }
   0x6   :  { %2706 = vmatprep.subr.bf16.mxu1 %v3014_v6  ;;  %v3021_v13 = vld [vmem:[%s3975_s1 + $0x20] sm:$0xff]   ;;  %v3025_v17 = vld [vmem:[%s3975_s1 + $0x18] sm:$0xff]   ;;  %v3029_v21 = vld [vmem:[%s3975_s1 + $0x10] sm:$0xff]  }
   0x7   :  { %2685 = vmatpush3.bf16.msra.mxu0 %v3013_v5  ;;  %v3022_v14 = vld [vmem:[%s3975_s1 + $0xe0] sm:$0xff]   ;;  %v3026_v18 = vld [vmem:[%s3975_s1 + $0xd8] sm:$0xff]   ;;  %v3030_v22 = vld [vmem:[%s3975_s1 + $0xd0] sm:$0xff]  }
   0x8   :  { %2686 = vmatprep.subr.bf16.mxu0 %v3016_v8  ;;  %v3023_v15 = vld [vmem:[%s3975_s1 + $0xa0] sm:$0xff]   ;;  %v3027_v19 = vld [vmem:[%s3975_s1 + $0x98] sm:$0xff]   ;;  %v3031_v23 = vld [vmem:[%s3975_s1 + $0x90] sm:$0xff]  }
   0x9   :  { %2707 = vmatpush3.bf16.msra.mxu1 %v3015_v7  ;;  %v3032_v24 = vld [vmem:[%s3975_s1 + $0x48] sm:$0xff]   ;;  %v3036_v29 = vld [vmem:[%s3975_s1 + $0x40] sm:$0xff]   ;;  %v3041_v37 = vld [vmem:[%s3975_s1 + $0x178] sm:$0xff]  }
   0xa   :  { %2708 = vmatprep.subr.bf16.mxu1 %v3018_v10  ;;  %v3033_v25 = vld [vmem:[%s3975_s1 + $0x8] sm:$0xff]   ;;  %v3037_v30 = vld [vmem:[%s3975_s1] sm:$0xff]   ;;  %v3043_v40 = vld [vmem:[%s3975_s1 + $0x1f8] sm:$0xff]  }
   0xb   :  { %2687 = vmatpush3.bf16.msra.mxu0 %v3017_v9  ;;  %v3034_v26 = vld [vmem:[%s3975_s1 + $0xc8] sm:$0xff]   ;;  %v3038_v31 = vld [vmem:[%s3975_s1 + $0xc0] sm:$0xff]   ;;  %v3042_v48 = vld [vmem:[%s3975_s1 + $0x138] sm:$0xff]  }
   0xc   :  { %2688 = vmatprep.subr.bf16.mxu0 %v3020_v12  ;;  %v3035_v28 = vld [vmem:[%s3975_s1 + $0x88] sm:$0xff]   ;;  %v22_v33 = vld [vmem:[%s3974_s0] sm:$0xff]  ;;  %v3045_v51 = vld [vmem:[%s3975_s1 + $0x170] sm:$0xff]  }
   0xd   :  { %2709 = vmatpush3.bf16.msra.mxu1 %v3019_v11  ;;  %v3040_v34 = vld [vmem:[%s3975_s1 + $0x80] sm:$0xff]   ;;  %v437_v38 = vcombine.high %v22_v33, %v22_v33  ;;  %v444_v42 = vrot.slane %v22_v33, %v3380_v41  ;;  %v3044_v53 = vld [vmem:[%s3975_s1 + $0x1b8] sm:$0xff]   ;;  %v3047_v54 = vld [vmem:[%s3975_s1 + $0x1f0] sm:$0xff]  }
   0xe   :  { %2710 = vmatprep.subr.bf16.mxu1 %v3022_v14  ;;  %v3046_v56 = vld [vmem:[%s3975_s1 + $0x130] sm:$0xff]   ;;  %v3049_v57 = vld [vmem:[%s3975_s1 + $0x168] sm:$0xff]   ;;  %v3053_v61 = vld [vmem:[%s3975_s1 + $0x160] sm:$0xff]  }
   0xf   :  { %2689 = vmatpush3.bf16.msra.mxu0 %v3021_v13  ;;  %v3384_v43 = vrot.slane %v437_v38, %v3380_v41  ;;  %v452_v44 = vcombine.high %v444_v42, %v444_v42  ;;  %v460_v45 = vrot.slane %v444_v42, %v3380_v41  ;;  %v3048_v58 = vld [vmem:[%s3975_s1 + $0x1b0] sm:$0xff]   ;;  %v3051_v59 = vld [vmem:[%s3975_s1 + $0x1e8] sm:$0xff]   ;;  %v3055_v63 = vld [vmem:[%s3975_s1 + $0x1e0] sm:$0xff]  }
  0x10   :  { %2690 = vmatprep.subr.bf16.mxu0 %v3024_v16  ;;  %v3050_v60 = vld [vmem:[%s3975_s1 + $0x128] sm:$0xff]   ;;  %v3054_v0 = vld [vmem:[%s3975_s1 + $0x120] sm:$0xff]   ;;  %v3057_v1 = vld [vmem:[%s3975_s1 + $0x158] sm:$0xff]  }
  0x11   :  { %2711 = vmatpush3.bf16.msra.mxu1 %v3023_v15  ;;  %v453_v46 = vcombine.high %v3384_v43, %v3384_v43  ;;  %v474_v47 = vrot.slane %v452_v44, %v3380_v41  ;;  %v482_v50 = vcombine.high %v460_v45, %v460_v45  ;;  %v3052_v62 = vld [vmem:[%s3975_s1 + $0x1a8] sm:$0xff]   ;;  %v3056_v2 = vld [vmem:[%s3975_s1 + $0x1a0] sm:$0xff]   ;;  %v3059_v3 = vld [vmem:[%s3975_s1 + $0x1d8] sm:$0xff]  }
  0x12   :  { %2712 = vmatprep.subr.bf16.mxu1 %v3026_v18  ;;  %v3058_v4 = vld [vmem:[%s3975_s1 + $0x118] sm:$0xff]   ;;  %v3061_v5 = vld [vmem:[%s3975_s1 + $0x150] sm:$0xff]   ;;  %v3065_v9 = vld [vmem:[%s3975_s1 + $0x148] sm:$0xff]  }
  0x13   :  { %2691 = vmatpush3.bf16.msra.mxu0 %v3025_v17  ;;  %v481_v49 = vrot.slane %v453_v46, %v3380_v41  ;;  %1855 = vmatprep.mubr.bf16.mxu0 %v474_v47  ;;  %v484_v52 = vcombine.high %v474_v47, %v474_v47  ;;  %v3060_v6 = vld [vmem:[%s3975_s1 + $0x198] sm:$0xff]   ;;  %v3063_v7 = vld [vmem:[%s3975_s1 + $0x1d0] sm:$0xff]   ;;  %v3067_v11 = vld [vmem:[%s3975_s1 + $0x1c8] sm:$0xff]   ;;  %v467_v17 = vrot.slane %v3384_v43, %v3380_v41 }
  0x14   :  { %2692 = vmatprep.subr.bf16.mxu0 %v3028_v20  ;;  %v3062_v8 = vld [vmem:[%s3975_s1 + $0x110] sm:$0xff]   ;;  %v3066_v12 = vld [vmem:[%s3975_s1 + $0x108] sm:$0xff]   ;;  %v3069_v13 = vld [vmem:[%s3975_s1 + $0x140] sm:$0xff]  }
  0x15   :  { %2713 = vmatpush3.bf16.msra.mxu1 %v3027_v19  ;;  %v485_v55 = vcombine.high %v481_v49, %v481_v49  ;;  %1895 = vmatprep.mubr.bf16.mxu1 %v484_v52  ;;  %v3064_v10 = vld [vmem:[%s3975_s1 + $0x190] sm:$0xff]   ;;  %v3068_v14 = vld [vmem:[%s3975_s1 + $0x188] sm:$0xff]   ;;  %v3071_v15 = vld [vmem:[%s3975_s1 + $0x1c0] sm:$0xff]  }
  0x16   :  { %2714 = vmatprep.subr.bf16.mxu1 %v3030_v22  ;;  %v3070_v16 = vld [vmem:[%s3975_s1 + $0x100] sm:$0xff]   ;;  %v3073_v18 = vld [vmem:[%s3975_s1 + $0x278] sm:$0xff]   ;;  %v483_v22 = vcombine.high %v467_v17, %v467_v17  ;;  %v3081_v27 = vld [vmem:[%s3975_s1 + $0x268] sm:$0xff]  }
  0x17   :  { %2693 = vmatpush3.bf16.msra.mxu0 %v3029_v21  ;;  %v3072_v19 = vld [vmem:[%s3975_s1 + $0x180] sm:$0xff]   ;;  %v3075_v20 = vld [vmem:[%s3975_s1 + $0x2f8] sm:$0xff]   ;;  %v3084_v32 = vld [vmem:[%s3975_s1 + $0x2a8] sm:$0xff]  }
  0x18   :  { %2694 = vmatprep.subr.bf16.mxu0 %v3032_v24  ;;  %v3074_v21 = vld [vmem:[%s3975_s1 + $0x238] sm:$0xff]   ;;  %v3087_v33 = vld [vmem:[%s3975_s1 + $0x2e0] sm:$0xff]   ;;  %v3093_v39 = vld [vmem:[%s3975_s1 + $0x250] sm:$0xff]  }
  0x19   :  { %2715 = vmatpush3.bf16.msra.mxu1 %v3031_v23  ;;  %v3077_v23 = vld [vmem:[%s3975_s1 + $0x270] sm:$0xff]   ;;  %v3076_v24 = vld [vmem:[%s3975_s1 + $0x2b8] sm:$0xff]   ;;  %v3088_v36 = vld [vmem:[%s3975_s1 + $0x2a0] sm:$0xff]  }
  0x1a   :  { %2716 = vmatprep.subr.bf16.mxu1 %v3034_v26  ;;  %v3078_v26 = vld [vmem:[%s3975_s1 + $0x230] sm:$0xff]   ;;  %v3089_v35 = vld [vmem:[%s3975_s1 + $0x258] sm:$0xff]   ;;  %v3097_v44 = vld [vmem:[%s3975_s1 + $0x248] sm:$0xff]  }
  0x1b   :  { %2695 = vmatpush3.bf16.msra.mxu0 %v3033_v25  ;;  %v3079_v25 = vld [vmem:[%s3975_s1 + $0x2f0] sm:$0xff]   ;;  %v3090_v38 = vld [vmem:[%s3975_s1 + $0x218] sm:$0xff]  }
  0x1c   :  { %2696 = vmatprep.subr.bf16.mxu0 %v3036_v29  ;;  %v3083_v29 = vld [vmem:[%s3975_s1 + $0x2e8] sm:$0xff]   ;;  %v3095_v42 = vld [vmem:[%s3975_s1 + $0x2d0] sm:$0xff]  }
  0x1d   :  { %2717 = vmatpush3.bf16.msra.mxu1 %v3035_v28  ;;  %v3080_v28 = vld [vmem:[%s3975_s1 + $0x2b0] sm:$0xff]  }
  0x1e   :  { %2718 = vmatprep.subr.bf16.mxu1 %v3038_v31  ;;  %v3085_v31 = vld [vmem:[%s3975_s1 + $0x260] sm:$0xff]   ;;  %v3094_v43 = vld [vmem:[%s3975_s1 + $0x210] sm:$0xff]  }
  0x1f   :  { %2697 = vmatpush3.bf16.msra.mxu0 %v3037_v30  ;;  %v3082_v30 = vld [vmem:[%s3975_s1 + $0x228] sm:$0xff]   ;;  %v3096_v46 = vld [vmem:[%s3975_s1 + $0x290] sm:$0xff]  }
  0x20   :  { %2726 = vmatprep.subr.bf16.mxu0 %v3041_v37  ;;  %v3091_v37 = vld [vmem:[%s3975_s1 + $0x2d8] sm:$0xff]  }
  0x21   :  { %2719 = vmatpush3.bf16.msra.mxu1 %v3040_v34  ;;  %v3086_v34 = vld [vmem:[%s3975_s1 + $0x220] sm:$0xff]  }
  0x22   :  { %2748 = vmatprep.subr.bf16.mxu1 %v3043_v40  ;;  %1856 = vmatmul.mubr.bf16.vlgmr.msra.gmra.mxu0 %v460_v45  ;;  %v3092_v40 = vld [vmem:[%s3975_s1 + $0x298] sm:$0xff]   ;;  %v23_v45 = vld [vmem:[%s3974_s0 + $0x8] sm:$0xff] }
  0x23   :  { %2727 = vmatpush3.bf16.msra.mxu0 %v3042_v48  ;;  %1935 = vmatprep.mubr.bf16.mxu0 %v481_v49  ;;  %v493_v47 = vrot.slane %v23_v45, %v3380_v41  ;;  %v486_v48 = vcombine.high %v23_v45, %v23_v45  ;;  %v3099_v49 = vld [vmem:[%s3975_s1 + $0x2c8] sm:$0xff]  }
  0x24   :  { %1896 = vmatmul.mubr.bf16.vlgmr.msra.gmra.mxu1 %v482_v50  ;;  %2728 = vmatprep.subr.bf16.mxu0 %v3045_v51  ;;  %v3098_v50 = vld [vmem:[%s3975_s1 + $0x208] sm:$0xff]  }
  0x25   :  { %2749 = vmatpush3.bf16.msra.mxu1 %v3044_v53  ;;  %1975 = vmatprep.mubr.bf16.mxu1 %v485_v55  ;;  %v501_v51 = vcombine.high %v493_v47, %v493_v47  ;;  %v3569_v52 = vrot.slane %v486_v48, %v3380_v41  ;;  %v3101_v53 = vld [vmem:[%s3975_s1 + $0x240] sm:$0xff]   ;;  %v3148_v45 = vld [vmem:[%s3975_s1 + $0x4e8] sm:$0xff]  }
  0x26   :  { %2750 = vmatprep.subr.bf16.mxu1 %v3047_v54  ;;  %v3100_v54 = vld [vmem:[%s3975_s1 + $0x288] sm:$0xff]  }
  0x27   :  { %2729 = vmatpush3.bf16.msra.mxu0 %v3046_v56  ;;  %v523_v55 = vrot.slane %v501_v51, %v3380_v41  ;;  %v502_v56 = vcombine.high %v3569_v52, %v3569_v52  ;;  %v3149_v48 = vld [vmem:[%s3975_s1 + $0x4a8] sm:$0xff]   ;;  %v3154_v51 = vld [vmem:[%s3975_s1 + $0x458] sm:$0xff]  }
  0x28   :  { %2730 = vmatprep.subr.bf16.mxu0 %v3049_v57  ;;  %v3103_v57 = vld [vmem:[%s3975_s1 + $0x2c0] sm:$0xff]  }
  0x29   :  { %2751 = vmatpush3.bf16.msra.mxu1 %v3048_v58  ;;  %v3102_v58 = vld [vmem:[%s3975_s1 + $0x200] sm:$0xff]  }
  0x2a   :  { %2752 = vmatprep.subr.bf16.mxu1 %v3051_v59  ;;  %v533_v59 = vcombine.high %v523_v55, %v523_v55 }
  0x2b   :  { %2731 = vmatpush3.bf16.msra.mxu0 %v3050_v60  ;;  %v509_v60 = vrot.slane %v493_v47, %v3380_v41  ;;  %v3150_v47 = vld [vmem:[%s3975_s1 + $0x460] sm:$0xff]  }
  0x2c   :  { %2732 = vmatprep.subr.bf16.mxu0 %v3053_v61  ;;  %v3105_v61 = vld [vmem:[%s3975_s1 + $0x378] sm:$0xff]  }
  0x2d   :  { %2753 = vmatpush3.bf16.msra.mxu1 %v3052_v62  ;;  %v3104_v62 = vld [vmem:[%s3975_s1 + $0x280] sm:$0xff]  }
  0x2e   :  { %2754 = vmatprep.subr.bf16.mxu1 %v3055_v63  ;;  %v530_v63 = vrot.slane %v502_v56, %v3380_v41  ;;  %v3157_v56 = vld [vmem:[%s3975_s1 + $0x498] sm:$0xff]  }
  0x2f   :  { %2733 = vmatpush3.bf16.msra.mxu0 %v3054_v0  ;;  %v3107_v0 = vld [vmem:[%s3975_s1 + $0x3f8] sm:$0xff]  }
  0x30   :  { %2734 = vmatprep.subr.bf16.mxu0 %v3057_v1  ;;  %v3106_v1 = vld [vmem:[%s3975_s1 + $0x338] sm:$0xff]  }
  0x31   :  { %2755 = vmatpush3.bf16.msra.mxu1 %v3056_v2  ;;  %v531_v2 = vcombine.high %v509_v60, %v509_v60 }
  0x32   :  { %2756 = vmatprep.subr.bf16.mxu1 %v3059_v3  ;;  %v3109_v3 = vld [vmem:[%s3975_s1 + $0x370] sm:$0xff]  }
  0x33   :  { %2735 = vmatpush3.bf16.msra.mxu0 %v3058_v4  ;;  %v3108_v4 = vld [vmem:[%s3975_s1 + $0x3b8] sm:$0xff]  }
  0x34   :  { %2736 = vmatprep.subr.bf16.mxu0 %v3061_v5  ;;  %v534_v5 = vcombine.high %v530_v63, %v530_v63 }
  0x35   :  { %2757 = vmatpush3.bf16.msra.mxu1 %v3060_v6  ;;  %v3111_v6 = vld [vmem:[%s3975_s1 + $0x3f0] sm:$0xff]  }
  0x36   :  { %2758 = vmatprep.subr.bf16.mxu1 %v3063_v7  ;;  %v3110_v7 = vld [vmem:[%s3975_s1 + $0x330] sm:$0xff]  }
  0x37   :  { %2737 = vmatpush3.bf16.msra.mxu0 %v3062_v8  ;;  %v3113_v8 = vld [vmem:[%s3975_s1 + $0x368] sm:$0xff]  }
  0x38   :  { %2738 = vmatprep.subr.bf16.mxu0 %v3065_v9  ;;  %v3112_v9 = vld [vmem:[%s3975_s1 + $0x3b0] sm:$0xff]  }
  0x39   :  { %2759 = vmatpush3.bf16.msra.mxu1 %v3064_v10  ;;  %v3115_v10 = vld [vmem:[%s3975_s1 + $0x3e8] sm:$0xff]  }
  0x3a   :  { %2760 = vmatprep.subr.bf16.mxu1 %v3067_v11  ;;  %v3114_v11 = vld [vmem:[%s3975_s1 + $0x328] sm:$0xff]  }
  0x3b   :  { %2739 = vmatpush3.bf16.msra.mxu0 %v3066_v12  ;;  %v3117_v12 = vld [vmem:[%s3975_s1 + $0x360] sm:$0xff]  }
  0x3c   :  { %2740 = vmatprep.subr.bf16.mxu0 %v3069_v13  ;;  %v3116_v13 = vld [vmem:[%s3975_s1 + $0x3a8] sm:$0xff]  }
  0x3d   :  { %2761 = vmatpush3.bf16.msra.mxu1 %v3068_v14  ;;  %v3119_v14 = vld [vmem:[%s3975_s1 + $0x3e0] sm:$0xff]  }
  0x3e   :  { %2762 = vmatprep.subr.bf16.mxu1 %v3071_v15  ;;  %v3118_v15 = vld [vmem:[%s3975_s1 + $0x320] sm:$0xff]  }
  0x3f   :  { %2741 = vmatpush3.bf16.msra.mxu0 %v3070_v16  ;;  %v3121_v16 = vld [vmem:[%s3975_s1 + $0x358] sm:$0xff]  }
  0x40   :  { %2770 = vmatprep.subr.bf16.mxu0 %v3073_v18  ;;  %v3123_v18 = vld [vmem:[%s3975_s1 + $0x3d8] sm:$0xff]  }
  0x41   :  { %2763 = vmatpush3.bf16.msra.mxu1 %v3072_v19  ;;  %v3122_v19 = vld [vmem:[%s3975_s1 + $0x318] sm:$0xff]  }
  0x42   :  { %1936 = vmatmul.mubr.bf16.vlgmr.msra.gmra.mxu0 %v467_v17  ;;  %2792 = vmatprep.subr.bf16.mxu1 %v3075_v20  ;;  %v3120_v17 = vld [vmem:[%s3975_s1 + $0x3a0] sm:$0xff]   ;;  %v3125_v20 = vld [vmem:[%s3975_s1 + $0x350] sm:$0xff]  }
  0x43   :  { %2771 = vmatpush3.bf16.msra.mxu0 %v3074_v21  ;;  %2015 = vmatprep.mubr.bf16.mxu0 %v523_v55  ;;  %v3124_v21 = vld [vmem:[%s3975_s1 + $0x398] sm:$0xff]   ;;  %v3158_v55 = vld [vmem:[%s3975_s1 + $0x450] sm:$0xff]  }
  0x44   :  { %1976 = vmatmul.mubr.bf16.vlgmr.msra.gmra.mxu1 %v483_v22  ;;  %2772 = vmatprep.subr.bf16.mxu0 %v3077_v23  ;;  %v3127_v22 = vld [vmem:[%s3975_s1 + $0x3d0] sm:$0xff]  }
  0x45   :  { %2793 = vmatpush3.bf16.msra.mxu1 %v3076_v24  ;;  %2055 = vmatprep.mubr.bf16.mxu1 %v533_v59  ;;  %v3126_v23 = vld [vmem:[%s3975_s1 + $0x310] sm:$0xff]   ;;  %v3129_v24 = vld [vmem:[%s3975_s1 + $0x348] sm:$0xff]  }
  0x46   :  { %2794 = vmatprep.subr.bf16.mxu1 %v3079_v25  ;;  %v3128_v25 = vld [vmem:[%s3975_s1 + $0x390] sm:$0xff]   ;;  %v3162_v59 = vld [vmem:[%s3975_s1 + $0x448] sm:$0xff]  }
  0x47   :  { %2773 = vmatpush3.bf16.msra.mxu0 %v3078_v26  ;;  %v3131_v26 = vld [vmem:[%s3975_s1 + $0x3c8] sm:$0xff]  }
  0x48   :  { %2774 = vmatprep.subr.bf16.mxu0 %v3081_v27  ;;  %v3130_v27 = vld [vmem:[%s3975_s1 + $0x308] sm:$0xff]  }
  0x49   :  { %2795 = vmatpush3.bf16.msra.mxu1 %v3080_v28  ;;  %v3133_v28 = vld [vmem:[%s3975_s1 + $0x340] sm:$0xff]  }
  0x4a   :  { %2796 = vmatprep.subr.bf16.mxu1 %v3083_v29  ;;  %v3132_v29 = vld [vmem:[%s3975_s1 + $0x388] sm:$0xff]  }
  0x4b   :  { %2775 = vmatpush3.bf16.msra.mxu0 %v3082_v30  ;;  %v3135_v30 = vld [vmem:[%s3975_s1 + $0x3c0] sm:$0xff]  }
  0x4c   :  { %2776 = vmatprep.subr.bf16.mxu0 %v3085_v31  ;;  %v3134_v31 = vld [vmem:[%s3975_s1 + $0x300] sm:$0xff]  }
  0x4d   :  { %2797 = vmatpush3.bf16.msra.mxu1 %v3084_v32  ;;  %v516_v32 = vrot.slane %v3569_v52, %v3380_v41  ;;  %v3153_v52 = vld [vmem:[%s3975_s1 + $0x4a0] sm:$0xff]  }
  0x4e   :  { %2798 = vmatprep.subr.bf16.mxu1 %v3087_v33  ;;  %v3138_v33 = vld [vmem:[%s3975_s1 + $0x478] sm:$0xff]  }
  0x4f   :  { %2777 = vmatpush3.bf16.msra.mxu0 %v3086_v34  ;;  %v3137_v34 = vld [vmem:[%s3975_s1 + $0x380] sm:$0xff]  }
  0x50   :  { %2778 = vmatprep.subr.bf16.mxu0 %v3089_v35  ;;  %v3140_v35 = vld [vmem:[%s3975_s1 + $0x4f8] sm:$0xff]  }
  0x51   :  { %2799 = vmatpush3.bf16.msra.mxu1 %v3088_v36  ;;  %v3139_v36 = vld [vmem:[%s3975_s1 + $0x438] sm:$0xff]  }
  0x52   :  { %2800 = vmatprep.subr.bf16.mxu1 %v3091_v37  ;;  %v532_v37 = vcombine.high %v516_v32, %v516_v32 }
  0x53   :  { %2779 = vmatpush3.bf16.msra.mxu0 %v3090_v38  ;;  %v3142_v38 = vld [vmem:[%s3975_s1 + $0x470] sm:$0xff]  }
  0x54   :  { %2780 = vmatprep.subr.bf16.mxu0 %v3093_v39  ;;  %v3141_v39 = vld [vmem:[%s3975_s1 + $0x4b8] sm:$0xff]  }
  0x55   :  { %2801 = vmatpush3.bf16.msra.mxu1 %v3092_v40  ;;  %v3144_v40 = vld [vmem:[%s3975_s1 + $0x4f0] sm:$0xff]  }
  0x56   :  { %2802 = vmatprep.subr.bf16.mxu1 %v3095_v42  ;;  %v3143_v42 = vld [vmem:[%s3975_s1 + $0x430] sm:$0xff]  }
  0x57   :  { %2781 = vmatpush3.bf16.msra.mxu0 %v3094_v43  ;;  %v3146_v43 = vld [vmem:[%s3975_s1 + $0x468] sm:$0xff]  }
  0x58   :  { %2782 = vmatprep.subr.bf16.mxu0 %v3097_v44  ;;  %v3145_v44 = vld [vmem:[%s3975_s1 + $0x4b0] sm:$0xff]  }
  0x59   :  { %2803 = vmatpush3.bf16.msra.mxu1 %v3096_v46  ;;  %v3147_v46 = vld [vmem:[%s3975_s1 + $0x428] sm:$0xff]  }
  0x5a   :  { %2804 = vmatprep.subr.bf16.mxu1 %v3099_v49  ;;  %v3152_v49 = vld [vmem:[%s3975_s1 + $0x4e0] sm:$0xff]  }
  0x5b   :  { %2783 = vmatpush3.bf16.msra.mxu0 %v3098_v50  ;;  %v3151_v50 = vld [vmem:[%s3975_s1 + $0x420] sm:$0xff]  }
  0x5c   :  { %2784 = vmatprep.subr.bf16.mxu0 %v3101_v53  ;;  %v3156_v53 = vld [vmem:[%s3975_s1 + $0x4d8] sm:$0xff]  }
  0x5d   :  { %2805 = vmatpush3.bf16.msra.mxu1 %v3100_v54  ;;  %v3155_v54 = vld [vmem:[%s3975_s1 + $0x418] sm:$0xff]  }
  0x5e   :  { %2806 = vmatprep.subr.bf16.mxu1 %v3103_v57  ;;  %v3160_v57 = vld [vmem:[%s3975_s1 + $0x4d0] sm:$0xff]  }
  0x5f   :  { %2785 = vmatpush3.bf16.msra.mxu0 %v3102_v58  ;;  %v3159_v58 = vld [vmem:[%s3975_s1 + $0x410] sm:$0xff]  }
  0x60   :  { %2814 = vmatprep.subr.bf16.mxu0 %v3105_v61  ;;  %v3161_v61 = vld [vmem:[%s3975_s1 + $0x490] sm:$0xff]  }
  0x61   :  { %2807 = vmatpush3.bf16.msra.mxu1 %v3104_v62 }
  0x62   :  { %2016 = vmatmul.mubr.bf16.vlgmr.msra.gmra.mxu0 %v509_v60  ;;  %2836 = vmatprep.subr.bf16.mxu1 %v3107_v0  ;;  %v24_v60 = vld [vmem:[%s3974_s0 + $0x10] sm:$0xff]  ;;  %v3164_v0 = vld [vmem:[%s3975_s1 + $0x4c8] sm:$0xff]  }
  0x63   :  { %2815 = vmatpush3.bf16.msra.mxu0 %v3106_v1  ;;  %2095 = vmatprep.mubr.bf16.mxu0 %v530_v63  ;;  %v542_v62 = vrot.slane %v24_v60, %v3380_v41  ;;  %v535_v63 = vcombine.high %v24_v60, %v24_v60  ;;  %v3163_v1 = vld [vmem:[%s3975_s1 + $0x408] sm:$0xff]  }
  0x64   :  { %2056 = vmatmul.mubr.bf16.vlgmr.msra.gmra.mxu1 %v531_v2  ;;  %2816 = vmatprep.subr.bf16.mxu0 %v3109_v3 }
  0x65   :  { %2837 = vmatpush3.bf16.msra.mxu1 %v3108_v4  ;;  %2135 = vmatprep.mubr.bf16.mxu1 %v534_v5  ;;  %v550_v2 = vcombine.high %v542_v62, %v542_v62  ;;  %v3775_v3 = vrot.slane %v535_v63, %v3380_v41  ;;  %v3166_v4 = vld [vmem:[%s3975_s1 + $0x440] sm:$0xff]   ;;  %v3165_v5 = vld [vmem:[%s3975_s1 + $0x488] sm:$0xff]  }
  0x66   :  { %2838 = vmatprep.subr.bf16.mxu1 %v3111_v6 }
  0x67   :  { %2817 = vmatpush3.bf16.msra.mxu0 %v3110_v7  ;;  %v572_v6 = vrot.slane %v550_v2, %v3380_v41  ;;  %v551_v7 = vcombine.high %v3775_v3, %v3775_v3 }
  0x68   :  { %2818 = vmatprep.subr.bf16.mxu0 %v3113_v8  ;;  %v3168_v8 = vld [vmem:[%s3975_s1 + $0x4c0] sm:$0xff]  }
  0x69   :  { %2839 = vmatpush3.bf16.msra.mxu1 %v3112_v9  ;;  %v3167_v9 = vld [vmem:[%s3975_s1 + $0x400] sm:$0xff]  }
  0x6a   :  { %2840 = vmatprep.subr.bf16.mxu1 %v3115_v10  ;;  %v582_v10 = vcombine.high %v572_v6, %v572_v6 }
  0x6b   :  { %2819 = vmatpush3.bf16.msra.mxu0 %v3114_v11  ;;  %v558_v11 = vrot.slane %v542_v62, %v3380_v41 }
  0x6c   :  { %2820 = vmatprep.subr.bf16.mxu0 %v3117_v12  ;;  %v3170_v12 = vld [vmem:[%s3975_s1 + $0x578] sm:$0xff]  }
  0x6d   :  { %2841 = vmatpush3.bf16.msra.mxu1 %v3116_v13  ;;  %v3169_v13 = vld [vmem:[%s3975_s1 + $0x480] sm:$0xff]  }
  0x6e   :  { %2842 = vmatprep.subr.bf16.mxu1 %v3119_v14  ;;  %v579_v14 = vrot.slane %v551_v7, %v3380_v41 }
  0x6f   :  { %2821 = vmatpush3.bf16.msra.mxu0 %v3118_v15  ;;  %v3172_v15 = vld [vmem:[%s3975_s1 + $0x5f8] sm:$0xff]  }
  0x70   :  { %2822 = vmatprep.subr.bf16.mxu0 %v3121_v16  ;;  %v3171_v16 = vld [vmem:[%s3975_s1 + $0x538] sm:$0xff]  }
  0x71   :  { %2843 = vmatpush3.bf16.msra.mxu1 %v3120_v17  ;;  %v580_v17 = vcombine.high %v558_v11, %v558_v11 }
  0x72   :  { %2844 = vmatprep.subr.bf16.mxu1 %v3123_v18  ;;  %v3174_v18 = vld [vmem:[%s3975_s1 + $0x570] sm:$0xff]  }
  0x73   :  { %2823 = vmatpush3.bf16.msra.mxu0 %v3122_v19  ;;  %v3173_v19 = vld [vmem:[%s3975_s1 + $0x5b8] sm:$0xff]  }
  0x74   :  { %2824 = vmatprep.subr.bf16.mxu0 %v3125_v20  ;;  %v583_v20 = vcombine.high %v579_v14, %v579_v14 }
  0x75   :  { %2845 = vmatpush3.bf16.msra.mxu1 %v3124_v21  ;;  %v3176_v21 = vld [vmem:[%s3975_s1 + $0x5f0] sm:$0xff]  }
  0x76   :  { %2846 = vmatprep.subr.bf16.mxu1 %v3127_v22  ;;  %v3175_v22 = vld [vmem:[%s3975_s1 + $0x530] sm:$0xff]  }
  0x77   :  { %2825 = vmatpush3.bf16.msra.mxu0 %v3126_v23  ;;  %v3178_v23 = vld [vmem:[%s3975_s1 + $0x568] sm:$0xff]  }
  0x78   :  { %2826 = vmatprep.subr.bf16.mxu0 %v3129_v24  ;;  %v3177_v24 = vld [vmem:[%s3975_s1 + $0x5b0] sm:$0xff]  }
  0x79   :  { %2847 = vmatpush3.bf16.msra.mxu1 %v3128_v25  ;;  %v3180_v25 = vld [vmem:[%s3975_s1 + $0x5e8] sm:$0xff]  }
  0x7a   :  { %2848 = vmatprep.subr.bf16.mxu1 %v3131_v26  ;;  %v3179_v26 = vld [vmem:[%s3975_s1 + $0x528] sm:$0xff]  }
  0x7b   :  { %2827 = vmatpush3.bf16.msra.mxu0 %v3130_v27  ;;  %v3182_v27 = vld [vmem:[%s3975_s1 + $0x560] sm:$0xff]  }
  0x7c   :  { %2828 = vmatprep.subr.bf16.mxu0 %v3133_v28  ;;  %v3181_v28 = vld [vmem:[%s3975_s1 + $0x5a8] sm:$0xff]  }
  0x7d   :  { %2849 = vmatpush3.bf16.msra.mxu1 %v3132_v29  ;;  %v3184_v29 = vld [vmem:[%s3975_s1 + $0x5e0] sm:$0xff]  }
  0x7e   :  { %2850 = vmatprep.subr.bf16.mxu1 %v3135_v30  ;;  %v3183_v30 = vld [vmem:[%s3975_s1 + $0x520] sm:$0xff]  }
  0x7f   :  { %2829 = vmatpush3.bf16.msra.mxu0 %v3134_v31  ;;  %v3186_v31 = vld [vmem:[%s3975_s1 + $0x558] sm:$0xff]  }
  0x80   :  { %2858 = vmatprep.subr.bf16.mxu0 %v3138_v33  ;;  %v3188_v33 = vld [vmem:[%s3975_s1 + $0x5d8] sm:$0xff]  }
  0x81   :  { %2851 = vmatpush3.bf16.msra.mxu1 %v3137_v34  ;;  %v3187_v34 = vld [vmem:[%s3975_s1 + $0x518] sm:$0xff]  }
  0x82   :  { %2096 = vmatmul.mubr.bf16.vlgmr.msra.gmra.mxu0 %v516_v32  ;;  %2880 = vmatprep.subr.bf16.mxu1 %v3140_v35  ;;  %v3185_v32 = vld [vmem:[%s3975_s1 + $0x5a0] sm:$0xff]   ;;  %v3190_v35 = vld [vmem:[%s3975_s1 + $0x550] sm:$0xff]  }
  0x83   :  { %2859 = vmatpush3.bf16.msra.mxu0 %v3139_v36  ;;  %2175 = vmatprep.mubr.bf16.mxu0 %v572_v6  ;;  %v3189_v36 = vld [vmem:[%s3975_s1 + $0x598] sm:$0xff]  }
  0x84   :  { %2136 = vmatmul.mubr.bf16.vlgmr.msra.gmra.mxu1 %v532_v37  ;;  %2860 = vmatprep.subr.bf16.mxu0 %v3142_v38  ;;  %v3192_v37 = vld [vmem:[%s3975_s1 + $0x5d0] sm:$0xff]  }
  0x85   :  { %2881 = vmatpush3.bf16.msra.mxu1 %v3141_v39  ;;  %2215 = vmatprep.mubr.bf16.mxu1 %v582_v10  ;;  %v3191_v38 = vld [vmem:[%s3975_s1 + $0x510] sm:$0xff]   ;;  %v3194_v39 = vld [vmem:[%s3975_s1 + $0x548] sm:$0xff]  }
  0x86   :  { %2882 = vmatprep.subr.bf16.mxu1 %v3144_v40  ;;  %v3193_v40 = vld [vmem:[%s3975_s1 + $0x590] sm:$0xff]  }
  0x87   :  { %2861 = vmatpush3.bf16.msra.mxu0 %v3143_v42  ;;  %v3196_v42 = vld [vmem:[%s3975_s1 + $0x5c8] sm:$0xff]  }
  0x88   :  { %2862 = vmatprep.subr.bf16.mxu0 %v3146_v43  ;;  %v3195_v43 = vld [vmem:[%s3975_s1 + $0x508] sm:$0xff]  }
  0x89   :  { %2883 = vmatpush3.bf16.msra.mxu1 %v3145_v44  ;;  %v3198_v44 = vld [vmem:[%s3975_s1 + $0x540] sm:$0xff]  }
  0x8a   :  { %2884 = vmatprep.subr.bf16.mxu1 %v3148_v45  ;;  %v3197_v45 = vld [vmem:[%s3975_s1 + $0x588] sm:$0xff]  }
  0x8b   :  { %2863 = vmatpush3.bf16.msra.mxu0 %v3147_v46  ;;  %v3200_v46 = vld [vmem:[%s3975_s1 + $0x5c0] sm:$0xff]  }
  0x8c   :  { %2864 = vmatprep.subr.bf16.mxu0 %v3150_v47  ;;  %v3199_v47 = vld [vmem:[%s3975_s1 + $0x500] sm:$0xff]  }
  0x8d   :  { %2885 = vmatpush3.bf16.msra.mxu1 %v3149_v48  ;;  %v565_v48 = vrot.slane %v3775_v3, %v3380_v41 }
  0x8e   :  { %2886 = vmatprep.subr.bf16.mxu1 %v3152_v49  ;;  %v3202_v49 = vld [vmem:[%s3975_s1 + $0x580] sm:$0xff]  }
  0x8f   :  { %2865 = vmatpush3.bf16.msra.mxu0 %v3151_v50  ;;  %v3203_v50 = vld [vmem:[%s3975_s1 + $0x638] sm:$0xff]  }
  0x90   :  { %2866 = vmatprep.subr.bf16.mxu0 %v3154_v51  ;;  %v3242_v51 = vmov 0.0  }
  0x91   :  { %2887 = vmatpush3.bf16.msra.mxu1 %v3153_v52  ;;  %v581_v52 = vcombine.high %v565_v48, %v565_v48 }
  0x92   :  { %2888 = vmatprep.subr.bf16.mxu1 %v3156_v53  ;;  %v3204_v53 = vld [vmem:[%s3975_s1 + $0x630] sm:$0xff]  }
  0x93   :  { %2867 = vmatpush3.bf16.msra.mxu0 %v3155_v54 }
  0x94   :  { %2868 = vmatprep.subr.bf16.mxu0 %v3158_v55 }
  0x95   :  { %2889 = vmatpush3.bf16.msra.mxu1 %v3157_v56 }
  0x96   :  { %2890 = vmatprep.subr.bf16.mxu1 %v3160_v57 }
  0x97   :  { %2869 = vmatpush3.bf16.msra.mxu0 %v3159_v58 }
  0x98   :  { %2870 = vmatprep.subr.bf16.mxu0 %v3162_v59 }
  0x99   :  { %2891 = vmatpush3.bf16.msra.mxu1 %v3161_v61 }
  0x9a   :  { %2892 = vmatprep.subr.bf16.mxu1 %v3164_v0 }
  0x9b   :  { %2871 = vmatpush3.bf16.msra.mxu0 %v3163_v1 }
  0x9c   :  { %2872 = vmatprep.subr.bf16.mxu0 %v3166_v4 }
  0x9d   :  { %2893 = vmatpush3.bf16.msra.mxu1 %v3165_v5 }
  0x9e   :  { %2894 = vmatprep.subr.bf16.mxu1 %v3168_v8 }
  0x9f   :  { %2873 = vmatpush3.bf16.msra.mxu0 %v3167_v9 }
  0xa0   :  { %2902 = vmatprep.subr.bf16.mxu0 %v3170_v12 }
  0xa1   :  { %2895 = vmatpush3.bf16.msra.mxu1 %v3169_v13 }
  0xa2   :  { %2176 = vmatmul.mubr.bf16.vlgmr.msra.gmra.mxu0 %v558_v11  ;;  %2924 = vmatprep.subr.bf16.mxu1 %v3172_v15 }
  0xa3   :  { %2903 = vmatpush3.bf16.msra.mxu0 %v3171_v16  ;;  %2255 = vmatprep.mubr.bf16.mxu0 %v579_v14 }
  0xa4   :  { %2216 = vmatmul.mubr.bf16.vlgmr.msra.gmra.mxu1 %v580_v17  ;;  %2904 = vmatprep.subr.bf16.mxu0 %v3174_v18 }
  0xa5   :  { %2925 = vmatpush3.bf16.msra.mxu1 %v3173_v19  ;;  %2295 = vmatprep.mubr.bf16.mxu1 %v583_v20 }
  0xa6   :  { %2926 = vmatprep.subr.bf16.mxu1 %v3176_v21 }
  0xa7   :  { %2905 = vmatpush3.bf16.msra.mxu0 %v3175_v22 }
  0xa8   :  { %2906 = vmatprep.subr.bf16.mxu0 %v3178_v23 }
  0xa9   :  { %2927 = vmatpush3.bf16.msra.mxu1 %v3177_v24 }
  0xaa   :  { %2928 = vmatprep.subr.bf16.mxu1 %v3180_v25 }
  0xab   :  { %2907 = vmatpush3.bf16.msra.mxu0 %v3179_v26 }
  0xac   :  { %2908 = vmatprep.subr.bf16.mxu0 %v3182_v27 }
  0xad   :  { %2929 = vmatpush3.bf16.msra.mxu1 %v3181_v28 }
  0xae   :  { %2930 = vmatprep.subr.bf16.mxu1 %v3184_v29 }
  0xaf   :  { %2909 = vmatpush3.bf16.msra.mxu0 %v3183_v30 }
  0xb0   :  { %2910 = vmatprep.subr.bf16.mxu0 %v3186_v31 }
  0xb1   :  { %2931 = vmatpush3.bf16.msra.mxu1 %v3185_v32 }
  0xb2   :  { %2932 = vmatprep.subr.bf16.mxu1 %v3188_v33 }
  0xb3   :  { %2911 = vmatpush3.bf16.msra.mxu0 %v3187_v34 }
  0xb4   :  { %2912 = vmatprep.subr.bf16.mxu0 %v3190_v35 }
  0xb5   :  { %2933 = vmatpush3.bf16.msra.mxu1 %v3189_v36 }
  0xb6   :  { %2934 = vmatprep.subr.bf16.mxu1 %v3192_v37 }
  0xb7   :  { %2913 = vmatpush3.bf16.msra.mxu0 %v3191_v38 }
  0xb8   :  { %2914 = vmatprep.subr.bf16.mxu0 %v3194_v39 }
  0xb9   :  { %2935 = vmatpush3.bf16.msra.mxu1 %v3193_v40 }
  0xba   :  { %2936 = vmatprep.subr.bf16.mxu1 %v3196_v42 }
  0xbb   :  { %2915 = vmatpush3.bf16.msra.mxu0 %v3195_v43 }
  0xbc   :  { %2916 = vmatprep.subr.bf16.mxu0 %v3198_v44 }
  0xbd   :  { %2937 = vmatpush3.bf16.msra.mxu1 %v3197_v45 }
  0xbe   :  { %2938 = vmatprep.subr.bf16.mxu1 %v3200_v46 }
  0xbf   :  { %2917 = vmatpush3.bf16.msra.mxu0 %v3199_v47 }
  0xc0   :  { %2964 = vmatprep.subr.bf16.mxu0 %v3242_v51 }
  0xc1   :  { %2939 = vmatpush3.bf16.msra.mxu1 %v3202_v49 }
  0xc2   :  { %2256 = vmatmul.mubr.bf16.vlgmr.msra.gmra.mxu0 %v565_v48  ;;  %2984 = vmatprep.subr.bf16.mxu1 %v3242_v51 }
  0xc3   :  { %2965 = vmatpush3.bf16.msra.mxu0 %v3203_v50  ;;  %2980 = vmatprep.mubr.msk.bf16.mxu0 %vm3243_vm0, %v3242_v51 }
  0xc4   :  { %2296 = vmatmul.mubr.bf16.vlgmr.msra.gmra.mxu1 %v581_v52  ;;  %2966 = vmatprep.subr.bf16.mxu0 %v3242_v51 }
  0xc5   :  { %10 = vsyncpa [#allocation3], 0  ;;  %3000 = vmatprep.mubr.msk.bf16.mxu1 %vm3243_vm0, %v3242_v51  ;;  %v3205_v54 = vld [vmem:[%s3975_s1 + $0x628] sm:$0xff]   ;;  %v3206_v55 = vld [vmem:[%s3975_s1 + $0x620] sm:$0xff]   ;;  %s3244_s17 = smov [#allocation2]  }
  0xc6   :  { %v3207_v56 = vld [vmem:[%s3975_s1 + $0x618] sm:$0xff]   ;;  %v3208_v57 = vld [vmem:[%s3975_s1 + $0x610] sm:$0xff]   ;;  %v3209_v58 = vld [vmem:[%s3975_s1 + $0x608] sm:$0xff]   ;;  %s2463_s18 = sshll.u32 %s3244_s17, 4  ;;  %s2464_s18 = int_to_ptr.vmem [resolvable:$true] %s2463_s18 }
  0xc7   :  { %2967 = vmatpush3.bf16.msra.mxu0 %v3204_v53  ;;  %v3210_v59 = vld [vmem:[%s3975_s1 + $0x600] sm:$0xff]   ;;  %v2472_v60 = vld.sshfl [vmem:[%s3974_s0 + $0x18] sm:$0x1 pattern:$0x75316420]  ;;  %v3212_v23 = vld [vmem:[%s3977_s3 + $0x30] sm:$0xff]   ;;  %p3224_p1 = scmp.lt.s32.totalorder %s2464_s18, %s2464_s18 }
  0xc8   :  { %2968 = vmatprep.subr.bf16.mxu0 %v3242_v51  ;;  %v597_v61 = vrot.slane %v2472_v60, %v3380_v41  ;;  %v2471_v63 = vld [vmem:[%s3976_s2] ss:$0 sm:$0xff]  ;;  %v3211_v20 = vld [vmem:[%s3977_s3 + $0x38] sm:$0xff]   ;;  %v3213_v24 = vld [vmem:[%s3977_s3 + $0x28] sm:$0xff]   ;;  %s3219_s19 = scalar_lea.vmem %s2464_s18, 32 }
  0xc9   :  { %2985 = vmatpush3.bf16.msra.mxu1 %v3211_v20  ;;  %v3214_v25 = vld [vmem:[%s3977_s3 + $0x20] sm:$0xff]   ;;  %v3215_v26 = vld [vmem:[%s3977_s3 + $0x18] sm:$0xff]   ;;  %v3216_v27 = vld [vmem:[%s3977_s3 + $0x10] sm:$0xff]   ;;  %p3220_p0 = scmp.ne.s32.totalorder %s2464_s18, %s3219_s19  ;;  %p3225_p2 = scmp.lt.s32.totalorder %s3219_s19, %s3219_s19 }
  0xca   :  { %2986 = vmatprep.subr.bf16.mxu1 %v3242_v51  ;;  %v3217_v28 = vld [vmem:[%s3977_s3 + $0x8] sm:$0xff]   ;;  %v3218_v32 = vld [vmem:[%s3977_s3] sm:$0xff]  }
  0xcb   :  { %2969 = vmatpush3.bf16.msra.mxu0 %v3205_v54  ;;  %p3226_p3 = por %p3225_p2, %p3224_p1 }
  0xcc   :  { %2970 = vmatprep.subr.bf16.mxu0 %v3242_v51 }
  0xcd   :  { %2987 = vmatpush3.bf16.msra.mxu1 %v3212_v23  ;;  %p3227_p4 = pnand %p3226_p3, %p3220_p0 }
  0xce   :  { %2988 = vmatprep.subr.bf16.mxu1 %v3242_v51 }
  0xcf   :  { %2971 = vmatpush3.bf16.msra.mxu0 %v3206_v55 }
  0xd0   :  { %2972 = vmatprep.subr.bf16.mxu0 %v3242_v51 }
  0xd1   :  { %2989 = vmatpush3.bf16.msra.mxu1 %v3213_v24 }
  0xd2   :  { %2990 = vmatprep.subr.bf16.mxu1 %v3242_v51 }
  0xd3   :  { %2973 = vmatpush3.bf16.msra.mxu0 %v3207_v56 }
  0xd4   :  { %2974 = vmatprep.subr.bf16.mxu0 %v3242_v51 }
  0xd5   :  { %2991 = vmatpush3.bf16.msra.mxu1 %v3214_v25 }
  0xd6   :  { %2992 = vmatprep.subr.bf16.mxu1 %v3242_v51 }
  0xd7   :  { %2975 = vmatpush3.bf16.msra.mxu0 %v3208_v57 }
  0xd8   :  { %2976 = vmatprep.subr.bf16.mxu0 %v3242_v51 }
  0xd9   :  { %2993 = vmatpush3.bf16.msra.mxu1 %v3215_v26 }
  0xda   :  { %2994 = vmatprep.subr.bf16.mxu1 %v3242_v51 }
  0xdb   :  { %2977 = vmatpush3.bf16.msra.mxu0 %v3209_v58 }
  0xdc   :  { %2978 = vmatprep.subr.bf16.mxu0 %v3242_v51 }
  0xdd   :  { %2995 = vmatpush3.bf16.msra.mxu1 %v3216_v27 }
  0xde   :  { %2996 = vmatprep.subr.bf16.mxu1 %v3242_v51 }
  0xdf   :  { %2979 = vmatpush3.bf16.msra.mxu0 %v3210_v59 }
  0xe1   :  { %2997 = vmatpush3.bf16.msra.mxu1 %v3217_v28 }
  0xe2   :  { %v2698_v62 = vpop.f32.mrf.mxu0  ;;  %2981 = vmatmul.mubr.bf16.vlgmr.msra.gmra.mxu0 %v597_v61  ;;  %2998 = vmatprep.subr.bf16.mxu1 %v3242_v51 }
  0xe4   :  { %v2699_v0 = vpop.f32.mrf.mxu0  ;;  %v2720_v1 = vpop.f32.mrf.mxu1 }
  0xe5   :  { %v2700_v2 = vadd.f32 %v2699_v0, %v2698_v62  ;;  %2999 = vmatpush3.bf16.msra.mxu1 %v3218_v32 }
  0xe6   :  { %v2701_v3 = vpop.f32.mrf.mxu0  ;;  %v2721_v4 = vpop.f32.mrf.mxu1 }
  0xe7   :  { %v1858_v5 = vadd.f32 %v2700_v2, %v2471_v63  ;;  %v2722_v6 = vadd.f32 %v2721_v4, %v2720_v1 }
  0xe8   :  { %v2702_v7 = vpop.f32.mrf.mxu0  ;;  %v2723_v8 = vpop.f32.mrf.mxu1 }
  0xe9   :  { %v1898_v9 = vadd.f32 %v2722_v6, %v1858_v5 }
  0xea   :  { %v2724_v10 = vpop.f32.mrf.mxu1 }
 0x102   :  { %v2742_v11 = vpop.f32.mrf.mxu0 }
 0x104   :  { %v2743_v41 = vpop.f32.mrf.mxu0  ;;  %v2764_v12 = vpop.f32.mrf.mxu1 }
 0x105   :  { %v2744_v13 = vadd.f32 %v2743_v41, %v2742_v11 }
 0x106   :  { %v2745_v14 = vpop.f32.mrf.mxu0  ;;  %v2765_v15 = vpop.f32.mrf.mxu1 }
 0x107   :  { %v1938_v16 = vadd.f32 %v2744_v13, %v1898_v9  ;;  %v2766_v17 = vadd.f32 %v2765_v15, %v2764_v12 }
 0x108   :  { %v2746_v18 = vpop.f32.mrf.mxu0  ;;  %v2767_v19 = vpop.f32.mrf.mxu1 }
 0x109   :  { %v1978_v21 = vadd.f32 %v2766_v17, %v1938_v16 }
 0x10a   :  { %v2768_v22 = vpop.f32.mrf.mxu1 }
 0x122   :  { %v2786_v29 = vpop.f32.mrf.mxu0 }
 0x124   :  { %v2787_v30 = vpop.f32.mrf.mxu0  ;;  %v2808_v31 = vpop.f32.mrf.mxu1 }
 0x125   :  { %v2788_v33 = vadd.f32 %v2787_v30, %v2786_v29 }
 0x126   :  { %v2789_v34 = vpop.f32.mrf.mxu0  ;;  %v2809_v35 = vpop.f32.mrf.mxu1 }
 0x127   :  { %v2018_v36 = vadd.f32 %v2788_v33, %v1978_v21  ;;  %v2810_v37 = vadd.f32 %v2809_v35, %v2808_v31  ;;  %v2673_v21 = vld [vmem:[%s3978_s4] ss:$0 sm:$0xff] }
 0x128   :  { %v2790_v38 = vpop.f32.mrf.mxu0  ;;  %v2811_v39 = vpop.f32.mrf.mxu1 }
 0x129   :  { %v2058_v40 = vadd.f32 %v2810_v37, %v2018_v36 }
 0x12a   :  { %v2812_v42 = vpop.f32.mrf.mxu1 }
 0x142   :  { %v2830_v43 = vpop.f32.mrf.mxu0 }
 0x144   :  { %v2831_v44 = vpop.f32.mrf.mxu0  ;;  %v2852_v45 = vpop.f32.mrf.mxu1 }
 0x145   :  { %v2832_v46 = vadd.f32 %v2831_v44, %v2830_v43 }
 0x146   :  { %v2833_v47 = vpop.f32.mrf.mxu0  ;;  %v2853_v48 = vpop.f32.mrf.mxu1 }
 0x147   :  { %v2098_v49 = vadd.f32 %v2832_v46, %v2058_v40  ;;  %v2854_v50 = vadd.f32 %v2853_v48, %v2852_v45 }
 0x148   :  { %v2834_v51 = vpop.f32.mrf.mxu0  ;;  %v2855_v52 = vpop.f32.mrf.mxu1 }
 0x149   :  { %v2138_v53 = vadd.f32 %v2854_v50, %v2098_v49 }
 0x14a   :  { %v2856_v54 = vpop.f32.mrf.mxu1 }
 0x162   :  { %v2874_v55 = vpop.f32.mrf.mxu0 }
 0x164   :  { %v2875_v56 = vpop.f32.mrf.mxu0  ;;  %v2896_v57 = vpop.f32.mrf.mxu1 }
 0x165   :  { %v2876_v7 = vadd.f32 %v2875_v56, %v2874_v55 }
 0x166   :  { %v2877_v58 = vpop.f32.mrf.mxu0  ;;  %v2897_v59 = vpop.f32.mrf.mxu1 }
 0x167   :  { %v2178_v8 = vadd.f32 %v2876_v7, %v2138_v53  ;;  %v2898_v9 = vadd.f32 %v2897_v59, %v2896_v57 }
 0x168   :  { %v2878_v60 = vpop.f32.mrf.mxu0  ;;  %v2899_v61 = vpop.f32.mrf.mxu1 }
 0x169   :  { %v2218_v11 = vadd.f32 %v2898_v9, %v2178_v8 }
 0x16a   :  { %v2900_v62 = vpop.f32.mrf.mxu1 }
 0x182   :  { %v2918_v63 = vpop.f32.mrf.mxu0 }
 0x184   :  { %v2919_v0 = vpop.f32.mrf.mxu0  ;;  %v2940_v1 = vpop.f32.mrf.mxu1 }
 0x185   :  { %v2920_v10 = vadd.f32 %v2919_v0, %v2918_v63 }
 0x186   :  { %v2921_v2 = vpop.f32.mrf.mxu0  ;;  %v2941_v3 = vpop.f32.mrf.mxu1 }
 0x187   :  { %v2258_v41 = vadd.f32 %v2920_v10, %v2218_v11  ;;  %v2942_v12 = vadd.f32 %v2941_v3, %v2940_v1 }
 0x188   :  { %v2922_v4 = vpop.f32.mrf.mxu0  ;;  %v2943_v5 = vpop.f32.mrf.mxu1 }
 0x189   :  { %v2298_v13 = vadd.f32 %v2942_v12, %v2258_v41 }
 0x18a   :  { %v2944_v6 = vpop.f32.mrf.mxu1 }
 0x1a2   :  { %v2337_v14 = vpop.f32.mrf.mxu0 }
 0x1a3   :  { %v2338_v15 = vadd.f32 %v2337_v14, %v2298_v13 }
 0x1a4   :  { %v2982_v16 = vpop.f32.mrf.mxu0 }
 0x1a5   :  { %v2343_v17 = vmax.f32 %v2338_v15, 0.0 }
 0x1a6   :  { %v2340_v18 = vpop.f32.mrf.mxu0 }
 0x1a7   :  { %v2344_v19 = vpack.c.bf16 %v2343_v17, %v2343_v17 }
 0x1a8   :  { %v2983_v20 = vpop.f32.mrf.mxu0 }
 0x1a9   :  { %3001 = vmatmul.mubr.bf16.vlgmr.msra.gmra.mxu1 %v2344_v19 }
 0x269   :  { %v2450_v22 = vpop.f32.mrf.mxu1 }
 0x26a   :  { %v2451_v23 = vadd.f32 %v2673_v21, %v2450_v22 }
 0x26b   :  { %v3002_v24 = vpop.f32.mrf.mxu1 }
 0x26c   :  { %2456 = vst [vmem:[#allocation2] sm:$0x3] %v2451_v23 }
 0x26d   :  { %v2453_v25 = vpop.f32.mrf.mxu1 }
 0x26e   :  { %3230 = shalt.err (!%p3227_p4)
}
 0x26f   :  { %2466 = dma.vmem_to_hbm [thread:$0]  %s2464_s18, 32, %s3979_s5, [#allocation3]   ;;  %v3003_v26 = vpop.f32.mrf.mxu1 }
 0x270   :  { %3239 = dma.done.wait [#allocation3], 32  }
 0x271   :  { %3240 = vsyncadd [#allocation3], 4294967264 }
 0x272   :  { %2470 = vsyncpa [#allocation3], 1 }

</bundles_post_ra>
